<compile_context>
chip_gen: v7x
topology: tpu7x:2x2x1
jax: 0.10.0
libtpu: 0.0.40
codegen_flags: <defaults>
</compile_context>

<pallas_src>
import math
import functools

import numpy as np
import jax
import jax.numpy as jnp
from jax import lax
from jax.experimental import pallas as pl
from jax.experimental.pallas import tpu as pltpu


# ----------------------------- tiled linear ----------------------------------
def _linear_kernel(x_ref, w_ref, b_ref, o_ref, acc_ref):
    @pl.when(pl.program_id(2) == 0)
    def _():
        acc_ref[...] = jnp.zeros(acc_ref.shape, acc_ref.dtype)

    # bf16 cast folded into the kernel (no separate HBM cast pass for f32 x)
    acc_ref[...] += jnp.dot(x_ref[...].astype(jnp.bfloat16), w_ref[...],
                            preferred_element_type=jnp.float32)

    @pl.when(pl.program_id(2) == pl.num_programs(2) - 1)
    def _():
        o_ref[...] = (acc_ref[...] + b_ref[...]).astype(o_ref.dtype)


def _pick_tile(dim, pref, align):
    """Largest tile <= pref that divides dim and is a multiple of `align`
    (falls back to the full dim, which is always a legal block)."""
    if dim <= pref:
        return dim
    t = (pref // align) * align
    while t >= align:
        if dim % t == 0:
            return t
        t -= align
    return dim


def linear(x, w, b, *, out_dtype=jnp.float32, tm=512, tn=512, tk=512):
    """x:(M,K) @ w:(K,N) + b:(N,) -- tiled bf16 MXU matmul, f32 accumulation.
    x may be f32 or bf16; the bf16 cast happens per-block inside the kernel."""
    M, K = x.shape
    _, N = w.shape
    tm = _pick_tile(M, tm, 16)     # 16: bf16-safe sublane tile
    tn = _pick_tile(N, tn, 128)
    tk = _pick_tile(K, tk, 128)
    grid = (M // tm, N // tn, K // tk)

    out_isz = jnp.dtype(out_dtype).itemsize
    vmem_bytes = (2 * tm * tk * x.dtype.itemsize      # double-buffered x blocks
                  + 2 * tk * tn * w.dtype.itemsize    # double-buffered w blocks
                  + 2 * tm * tn * out_isz             # double-buffered out blocks
                  + tm * tn * 4                       # f32 accumulator
                  + 2 * tn * 4)                       # bias
    vmem_limit = int(min(100 * 2**20, max(32 * 2**20, int(vmem_bytes * 1.5))))

    bytes_accessed = (M * K * x.dtype.itemsize * (N // tn)
                      + K * N * w.dtype.itemsize * (M // tm)
                      + M * N * out_isz)
    return pl.pallas_call(
        _linear_kernel,
        out_shape=jax.ShapeDtypeStruct((M, N), out_dtype),
        grid_spec=pltpu.PrefetchScalarGridSpec(
            num_scalar_prefetch=0,
            grid=grid,
            in_specs=[
                pl.BlockSpec((tm, tk), lambda i, j, k: (i, k)),
                pl.BlockSpec((tk, tn), lambda i, j, k: (k, j)),
                pl.BlockSpec((1, tn), lambda i, j, k: (0, j)),
            ],
            out_specs=pl.BlockSpec((tm, tn), lambda i, j, k: (i, j)),
            scratch_shapes=[pltpu.VMEM((tm, tn), jnp.float32)],
        ),
        compiler_params=pltpu.CompilerParams(
            dimension_semantics=("parallel", "parallel", "arbitrary"),
            vmem_limit_bytes=vmem_limit),
        cost_estimate=pl.CostEstimate(
            flops=2 * M * N * K, transcendentals=0,
            bytes_accessed=int(bytes_accessed)),
    )(x, w, b.reshape(1, N).astype(jnp.float32))


# --------------------------- flash attention kernel ---------------------------
def _flash_attn_kernel(half, scale,                         # static (partial-bound)
                       qi_s, ki_s, mk_s, last_s,            # scalar prefetch (SMEM)
                       q_ref, k_ref, v_ref,                 # (1,tq,hd)/(1,tk,hd) bf16
                       cos_ref, sin_ref,                    # (T, hd) f32, VMEM-resident
                       o_ref,                               # (1, tq, hd) bf16
                       q_scr, m_scr, l_scr, acc_scr):
    s_idx = pl.program_id(2)
    qi = qi_s[s_idx]
    ki = ki_s[s_idx]
    needs_mask = mk_s[s_idx]
    is_last = last_s[s_idx]

    tq, hd = q_scr.shape
    tk = k_ref.shape[1]
    hd2 = hd // 2

    # ki == 0 is always the first scheduled step of every query tile.
    @pl.when(ki == 0)
    def _():
        row0 = pl.multiple_of(qi * tq, 8)
        cos_q = cos_ref[pl.ds(row0, tq), :]
        sin_q = sin_ref[pl.ds(row0, tq), :]
        # rotary on lane-dense [evens | odds] layout:
        #   q_rot = q * [cos|cos] + roll(q, hd/2) * [-sin|sin]
        q = q_ref[0].astype(jnp.float32)
        q_rot = q * cos_q + pltpu.roll(q, hd2, 1) * sin_q
        q_scr[...] = (q_rot * scale).astype(jnp.bfloat16)
        m_scr[...] = jnp.full(m_scr.shape, -jnp.inf, m_scr.dtype)
        l_scr[...] = jnp.zeros(l_scr.shape, l_scr.dtype)
        acc_scr[...] = jnp.zeros(acc_scr.shape, acc_scr.dtype)

    col0 = pl.multiple_of(ki * tk, 8)
    cos_k = cos_ref[pl.ds(col0, tk), :]
    sin_k = sin_ref[pl.ds(col0, tk), :]
    k = k_ref[0].astype(jnp.float32)
    k_rot = (k * cos_k + pltpu.roll(k, hd2, 1) * sin_k).astype(jnp.bfloat16)

    def flash_update(s):
        m_prev = m_scr[...]
        m_new = jnp.maximum(m_prev, s.max(axis=-1, keepdims=True))
        alpha = jnp.exp(m_prev - m_new)
        p = jnp.exp(s - m_new)
        l_scr[...] = alpha * l_scr[...] + p.sum(axis=-1, keepdims=True)
        acc_scr[...] = alpha * acc_scr[...] + jnp.dot(
            p.astype(jnp.bfloat16), v_ref[0], preferred_element_type=jnp.float32)
        m_scr[...] = m_new

    # fully-visible tile: no iota / compare / select at all
    @pl.when(needs_mask == 0)
    def _():
        s = lax.dot_general(q_scr[...], k_rot, (((1,), (1,)), ((), ())),
                            preferred_element_type=jnp.float32)      # (tq, tk)
        flash_update(s)

    # boundary tile: mask built from (tq,1) and (1,tk) iotas (broadcast compares)
    @pl.when(needs_mask == 1)
    def _():
        s = lax.dot_general(q_scr[...], k_rot, (((1,), (1,)), ((), ())),
                            preferred_element_type=jnp.float32)      # (tq, tk)
        row = qi * tq + lax.broadcasted_iota(jnp.int32, (tq, 1), 0)
        col = ki * tk + lax.broadcasted_iota(jnp.int32, (1, tk), 1)
        visible = (col <= row) | ((row < half) & (col < half))
        s = jnp.where(visible, s, -1e30)                             # finite: no NaN
        flash_update(s)

    @pl.when(is_last == 1)
    def _():
        o_ref[0] = (acc_scr[...] *
                    pl.reciprocal(l_scr[...], approx=True)).astype(o_ref.dtype)


# ----------------------- host-side (trace-time) schedule ----------------------
def _build_schedule(T, tq, tk, half):
    """Enumerate only the (qi, ki) tiles with at least one visible mask entry,
    in qi-major / ki-ascending order.  Returns int32 arrays:
    qi, ki, needs_mask (0 = fully visible), is_last (last scheduled ki of qi)."""
    nq, nk = T // tq, T // tk
    qi_l, ki_l, mk_l, last_l = [], [], [], []
    for qi in range(nq):
        r = np.arange(qi * tq, (qi + 1) * tq)
        steps = []
        for ki in range(nk):
            c0 = ki * tk
            c1 = c0 + tk - 1
            row_any = (c0 <= r) | ((r < half) & (c0 < half))
            row_all = (c1 <= r) | ((r < half) & (c1 < half))
            if bool(row_any.any()):
                steps.append((ki, 0 if bool(row_all.all()) else 1))
        assert steps and steps[0][0] == 0          # ki=0 is always visible (col 0)
        for idx, (ki, nm) in enumerate(steps):
            qi_l.append(qi)
            ki_l.append(ki)
            mk_l.append(nm)
            last_l.append(1 if idx == len(steps) - 1 else 0)
    return (np.asarray(qi_l, np.int32), np.asarray(ki_l, np.int32),
            np.asarray(mk_l, np.int32), np.asarray(last_l, np.int32))


# ------------------------- one-time parameter prep ----------------------------
def _deinterleave_perm(C, n_head):
    """Column permutation of w_attn so q/k come out per-head as [evens|odds]."""
    hd = C // n_head
    perm = []
    for sec in range(3):
        base = sec * C
        if sec < 2:                      # q, k sections: de-interleave per head
            for h in range(n_head):
                hb = base + h * hd
                perm.extend(range(hb, hb + hd, 2))        # even channels
                perm.extend(range(hb + 1, hb + hd, 2))    # odd channels
        else:                            # v keeps original interleaved layout
            perm.extend(range(base, base + C))
    return np.asarray(perm, dtype=np.int32)


def prepare_params(w_attn, b_attn, w_proj, b_proj, cos, sin, n_head):
    """One-time prep: fold the rotary even/odd de-interleave into w_attn columns,
    cast weights to bf16, and build lane-dense (T, hd) rotary tables."""
    C = w_attn.shape[0]
    perm = _deinterleave_perm(C, n_head)
    return dict(
        w_attn=jnp.asarray(w_attn)[:, perm].astype(jnp.bfloat16),
        b_attn=jnp.asarray(b_attn)[perm].astype(jnp.float32),
        w_proj=jnp.asarray(w_proj).astype(jnp.bfloat16),
        b_proj=jnp.asarray(b_proj).astype(jnp.float32),
        cos=jnp.concatenate([cos, cos], axis=-1).astype(jnp.float32),     # (T, hd)
        sin=jnp.concatenate([-sin, sin], axis=-1).astype(jnp.float32),    # (T, hd)
    )


# ------------------------------- full forward ---------------------------------
def causal_self_attention(x, params, n_head, *, visible_prefix=None,
                          q_block=256, kv_block=256,
                          lin_tm=512, lin_tn=512, lin_tk=512):
    """CausalSelfAttention.forward (dropout = 0).

    x: (B,T,C) f32 or bf16; params from prepare_params().  The attention mask
    is the module's mask (causal tril with a fully visible top-left
    (T//2, T//2) block), realized via a static tile schedule + in-kernel mask.
    """
    B, T, C = x.shape
    assert C % n_head == 0
    hd = C // n_head
    assert hd % 2 == 0
    # TODO(synk): support head_dim not a multiple of 128 (needs a padded or
    # per-head-array layout; current lane-dense qkv slicing requires hd % 128 == 0)
    assert hd % 128 == 0, "head_dim must be a multiple of 128 for lane-dense tiling"
    half = int(T // 2 if visible_prefix is None else visible_prefix)
    H = n_head

    # qkv projection (tiled bf16 matmul; f32 x cast to bf16 in-kernel)
    qkv = linear(x.reshape(B * T, C), params["w_attn"], params["b_attn"],
                 out_dtype=jnp.bfloat16, tm=lin_tm, tn=lin_tn, tk=lin_tk)
    qkv = qkv.reshape(B, T, 3 * C)

    tq = _pick_tile(T, q_block, 16)
    tk_a = _pick_tile(T, kv_block, 16)
    qi_np, ki_np, mk_np, last_np = _build_schedule(T, tq, tk_a, half)
    n_steps = int(qi_np.shape[0])
    qi_arr, ki_arr = jnp.asarray(qi_np), jnp.asarray(ki_np)
    mk_arr, last_arr = jnp.asarray(mk_np), jnp.asarray(last_np)

    scale = 1.0 / math.sqrt(hd)
    kernel = functools.partial(_flash_attn_kernel, half, scale)

    vmem_attn = (2 * T * hd * 4                      # resident cos/sin tables
                 + 2 * tq * hd * 2                   # q blocks (double buffered)
                 + 2 * 2 * tk_a * hd * 2             # k, v blocks
                 + 2 * tq * hd * 2                   # out blocks
                 + tq * hd * 2 + 2 * tq * 4 + tq * hd * 4)  # scratch
    vmem_limit = int(min(100 * 2**20, max(32 * 2**20, int(vmem_attn * 1.5))))

    flops = 4 * B * H * n_steps * tq * tk_a * hd
    bytes_accessed = (B * H * n_steps * (tq + 2 * tk_a) * hd * 2
                      + 2 * T * hd * 4 + B * T * C * 2)

    y = pl.pallas_call(
        kernel,
        out_shape=jax.ShapeDtypeStruct((B, T, C), jnp.bfloat16),
        grid_spec=pltpu.PrefetchScalarGridSpec(
            num_scalar_prefetch=4,
            grid=(B, H, n_steps),
            in_specs=[
                # q / k / v sliced straight out of the (B, T, 3C) qkv buffer,
                # block indices driven by the prefetched (qi, ki) schedule so
                # fully-masked tiles are never DMAed.
                pl.BlockSpec((1, tq, hd),
                             lambda b, h, s, qi, ki, mk, lst: (b, qi[s], h)),
                pl.BlockSpec((1, tk_a, hd),
                             lambda b, h, s, qi, ki, mk, lst: (b, ki[s], H + h)),
                pl.BlockSpec((1, tk_a, hd),
                             lambda b, h, s, qi, ki, mk, lst: (b, ki[s], 2 * H + h)),
                # rotary tables: constant index_map -> DMAed once, VMEM-resident
                pl.BlockSpec((T, hd), lambda b, h, s, *_: (0, 0)),
                pl.BlockSpec((T, hd), lambda b, h, s, *_: (0, 0)),
            ],
            out_specs=pl.BlockSpec((1, tq, hd),
                                   lambda b, h, s, qi, ki, mk, lst: (b, qi[s], h)),
            scratch_shapes=[
                pltpu.VMEM((tq, hd), jnp.bfloat16),   # rotated + scaled q tile
                pltpu.VMEM((tq, 1), jnp.float32),     # running max m
                pltpu.VMEM((tq, 1), jnp.float32),     # running denom l
                pltpu.VMEM((tq, hd), jnp.float32),    # output accumulator
            ],
        ),
        compiler_params=pltpu.CompilerParams(
            dimension_semantics=("parallel", "parallel", "arbitrary"),
            vmem_limit_bytes=vmem_limit),
        cost_estimate=pl.CostEstimate(
            flops=int(flops), transcendentals=int(B * H * n_steps * tq * tk_a),
            bytes_accessed=int(bytes_accessed)),
    )(qi_arr, ki_arr, mk_arr, last_arr, qkv, qkv, qkv, params["cos"], params["sin"])

    # output projection (tiled bf16 matmul, f32 output matching the reference)
    out = linear(y.reshape(B * T, C), params["w_proj"], params["b_proj"],
                 out_dtype=jnp.float32, tm=lin_tm, tn=lin_tn, tk=lin_tk)
    return out.reshape(B, T, C)


# ----------------------------- pure-JAX reference ------------------------------
def reference(x, w_attn, b_attn, w_proj, b_proj, attn_mask, cos, sin, n_head):
    B, T, C = x.shape
    hd = C // n_head
    qkv = x @ w_attn + b_attn
    q, k, v = jnp.split(qkv, 3, axis=-1)
    q = q.reshape(B, T, n_head, hd).transpose(0, 2, 1, 3)
    k = k.reshape(B, T, n_head, hd).transpose(0, 2, 1, 3)
    v = v.reshape(B, T, n_head, hd).transpose(0, 2, 1, 3)

    def rot(t):
        te, to = t[..., 0::2], t[..., 1::2]
        re = te * cos - to * sin
        im = te * sin + to * cos
        return jnp.stack([re, im], axis=-1).reshape(t.shape)

    q, k = rot(q), rot(k)
    s = jnp.einsum('bhqd,bhkd->bhqk', q, k) / math.sqrt(hd)
    s = jnp.where(attn_mask[None, None] > 0, s, -jnp.inf)
    p = jax.nn.softmax(s, axis=-1)
    y = jnp.einsum('bhqk,bhkd->bhqd', p, v)
    y = y.transpose(0, 2, 1, 3).reshape(B, T, C)
    return y @ w_proj + b_proj


if __name__ == "__main__":
    # small shapes consistent with the module, chosen so blocks are aligned and
    # the schedule exercises skipped / fully-visible / masked tiles plus
    # multi-step K accumulation in the linears:
    # B=2, T=128, n_embd=256, n_head=2 (head_dim=128).
    B, T, C, H = 2, 128, 256, 2
    hd = C // H

    key = jax.random.PRNGKey(0)
    k1, k2, k3, k4, k5 = jax.random.split(key, 5)
    x = jax.random.normal(k1, (B, T, C), jnp.float32)
    w_attn = jax.random.normal(k2, (C, 3 * C), jnp.float32) * 0.02   # c_attn.weight^T
    b_attn = jax.random.normal(k3, (3 * C,), jnp.float32) * 0.02     # c_attn.bias
    w_proj = jax.random.normal(k4, (C, C), jnp.float32) * 0.02       # c_proj.weight^T
    b_proj = jax.random.normal(k5, (C,), jnp.float32) * 0.02         # c_proj.bias

    # rotary freqs_cis (T, hd/2) given as cos/sin
    inv_freq = 1.0 / (10000.0 ** (jnp.arange(0, hd, 2, dtype=jnp.float32) / hd))
    angles = jnp.outer(jnp.arange(T, dtype=jnp.float32), inv_freq)   # (T, hd/2)
    cos, sin = jnp.cos(angles), jnp.sin(angles)

    # one-time parameter prep (hoisted out of the forward)
    params = prepare_params(w_attn, b_attn, w_proj, b_proj, cos, sin, H)

    fwd = jax.jit(functools.partial(
        causal_self_attention, n_head=H,
        q_block=64, kv_block=64,            # multi-tile flash schedule per (b, h)
        lin_tm=128, lin_tn=256, lin_tk=128  # multi-tile M/N/K linear grids
    ))
    out = jax.block_until_ready(fwd(x, params))

    # reference with the module's mask: causal tril + visible top-left block
    mask = jnp.tril(jnp.ones((T, T), jnp.float32))
    mask = mask.at[:T // 2, :T // 2].set(1.0)
    ref = reference(x, w_attn, b_attn, w_proj, b_proj, mask, cos, sin, H)

    err = float(jnp.max(jnp.abs(out - ref)))
    assert jnp.allclose(out, ref, atol=2e-2, rtol=2e-2), f"max abs err {err}"

    print("KERNEL_OK")
</pallas_src>

<mosaic_0001>
module attributes {stable_mosaic.version = 11 : i64} {
  func.func @_linear_kernel(%arg0: i32, %arg1: i32, %arg2: i32, %arg3: memref<128x128xf32, #tpu.memory_space<vmem>>, %arg4: memref<128x256xbf16, #tpu.memory_space<vmem>>, %arg5: memref<1x256xf32, #tpu.memory_space<vmem>>, %arg6: memref<128x256xbf16, #tpu.memory_space<vmem>>, %arg7: memref<128x256xf32, #tpu.memory_space<vmem>>) attributes {dimension_semantics = [#tpu.dimension_semantics<parallel>, #tpu.dimension_semantics<parallel>, #tpu.dimension_semantics<arbitrary>], iteration_bounds = array<i64: 2, 3, 2>, scalar_prefetch = 0 : i64, scratch_operands = 1 : i64, tpu.core_type = #tpu.core_type<tc>, window_params = [{transform_indices = @transform_0, window_bounds = array<i64: 128, 128>}, {transform_indices = @transform_1, window_bounds = array<i64: 128, 256>}, {transform_indices = @transform_2, window_bounds = array<i64: 1, 256>}, {transform_indices = @transform_3, window_bounds = array<i64: 128, 256>}]} {
    %c0_i32 = arith.constant 0 : i32
    %0 = arith.cmpi eq, %arg2, %c0_i32 : i32
    %1 = arith.extui %0 : i1 to i32
    %c0_i32_0 = arith.constant 0 : i32
    %2 = arith.cmpi ne, %1, %c0_i32_0 : i32
    scf.if %2 {
      %cst_9 = arith.constant 0.000000e+00 : f32
      %13 = vector.broadcast %cst_9 : f32 to vector<128x256xf32>
      %c0_10 = arith.constant 0 : index
      %c0_11 = arith.constant 0 : index
      %14 = vector.load %arg7[%c0_10, %c0_11] : memref<128x256xf32, #tpu.memory_space<vmem>>, vector<128x256xf32>
      tpu.vector_store %arg7[%c0_10, %c0_11], %13 {strides = array<i32>} : memref<128x256xf32, #tpu.memory_space<vmem>>, vector<128x256xf32>,
    } else {
    }
    %c0 = arith.constant 0 : index
    %c0_1 = arith.constant 0 : index
    %3 = vector.load %arg7[%c0, %c0_1] : memref<128x256xf32, #tpu.memory_space<vmem>>, vector<128x256xf32>
    %c0_2 = arith.constant 0 : index
    %c0_3 = arith.constant 0 : index
    %4 = vector.load %arg3[%c0_2, %c0_3] : memref<128x128xf32, #tpu.memory_space<vmem>>, vector<128x128xf32>
    %5 = arith.truncf %4 : vector<128x128xf32> to vector<128x128xbf16>
    %c0_4 = arith.constant 0 : index
    %c0_5 = arith.constant 0 : index
    %6 = vector.load %arg4[%c0_4, %c0_5] : memref<128x256xbf16, #tpu.memory_space<vmem>>, vector<128x256xbf16>
    %cst = arith.constant dense<0.000000e+00> : vector<128x256xf32>
    %7 = tpu.matmul %5, %6, %cst {dimension_numbers = #tpu.dot_dimension_numbers<[1], [0], [0], [1], [0, 0, 1, 1], [], []>} : vector<128x128xbf16>, vector<128x256xbf16>, vector<128x256xf32> -> vector<128x256xf32>
    %8 = arith.addf %3, %7 : vector<128x256xf32>
    %c0_6 = arith.constant 0 : index
    %c0_7 = arith.constant 0 : index
    %9 = vector.load %arg7[%c0_6, %c0_7] : memref<128x256xf32, #tpu.memory_space<vmem>>, vector<128x256xf32>
    tpu.vector_store %arg7[%c0_6, %c0_7], %8 {strides = array<i32>} : memref<128x256xf32, #tpu.memory_space<vmem>>, vector<128x256xf32>,
    %c1_i32 = arith.constant 1 : i32
    %10 = arith.cmpi eq, %arg2, %c1_i32 : i32
    %11 = arith.extui %10 : i1 to i32
    %c0_i32_8 = arith.constant 0 : i32
    %12 = arith.cmpi ne, %11, %c0_i32_8 : i32
    scf.if %12 {
      %c0_9 = arith.constant 0 : index
      %c0_10 = arith.constant 0 : index
      %13 = vector.load %arg7[%c0_9, %c0_10] : memref<128x256xf32, #tpu.memory_space<vmem>>, vector<128x256xf32>
      %c0_11 = arith.constant 0 : index
      %c0_12 = arith.constant 0 : index
      %14 = vector.load %arg5[%c0_11, %c0_12] : memref<1x256xf32, #tpu.memory_space<vmem>>, vector<1x256xf32>
      %15 = vector.broadcast %14 : vector<1x256xf32> to vector<128x256xf32>
      %16 = arith.addf %13, %15 : vector<128x256xf32>
      %17 = arith.truncf %16 : vector<128x256xf32> to vector<128x256xbf16>
      %c0_13 = arith.constant 0 : index
      %c0_14 = arith.constant 0 : index
      %18 = vector.load %arg6[%c0_13, %c0_14] : memref<128x256xbf16, #tpu.memory_space<vmem>>, vector<128x256xbf16>
      tpu.vector_store %arg6[%c0_13, %c0_14], %17 {strides = array<i32>} : memref<128x256xbf16, #tpu.memory_space<vmem>>, vector<128x256xbf16>,
    } else {
    }
    return
  }
  func.func @transform_0(%arg0: i32, %arg1: i32, %arg2: i32) -> (i32, i32) {
    %c0_i32 = arith.constant 0 : i32
    return %arg0, %arg2 : i32, i32
  }
  func.func @transform_1(%arg0: i32, %arg1: i32, %arg2: i32) -> (i32, i32) {
    %c0_i32 = arith.constant 0 : i32
    return %arg2, %arg1 : i32, i32
  }
  func.func @transform_2(%arg0: i32, %arg1: i32, %arg2: i32) -> (i32, i32) {
    %c0_i32 = arith.constant 0 : i32
    %c0_i32_0 = arith.constant 0 : i32
    return %c0_i32, %arg1 : i32, i32
  }
  func.func @transform_3(%arg0: i32, %arg1: i32, %arg2: i32) -> (i32, i32) {
    %c0_i32 = arith.constant 0 : i32
    return %arg0, %arg1 : i32, i32
  }
}

module attributes {stable_mosaic.version = 11 : i64} {
  func.func @_flash_attn_kernel(%arg0: i32, %arg1: i32, %arg2: i32, %arg3: memref<3xi32, #tpu.memory_space<smem>>, %arg4: memref<3xi32, #tpu.memory_space<smem>>, %arg5: memref<3xi32, #tpu.memory_space<smem>>, %arg6: memref<3xi32, #tpu.memory_space<smem>>, %arg7: memref<1x64x128xbf16, #tpu.memory_space<vmem>>, %arg8: memref<1x64x128xbf16, #tpu.memory_space<vmem>>, %arg9: memref<1x64x128xbf16, #tpu.memory_space<vmem>>, %arg10: memref<128x128xf32, #tpu.memory_space<vmem>>, %arg11: memref<128x128xf32, #tpu.memory_space<vmem>>, %arg12: memref<1x64x128xbf16, #tpu.memory_space<vmem>>, %arg13: memref<64x128xbf16, #tpu.memory_space<vmem>>, %arg14: memref<64x1xf32, #tpu.memory_space<vmem>>, %arg15: memref<64x1xf32, #tpu.memory_space<vmem>>, %arg16: memref<64x128xf32, #tpu.memory_space<vmem>>) attributes {dimension_semantics = [#tpu.dimension_semantics<parallel>, #tpu.dimension_semantics<parallel>, #tpu.dimension_semantics<arbitrary>], iteration_bounds = array<i64: 2, 2, 3>, scalar_prefetch = 4 : i64, scratch_operands = 4 : i64, tpu.core_type = #tpu.core_type<tc>, window_params = [{transform_indices = @transform_0, window_bounds = array<i64: 1, 64, 128>}, {transform_indices = @transform_1, window_bounds = array<i64: 1, 64, 128>}, {transform_indices = @transform_2, window_bounds = array<i64: 1, 64, 128>}, {pipeline_mode = #tpu.pipeline_mode<synchronous>, transform_indices = @transform_3, window_bounds = array<i64: 128, 128>}, {pipeline_mode = #tpu.pipeline_mode<synchronous>, transform_indices = @transform_4, window_bounds = array<i64: 128, 128>}, {transform_indices = @transform_5, window_bounds = array<i64: 1, 64, 128>}]} {
    %0 = arith.index_cast %arg2 : i32 to index
    %1 = memref.load %arg3[%0] : memref<3xi32, #tpu.memory_space<smem>>
    %2 = arith.index_cast %arg2 : i32 to index
    %3 = memref.load %arg4[%2] : memref<3xi32, #tpu.memory_space<smem>>
    %4 = arith.index_cast %arg2 : i32 to index
    %5 = memref.load %arg5[%4] : memref<3xi32, #tpu.memory_space<smem>>
    %6 = arith.index_cast %arg2 : i32 to index
    %7 = memref.load %arg6[%6] : memref<3xi32, #tpu.memory_space<smem>>
    %c0_i32 = arith.constant 0 : i32
    %8 = arith.cmpi eq, %3, %c0_i32 : i32
    %9 = arith.extui %8 : i1 to i32
    %c0_i32_0 = arith.constant 0 : i32
    %10 = arith.cmpi ne, %9, %c0_i32_0 : i32
    scf.if %10 {
      %c64_i32_11 = arith.constant 64 : i32
      %34 = arith.muli %1, %c64_i32_11 : i32
      %35 = tpu.assume_multiple %34, 8 : i32
      %36 = arith.index_cast %35 : i32 to index
      %c0_12 = arith.constant 0 : index
      %37 = vector.load %arg10[%36, %c0_12] : memref<128x128xf32, #tpu.memory_space<vmem>>, vector<64x128xf32>
      %38 = arith.index_cast %35 : i32 to index
      %c0_13 = arith.constant 0 : index
      %39 = vector.load %arg11[%38, %c0_13] : memref<128x128xf32, #tpu.memory_space<vmem>>, vector<64x128xf32>
      %c0_14 = arith.constant 0 : index
      %c0_15 = arith.constant 0 : index
      %c0_16 = arith.constant 0 : index
      %40 = vector.load %arg7[%c0_14, %c0_15, %c0_16] : memref<1x64x128xbf16, #tpu.memory_space<vmem>>, vector<1x64x128xbf16>
      %41 = vector.shape_cast %40 : vector<1x64x128xbf16> to vector<64x128xbf16>
      %42 = arith.extf %41 : vector<64x128xbf16> to vector<64x128xf32>
      %43 = arith.mulf %42, %37 : vector<64x128xf32>
      %c64_i32_17 = arith.constant 64 : i32
      %44 = tpu.dynamic_rotate %42 by %c64_i32_17 dim 1 : vector<64x128xf32>, i32 -> vector<64x128xf32>
      %45 = arith.mulf %44, %39 : vector<64x128xf32>
      %46 = arith.addf %43, %45 : vector<64x128xf32>
      %cst = arith.constant 0.0883883461 : f32
      %47 = vector.broadcast %cst : f32 to vector<64x128xf32>
      %48 = arith.mulf %46, %47 : vector<64x128xf32>
      %49 = arith.truncf %48 : vector<64x128xf32> to vector<64x128xbf16>
      %c0_18 = arith.constant 0 : index
      %c0_19 = arith.constant 0 : index
      %50 = vector.load %arg13[%c0_18, %c0_19] : memref<64x128xbf16, #tpu.memory_space<vmem>>, vector<64x128xbf16>
      tpu.vector_store %arg13[%c0_18, %c0_19], %49 {strides = array<i32>} : memref<64x128xbf16, #tpu.memory_space<vmem>>, vector<64x128xbf16>,
      %cst_20 = arith.constant 0xFF800000 : f32
      %51 = vector.broadcast %cst_20 : f32 to vector<64x1xf32>
      %c0_21 = arith.constant 0 : index
      %c0_22 = arith.constant 0 : index
      %52 = vector.load %arg14[%c0_21, %c0_22] : memref<64x1xf32, #tpu.memory_space<vmem>>, vector<64x1xf32>
      tpu.vector_store %arg14[%c0_21, %c0_22], %51 {strides = array<i32>} : memref<64x1xf32, #tpu.memory_space<vmem>>, vector<64x1xf32>,
      %cst_23 = arith.constant 0.000000e+00 : f32
      %53 = vector.broadcast %cst_23 : f32 to vector<64x1xf32>
      %c0_24 = arith.constant 0 : index
      %c0_25 = arith.constant 0 : index
      %54 = vector.load %arg15[%c0_24, %c0_25] : memref<64x1xf32, #tpu.memory_space<vmem>>, vector<64x1xf32>
      tpu.vector_store %arg15[%c0_24, %c0_25], %53 {strides = array<i32>} : memref<64x1xf32, #tpu.memory_space<vmem>>, vector<64x1xf32>,
      %cst_26 = arith.constant 0.000000e+00 : f32
      %55 = vector.broadcast %cst_26 : f32 to vector<64x128xf32>
      %c0_27 = arith.constant 0 : index
      %c0_28 = arith.constant 0 : index
      %56 = vector.load %arg16[%c0_27, %c0_28] : memref<64x128xf32, #tpu.memory_space<vmem>>, vector<64x128xf32>
      tpu.vector_store %arg16[%c0_27, %c0_28], %55 {strides = array<i32>} : memref<64x128xf32, #tpu.memory_space<vmem>>, vector<64x128xf32>,
    } else {
    }
    %c64_i32 = arith.constant 64 : i32
    %11 = arith.muli %3, %c64_i32 : i32
    %12 = tpu.assume_multiple %11, 8 : i32
    %13 = arith.index_cast %12 : i32 to index
    %c0 = arith.constant 0 : index
    %14 = vector.load %arg10[%13, %c0] : memref<128x128xf32, #tpu.memory_space<vmem>>, vector<64x128xf32>
    %15 = arith.index_cast %12 : i32 to index
    %c0_1 = arith.constant 0 : index
    %16 = vector.load %arg11[%15, %c0_1] : memref<128x128xf32, #tpu.memory_space<vmem>>, vector<64x128xf32>
    %c0_2 = arith.constant 0 : index
    %c0_3 = arith.constant 0 : index
    %c0_4 = arith.constant 0 : index
    %17 = vector.load %arg8[%c0_2, %c0_3, %c0_4] : memref<1x64x128xbf16, #tpu.memory_space<vmem>>, vector<1x64x128xbf16>
    %18 = vector.shape_cast %17 : vector<1x64x128xbf16> to vector<64x128xbf16>
    %19 = arith.extf %18 : vector<64x128xbf16> to vector<64x128xf32>
    %20 = arith.mulf %19, %14 : vector<64x128xf32>
    %c64_i32_5 = arith.constant 64 : i32
    %21 = tpu.dynamic_rotate %19 by %c64_i32_5 dim 1 : vector<64x128xf32>, i32 -> vector<64x128xf32>
    %22 = arith.mulf %21, %16 : vector<64x128xf32>
    %23 = arith.addf %20, %22 : vector<64x128xf32>
    %24 = arith.truncf %23 : vector<64x128xf32> to vector<64x128xbf16>
    %c0_i32_6 = arith.constant 0 : i32
    %25 = arith.cmpi eq, %5, %c0_i32_6 : i32
    %26 = arith.extui %25 : i1 to i32
    %c0_i32_7 = arith.constant 0 : i32
    %27 = arith.cmpi ne, %26, %c0_i32_7 : i32
    scf.if %27 {
      %c0_11 = arith.constant 0 : index
      %c0_12 = arith.constant 0 : index
      %34 = vector.load %arg13[%c0_11, %c0_12] : memref<64x128xbf16, #tpu.memory_space<vmem>>, vector<64x128xbf16>
      %cst = arith.constant dense<0.000000e+00> : vector<64x64xf32>
      %35 = tpu.matmul %34, %24, %cst {dimension_numbers = #tpu.dot_dimension_numbers<[1], [1], [0], [0], [0, 0, 1, 0], [], []>} : vector<64x128xbf16>, vector<64x128xbf16>, vector<64x64xf32> -> vector<64x64xf32>
      %c0_13 = arith.constant 0 : index
      %c0_14 = arith.constant 0 : index
      %36 = vector.load %arg14[%c0_13, %c0_14] : memref<64x1xf32, #tpu.memory_space<vmem>>, vector<64x1xf32>
      %cst_15 = arith.constant dense<0xFF800000> : vector<64xf32>
      %37 = vector.multi_reduction <maximumf>, %35, %cst_15 [1] : vector<64x64xf32> to vector<64xf32>
      %38 = vector.shape_cast %37 : vector<64xf32> to vector<64x1xf32>
      %39 = arith.maximumf %36, %38 : vector<64x1xf32>
      %40 = arith.subf %36, %39 : vector<64x1xf32>
      %41 = math.exp %40 : vector<64x1xf32>
      %42 = vector.broadcast %39 : vector<64x1xf32> to vector<64x64xf32>
      %43 = arith.subf %35, %42 : vector<64x64xf32>
      %44 = math.exp %43 : vector<64x64xf32>
      %c0_16 = arith.constant 0 : index
      %c0_17 = arith.constant 0 : index
      %45 = vector.load %arg15[%c0_16, %c0_17] : memref<64x1xf32, #tpu.memory_space<vmem>>, vector<64x1xf32>
      %46 = arith.mulf %41, %45 : vector<64x1xf32>
      %cst_18 = arith.constant dense<0.000000e+00> : vector<64xf32>
      %47 = vector.multi_reduction <add>, %44, %cst_18 [1] : vector<64x64xf32> to vector<64xf32>
      %48 = vector.shape_cast %47 : vector<64xf32> to vector<64x1xf32>
      %49 = arith.addf %46, %48 : vector<64x1xf32>
      %c0_19 = arith.constant 0 : index
      %c0_20 = arith.constant 0 : index
      %50 = vector.load %arg15[%c0_19, %c0_20] : memref<64x1xf32, #tpu.memory_space<vmem>>, vector<64x1xf32>
      tpu.vector_store %arg15[%c0_19, %c0_20], %49 {strides = array<i32>} : memref<64x1xf32, #tpu.memory_space<vmem>>, vector<64x1xf32>,
      %c0_21 = arith.constant 0 : index
      %c0_22 = arith.constant 0 : index
      %51 = vector.load %arg16[%c0_21, %c0_22] : memref<64x128xf32, #tpu.memory_space<vmem>>, vector<64x128xf32>
      %52 = vector.broadcast %41 : vector<64x1xf32> to vector<64x128xf32>
      %53 = arith.mulf %52, %51 : vector<64x128xf32>
      %54 = arith.truncf %44 : vector<64x64xf32> to vector<64x64xbf16>
      %c0_23 = arith.constant 0 : index
      %c0_24 = arith.constant 0 : index
      %c0_25 = arith.constant 0 : index
      %55 = vector.load %arg9[%c0_23, %c0_24, %c0_25] : memref<1x64x128xbf16, #tpu.memory_space<vmem>>, vector<1x64x128xbf16>
      %56 = vector.shape_cast %55 : vector<1x64x128xbf16> to vector<64x128xbf16>
      %cst_26 = arith.constant dense<0.000000e+00> : vector<64x128xf32>
      %57 = tpu.matmul %54, %56, %cst_26 {dimension_numbers = #tpu.dot_dimension_numbers<[1], [0], [0], [1], [0, 0, 1, 1], [], []>} : vector<64x64xbf16>, vector<64x128xbf16>, vector<64x128xf32> -> vector<64x128xf32>
      %58 = arith.addf %53, %57 : vector<64x128xf32>
      %c0_27 = arith.constant 0 : index
      %c0_28 = arith.constant 0 : index
      %59 = vector.load %arg16[%c0_27, %c0_28] : memref<64x128xf32, #tpu.memory_space<vmem>>, vector<64x128xf32>
      tpu.vector_store %arg16[%c0_27, %c0_28], %58 {strides = array<i32>} : memref<64x128xf32, #tpu.memory_space<vmem>>, vector<64x128xf32>,
      %c0_29 = arith.constant 0 : index
      %c0_30 = arith.constant 0 : index
      %60 = vector.load %arg14[%c0_29, %c0_30] : memref<64x1xf32, #tpu.memory_space<vmem>>, vector<64x1xf32>
      tpu.vector_store %arg14[%c0_29, %c0_30], %39 {strides = array<i32>} : memref<64x1xf32, #tpu.memory_space<vmem>>, vector<64x1xf32>,
    } else {
    }
    %c1_i32 = arith.constant 1 : i32
    %28 = arith.cmpi eq, %5, %c1_i32 : i32
    %29 = arith.extui %28 : i1 to i32
    %c0_i32_8 = arith.constant 0 : i32
    %30 = arith.cmpi ne, %29, %c0_i32_8 : i32
    scf.if %30 {
      %c0_11 = arith.constant 0 : index
      %c0_12 = arith.constant 0 : index
      %34 = vector.load %arg13[%c0_11, %c0_12] : memref<64x128xbf16, #tpu.memory_space<vmem>>, vector<64x128xbf16>
      %cst = arith.constant dense<0.000000e+00> : vector<64x64xf32>
      %35 = tpu.matmul %34, %24, %cst {dimension_numbers = #tpu.dot_dimension_numbers<[1], [1], [0], [0], [0, 0, 1, 0], [], []>} : vector<64x128xbf16>, vector<64x128xbf16>, vector<64x64xf32> -> vector<64x64xf32>
      %c64_i32_13 = arith.constant 64 : i32
      %36 = arith.muli %1, %c64_i32_13 : i32
      %37 = tpu.iota {dimensions = array<i32: 0>} : vector<64x1xi32>
      %38 = vector.broadcast %36 : i32 to vector<64x1xi32>
      %39 = arith.addi %38, %37 : vector<64x1xi32>
      %c64_i32_14 = arith.constant 64 : i32
      %40 = arith.muli %3, %c64_i32_14 : i32
      %41 = tpu.iota {dimensions = array<i32: 1>} : vector<1x64xi32>
      %42 = vector.broadcast %40 : i32 to vector<1x64xi32>
      %43 = arith.addi %42, %41 : vector<1x64xi32>
      %44 = vector.broadcast %43 : vector<1x64xi32> to vector<64x64xi32>
      %45 = vector.broadcast %39 : vector<64x1xi32> to vector<64x64xi32>
      %46 = arith.cmpi sle, %44, %45 : vector<64x64xi32>
      %c64_i32_15 = arith.constant 64 : i32
      %47 = vector.broadcast %c64_i32_15 : i32 to vector<64x1xi32>
      %48 = arith.cmpi slt, %39, %47 : vector<64x1xi32>
      %c64_i32_16 = arith.constant 64 : i32
      %49 = vector.broadcast %c64_i32_16 : i32 to vector<1x64xi32>
      %50 = arith.cmpi slt, %43, %49 : vector<1x64xi32>
      %51 = vector.broadcast %48 : vector<64x1xi1> to vector<64x64xi1>
      %52 = vector.broadcast %50 : vector<1x64xi1> to vector<64x64xi1>
      %53 = arith.andi %51, %52 : vector<64x64xi1>
      %54 = arith.ori %46, %53 : vector<64x64xi1>
      %cst_17 = arith.constant -1.000000e+30 : f32
      %55 = vector.broadcast %cst_17 : f32 to vector<64x64xf32>
      %56 = arith.select %54, %35, %55 : vector<64x64xi1>, vector<64x64xf32>
      %c0_18 = arith.constant 0 : index
      %c0_19 = arith.constant 0 : index
      %57 = vector.load %arg14[%c0_18, %c0_19] : memref<64x1xf32, #tpu.memory_space<vmem>>, vector<64x1xf32>
      %cst_20 = arith.constant dense<0xFF800000> : vector<64xf32>
      %58 = vector.multi_reduction <maximumf>, %56, %cst_20 [1] : vector<64x64xf32> to vector<64xf32>
      %59 = vector.shape_cast %58 : vector<64xf32> to vector<64x1xf32>
      %60 = arith.maximumf %57, %59 : vector<64x1xf32>
      %61 = arith.subf %57, %60 : vector<64x1xf32>
      %62 = math.exp %61 : vector<64x1xf32>
      %63 = vector.broadcast %60 : vector<64x1xf32> to vector<64x64xf32>
      %64 = arith.subf %56, %63 : vector<64x64xf32>
      %65 = math.exp %64 : vector<64x64xf32>
      %c0_21 = arith.constant 0 : index
      %c0_22 = arith.constant 0 : index
      %66 = vector.load %arg15[%c0_21, %c0_22] : memref<64x1xf32, #tpu.memory_space<vmem>>, vector<64x1xf32>
      %67 = arith.mulf %62, %66 : vector<64x1xf32>
      %cst_23 = arith.constant dense<0.000000e+00> : vector<64xf32>
      %68 = vector.multi_reduction <add>, %65, %cst_23 [1] : vector<64x64xf32> to vector<64xf32>
      %69 = vector.shape_cast %68 : vector<64xf32> to vector<64x1xf32>
      %70 = arith.addf %67, %69 : vector<64x1xf32>
      %c0_24 = arith.constant 0 : index
      %c0_25 = arith.constant 0 : index
      %71 = vector.load %arg15[%c0_24, %c0_25] : memref<64x1xf32, #tpu.memory_space<vmem>>, vector<64x1xf32>
      tpu.vector_store %arg15[%c0_24, %c0_25], %70 {strides = array<i32>} : memref<64x1xf32, #tpu.memory_space<vmem>>, vector<64x1xf32>,
      %c0_26 = arith.constant 0 : index
      %c0_27 = arith.constant 0 : index
      %72 = vector.load %arg16[%c0_26, %c0_27] : memref<64x128xf32, #tpu.memory_space<vmem>>, vector<64x128xf32>
      %73 = vector.broadcast %62 : vector<64x1xf32> to vector<64x128xf32>
      %74 = arith.mulf %73, %72 : vector<64x128xf32>
      %75 = arith.truncf %65 : vector<64x64xf32> to vector<64x64xbf16>
      %c0_28 = arith.constant 0 : index
      %c0_29 = arith.constant 0 : index
      %c0_30 = arith.constant 0 : index
      %76 = vector.load %arg9[%c0_28, %c0_29, %c0_30] : memref<1x64x128xbf16, #tpu.memory_space<vmem>>, vector<1x64x128xbf16>
      %77 = vector.shape_cast %76 : vector<1x64x128xbf16> to vector<64x128xbf16>
      %cst_31 = arith.constant dense<0.000000e+00> : vector<64x128xf32>
      %78 = tpu.matmul %75, %77, %cst_31 {dimension_numbers = #tpu.dot_dimension_numbers<[1], [0], [0], [1], [0, 0, 1, 1], [], []>} : vector<64x64xbf16>, vector<64x128xbf16>, vector<64x128xf32> -> vector<64x128xf32>
      %79 = arith.addf %74, %78 : vector<64x128xf32>
      %c0_32 = arith.constant 0 : index
      %c0_33 = arith.constant 0 : index
      %80 = vector.load %arg16[%c0_32, %c0_33] : memref<64x128xf32, #tpu.memory_space<vmem>>, vector<64x128xf32>
      tpu.vector_store %arg16[%c0_32, %c0_33], %79 {strides = array<i32>} : memref<64x128xf32, #tpu.memory_space<vmem>>, vector<64x128xf32>,
      %c0_34 = arith.constant 0 : index
      %c0_35 = arith.constant 0 : index
      %81 = vector.load %arg14[%c0_34, %c0_35] : memref<64x1xf32, #tpu.memory_space<vmem>>, vector<64x1xf32>
      tpu.vector_store %arg14[%c0_34, %c0_35], %60 {strides = array<i32>} : memref<64x1xf32, #tpu.memory_space<vmem>>, vector<64x1xf32>,
    } else {
    }
    %c1_i32_9 = arith.constant 1 : i32
    %31 = arith.cmpi eq, %7, %c1_i32_9 : i32
    %32 = arith.extui %31 : i1 to i32
    %c0_i32_10 = arith.constant 0 : i32
    %33 = arith.cmpi ne, %32, %c0_i32_10 : i32
    scf.if %33 {
      %c0_11 = arith.constant 0 : index
      %c0_12 = arith.constant 0 : index
      %34 = vector.load %arg16[%c0_11, %c0_12] : memref<64x128xf32, #tpu.memory_space<vmem>>, vector<64x128xf32>
      %c0_13 = arith.constant 0 : index
      %c0_14 = arith.constant 0 : index
      %35 = vector.load %arg15[%c0_13, %c0_14] : memref<64x1xf32, #tpu.memory_space<vmem>>, vector<64x1xf32>
      %36 = tpu.reciprocal %35 {approx = true} : vector<64x1xf32> -> vector<64x1xf32>
      %37 = vector.broadcast %36 : vector<64x1xf32> to vector<64x128xf32>
      %38 = arith.mulf %34, %37 : vector<64x128xf32>
      %39 = arith.truncf %38 : vector<64x128xf32> to vector<64x128xbf16>
      %c0_15 = arith.constant 0 : index
      %c0_16 = arith.constant 0 : index
      %c0_17 = arith.constant 0 : index
      %40 = vector.load %arg12[%c0_15, %c0_16, %c0_17] : memref<1x64x128xbf16, #tpu.memory_space<vmem>>, vector<1x64x128xbf16>
      %41 = vector.shape_cast %40 : vector<1x64x128xbf16> to vector<64x128xbf16>
      %42 = vector.shape_cast %39 : vector<64x128xbf16> to vector<1x64x128xbf16>
      tpu.vector_store %arg12[%c0_15, %c0_16, %c0_17], %42 {strides = array<i32>} : memref<1x64x128xbf16, #tpu.memory_space<vmem>>, vector<1x64x128xbf16>,
    } else {
    }
    return
  }
  func.func @transform_0(%arg0: i32, %arg1: i32, %arg2: i32, %arg3: memref<3xi32, #tpu.memory_space<smem>>, %arg4: memref<3xi32, #tpu.memory_space<smem>>, %arg5: memref<3xi32, #tpu.memory_space<smem>>, %arg6: memref<3xi32, #tpu.memory_space<smem>>) -> (i32, i32, i32) {
    %0 = arith.index_cast %arg2 : i32 to index
    %1 = memref.load %arg3[%0] : memref<3xi32, #tpu.memory_space<smem>>
    %c0_i32 = arith.constant 0 : i32
    return %arg0, %1, %arg1 : i32, i32, i32
  }
  func.func @transform_1(%arg0: i32, %arg1: i32, %arg2: i32, %arg3: memref<3xi32, #tpu.memory_space<smem>>, %arg4: memref<3xi32, #tpu.memory_space<smem>>, %arg5: memref<3xi32, #tpu.memory_space<smem>>, %arg6: memref<3xi32, #tpu.memory_space<smem>>) -> (i32, i32, i32) {
    %0 = arith.index_cast %arg2 : i32 to index
    %1 = memref.load %arg4[%0] : memref<3xi32, #tpu.memory_space<smem>>
    %c2_i32 = arith.constant 2 : i32
    %2 = arith.addi %c2_i32, %arg1 : i32
    %c0_i32 = arith.constant 0 : i32
    return %arg0, %1, %2 : i32, i32, i32
  }
  func.func @transform_2(%arg0: i32, %arg1: i32, %arg2: i32, %arg3: memref<3xi32, #tpu.memory_space<smem>>, %arg4: memref<3xi32, #tpu.memory_space<smem>>, %arg5: memref<3xi32, #tpu.memory_space<smem>>, %arg6: memref<3xi32, #tpu.memory_space<smem>>) -> (i32, i32, i32) {
    %0 = arith.index_cast %arg2 : i32 to index
    %1 = memref.load %arg4[%0] : memref<3xi32, #tpu.memory_space<smem>>
    %c4_i32 = arith.constant 4 : i32
    %2 = arith.addi %c4_i32, %arg1 : i32
    %c0_i32 = arith.constant 0 : i32
    return %arg0, %1, %2 : i32, i32, i32
  }
  func.func @transform_3(%arg0: i32, %arg1: i32, %arg2: i32, %arg3: memref<3xi32, #tpu.memory_space<smem>>, %arg4: memref<3xi32, #tpu.memory_space<smem>>, %arg5: memref<3xi32, #tpu.memory_space<smem>>, %arg6: memref<3xi32, #tpu.memory_space<smem>>) -> (i32, i32) {
    %c0_i32 = arith.constant 0 : i32
    %c0_i32_0 = arith.constant 0 : i32
    %c0_i32_1 = arith.constant 0 : i32
    return %c0_i32, %c0_i32_0 : i32, i32
  }
  func.func @transform_4(%arg0: i32, %arg1: i32, %arg2: i32, %arg3: memref<3xi32, #tpu.memory_space<smem>>, %arg4: memref<3xi32, #tpu.memory_space<smem>>, %arg5: memref<3xi32, #tpu.memory_space<smem>>, %arg6: memref<3xi32, #tpu.memory_space<smem>>) -> (i32, i32) {
    %c0_i32 = arith.constant 0 : i32
    %c0_i32_0 = arith.constant 0 : i32
    %c0_i32_1 = arith.constant 0 : i32
    return %c0_i32, %c0_i32_0 : i32, i32
  }
  func.func @transform_5(%arg0: i32, %arg1: i32, %arg2: i32, %arg3: memref<3xi32, #tpu.memory_space<smem>>, %arg4: memref<3xi32, #tpu.memory_space<smem>>, %arg5: memref<3xi32, #tpu.memory_space<smem>>, %arg6: memref<3xi32, #tpu.memory_space<smem>>) -> (i32, i32, i32) {
    %0 = arith.index_cast %arg2 : i32 to index
    %1 = memref.load %arg3[%0] : memref<3xi32, #tpu.memory_space<smem>>
    %c0_i32 = arith.constant 0 : i32
    return %arg0, %1, %arg1 : i32, i32, i32
  }
}

module attributes {stable_mosaic.version = 11 : i64} {
  func.func @_linear_kernel(%arg0: i32, %arg1: i32, %arg2: i32, %arg3: memref<128x128xbf16, #tpu.memory_space<vmem>>, %arg4: memref<128x256xbf16, #tpu.memory_space<vmem>>, %arg5: memref<1x256xf32, #tpu.memory_space<vmem>>, %arg6: memref<128x256xf32, #tpu.memory_space<vmem>>, %arg7: memref<128x256xf32, #tpu.memory_space<vmem>>) attributes {dimension_semantics = [#tpu.dimension_semantics<parallel>, #tpu.dimension_semantics<parallel>, #tpu.dimension_semantics<arbitrary>], iteration_bounds = array<i64: 2, 1, 2>, scalar_prefetch = 0 : i64, scratch_operands = 1 : i64, tpu.core_type = #tpu.core_type<tc>, window_params = [{transform_indices = @transform_0, window_bounds = array<i64: 128, 128>}, {transform_indices = @transform_1, window_bounds = array<i64: 128, 256>}, {transform_indices = @transform_2, window_bounds = array<i64: 1, 256>}, {transform_indices = @transform_3, window_bounds = array<i64: 128, 256>}]} {
    %c0_i32 = arith.constant 0 : i32
    %0 = arith.cmpi eq, %arg2, %c0_i32 : i32
    %1 = arith.extui %0 : i1 to i32
    %c0_i32_0 = arith.constant 0 : i32
    %2 = arith.cmpi ne, %1, %c0_i32_0 : i32
    scf.if %2 {
      %cst_9 = arith.constant 0.000000e+00 : f32
      %12 = vector.broadcast %cst_9 : f32 to vector<128x256xf32>
      %c0_10 = arith.constant 0 : index
      %c0_11 = arith.constant 0 : index
      %13 = vector.load %arg7[%c0_10, %c0_11] : memref<128x256xf32, #tpu.memory_space<vmem>>, vector<128x256xf32>
      tpu.vector_store %arg7[%c0_10, %c0_11], %12 {strides = array<i32>} : memref<128x256xf32, #tpu.memory_space<vmem>>, vector<128x256xf32>,
    } else {
    }
    %c0 = arith.constant 0 : index
    %c0_1 = arith.constant 0 : index
    %3 = vector.load %arg7[%c0, %c0_1] : memref<128x256xf32, #tpu.memory_space<vmem>>, vector<128x256xf32>
    %c0_2 = arith.constant 0 : index
    %c0_3 = arith.constant 0 : index
    %4 = vector.load %arg3[%c0_2, %c0_3] : memref<128x128xbf16, #tpu.memory_space<vmem>>, vector<128x128xbf16>
    %c0_4 = arith.constant 0 : index
    %c0_5 = arith.constant 0 : index
    %5 = vector.load %arg4[%c0_4, %c0_5] : memref<128x256xbf16, #tpu.memory_space<vmem>>, vector<128x256xbf16>
    %cst = arith.constant dense<0.000000e+00> : vector<128x256xf32>
    %6 = tpu.matmul %4, %5, %cst {dimension_numbers = #tpu.dot_dimension_numbers<[1], [0], [0], [1], [0, 0, 1, 1], [], []>} : vector<128x128xbf16>, vector<128x256xbf16>, vector<128x256xf32> -> vector<128x256xf32>
    %7 = arith.addf %3, %6 : vector<128x256xf32>
    %c0_6 = arith.constant 0 : index
    %c0_7 = arith.constant 0 : index
    %8 = vector.load %arg7[%c0_6, %c0_7] : memref<128x256xf32, #tpu.memory_space<vmem>>, vector<128x256xf32>
    tpu.vector_store %arg7[%c0_6, %c0_7], %7 {strides = array<i32>} : memref<128x256xf32, #tpu.memory_space<vmem>>, vector<128x256xf32>,
    %c1_i32 = arith.constant 1 : i32
    %9 = arith.cmpi eq, %arg2, %c1_i32 : i32
    %10 = arith.extui %9 : i1 to i32
    %c0_i32_8 = arith.constant 0 : i32
    %11 = arith.cmpi ne, %10, %c0_i32_8 : i32
    scf.if %11 {
      %c0_9 = arith.constant 0 : index
      %c0_10 = arith.constant 0 : index
      %12 = vector.load %arg7[%c0_9, %c0_10] : memref<128x256xf32, #tpu.memory_space<vmem>>, vector<128x256xf32>
      %c0_11 = arith.constant 0 : index
      %c0_12 = arith.constant 0 : index
      %13 = vector.load %arg5[%c0_11, %c0_12] : memref<1x256xf32, #tpu.memory_space<vmem>>, vector<1x256xf32>
      %14 = vector.broadcast %13 : vector<1x256xf32> to vector<128x256xf32>
      %15 = arith.addf %12, %14 : vector<128x256xf32>
      %c0_13 = arith.constant 0 : index
      %c0_14 = arith.constant 0 : index
      %16 = vector.load %arg6[%c0_13, %c0_14] : memref<128x256xf32, #tpu.memory_space<vmem>>, vector<128x256xf32>
      tpu.vector_store %arg6[%c0_13, %c0_14], %15 {strides = array<i32>} : memref<128x256xf32, #tpu.memory_space<vmem>>, vector<128x256xf32>,
    } else {
    }
    return
  }
  func.func @transform_0(%arg0: i32, %arg1: i32, %arg2: i32) -> (i32, i32) {
    %c0_i32 = arith.constant 0 : i32
    return %arg0, %arg2 : i32, i32
  }
  func.func @transform_1(%arg0: i32, %arg1: i32, %arg2: i32) -> (i32, i32) {
    %c0_i32 = arith.constant 0 : i32
    return %arg2, %arg1 : i32, i32
  }
  func.func @transform_2(%arg0: i32, %arg1: i32, %arg2: i32) -> (i32, i32) {
    %c0_i32 = arith.constant 0 : i32
    %c0_i32_0 = arith.constant 0 : i32
    return %c0_i32, %arg1 : i32, i32
  }
  func.func @transform_3(%arg0: i32, %arg1: i32, %arg2: i32) -> (i32, i32) {
    %c0_i32 = arith.constant 0 : i32
    return %arg0, %arg1 : i32, i32
  }
}

</mosaic_0001>

<bundles_post_ra>
// kernel: causal_self_attention.3
= control target key start
LH: loop header
LB: loop body
LE: loop exit
PB: predicated region body
PF: predicated region fallthrough
CT: control target
= control target key end

     0   :  { %s2006_s0 = inlined_call_operand.hbm [shape: f32[256,256], index: 0, kind: input, shape index: {}]   ;;  %s2007_s1 = inlined_call_operand.hbm [shape: bf16[256,768], index: 1, kind: input, shape index: {}]   ;;  %s2008_s2 = inlined_call_operand.vmem [shape: f32[1,768], index: 2, kind: input, shape index: {}]   ;;  %s2009_s3 = inlined_call_operand.vmem [shape: bf16[256,768], index: 3, kind: output, shape index: {}]  }
   0x1   :  { %2021 = sst [smem:[#allocation18_spill]] %s2006_s0 }
   0x2   :  { %2022 = sst [smem:[#allocation19_spill]] %s2008_s2 }
   0x3   :  { %2023 = sst [smem:[#allocation20_spill]] %s2009_s3 }
   0x4   :  { %8 = vsyncpa [#allocation4], 0 }
   0x5   :  { %10 = vsyncpa [#allocation4 + $0x1], 0 }
   0x6   :  { %11 = vsyncpa [#allocation6], 0 }
   0x7   :  { %13 = vsyncpa [#allocation6 + $0x1], 0  ;;  %s1533_s12 = smov 0   ;;  %s1535_s13 = smov 0  }
   0x8   :  { %s1537_s14 = smov 0   ;;  %s1539_s15 = smov 0  }
   0x9   :  { %s1541_s16 = smov 0   ;;  %s1543_s17 = smov 0  }
   0xa   :  { %s1545_s18 = smov 0   ;;  %s1547_s19 = smov 0  }
   0xb   :  { %s1549_s20 = smov 0   ;;  %s1551_s21 = smov 0  }
   0xc   :  { %s1553_s22 = smov 0   ;;  %s1555_s23 = smov 0  }
   0xd   :  { %s1557_s24 = smov 0   ;;  %s1559_s25 = smov 0  }
   0xe   :  { %s1561_s26 = smov 0  }
   0xf LB: > { %2024 = sst [smem:[#allocation10_spill]] %s1447_s12  ;;  %s1061_s27 = sadd.s32 4294967295, %s1503_s26   ;;  %s1503_s26 = sphi %s1561_s26, %s19_s26   ;;  %s1499_s25 = sphi %s1559_s25, %s2081_s25   ;;  %s1495_s24 = sphi %s1557_s24, %s2080_s24   ;;  %s1491_s23 = sphi %s1555_s23, %s2079_s23   ;;  %s1487_s22 = sphi %s1553_s22, %s2078_s22   ;;  %s1483_s21 = sphi %s1551_s21, %s2077_s21   ;;  %s1479_s20 = sphi %s1549_s20, %s2076_s20   ;;  %s1475_s19 = sphi %s1547_s19, %s2075_s19   ;;  %s1471_s18 = sphi %s1545_s18, %s2074_s18   ;;  %s1467_s17 = sphi %s1543_s17, %s2073_s17   ;;  %s1463_s16 = sphi %s1541_s16, %s2072_s16   ;;  %s1459_s15 = sphi %s1539_s15, %s2071_s15   ;;  %s1455_s14 = sphi %s1537_s14, %s2070_s14   ;;  %s1451_s13 = sphi %s1535_s13, %s2069_s13   ;;  %s1447_s12 = sphi %s1533_s12, %s2068_s12  }
  0x10   : > { %2025 = sst [smem:[#allocation11_spill]] %s1479_s20  ;;  %s31_s28 = sadd.s32 1, %s1491_s23 }
  0x11   : > { %2026 = sst [smem:[#allocation12_spill]] %s1483_s21  ;;  %p1608_p0 = scmp.ge.s32.totalorder %s31_s28, 2 }
  0x12   : > { %2027 = sst [smem:[#allocation13_spill]] %s1487_s22  ;;  %p54_p1 = scmp.ne.s32.totalorder %s1475_s19, %s1471_s18 }
  0x13   : > { %s2083_s28 = smov (%p1608_p0, %s31_s28), 0  ;;  %p2012_p2 = scmp.eq.s32.totalorder %s1503_s26, 0 }
  0x14   : > { %2029 = sst [smem:[#allocation14_spill]] %s2083_s28  ;;  %p60_p3 = scmp.ne.s32.totalorder %s1471_s18, %s1467_s17 }
  0x15   : > { %s1624_s5 = ssub.s32 %s1491_s23, %s2083_s28  ;;  %p1626_p4 = scmp.eq.s32.totalorder %s1061_s27, 0 }
  0x16   : > { %p1632_p5 = por %p2012_p2, %p54_p1  ;;  %p1636_p6 = scmp.eq.s32.totalorder %s1061_s27, 11 }
  0x17   : > { %s2030_s6 = scalar_select %p1626_p4, 1, 0 }
  0x18   : > { %s2032_s8 = scalar_select %p1636_p6, 1, 0 }
  0x19   : > { %p1642_p7 = por %p1626_p4, %p60_p3  ;;  %p2011_p8 = scmp.lt.s32.totalorder %s1503_s26, 12 }
  0x1a   : > { %s166_s10 = sand.u32 1, %s1475_s19   ;;  %s1120_s17 = sshll.u32 %s1499_s25, 5 }
  0x1b   : > { %s2033_s9 = scalar_select %p1642_p7, 1, 0 }
  0x1c   : > { %s1065_s11 = sshll.u32 %s166_s10, 7  ;;  %s176_s4 = sadd.s32 %s1491_s23, %s1120_s17 }
  0x1d   : > { %s170_s30 = scalar_lea.vmem [#allocation3], %s1065_s11  ;;  %s1068_s3 = sshll.u32 %s176_s4, 7 }
  0x1e   : > { %s179_s28 = sshll.u32 %s170_s30, 4  ;;  %s2034_s0 = sld [smem:[#allocation18_spill]]  ;;  %s1650_s28 = int_to_ptr.vmem [resolvable:$true] %s179_s28 }
  0x1f   : > { %p1661_p9 = pnand %p2011_p8, %p1632_p5  ;;  %s1665_s30 = scalar_lea.sflag [#allocation4], %s166_s10 }
  0x21   : > { %p1319_p11 = pneg %p1661_p9 }
  0x24   : > { %s1655_s20 = scalar_lea.hbm %s2034_s0, %s1068_s3  ;;  %s1322_s7 = scalar_lea.hbm %s2034_s0, 8192 }
  0x25   : > { %s1317_s4 = scalar_lea.hbm %s1655_s20, 2048  ;;  %p1323_p1 = scmp.lt.u32.totalorder %s1655_s20, %s2034_s0 }
  0x26   : > { %p1318_p10 = scmp.ne.s32.totalorder %s1655_s20, %s1317_s4  ;;  %p1324_p3 = scmp.lt.u32.totalorder %s1322_s7, %s1317_s4 }
  0x27   : > { %p1326_p8 = scmp.lt.u32.totalorder %s1317_s4, %s1655_s20 }
  0x28   : > { %p1320_p12 = pnand %p1319_p11, %p1318_p10  ;;  %p1325_p5 = por %p1324_p3, %p1323_p1 }
  0x2a   : > { %p1321_p13 = pneg %p1320_p12  ;;  %p1327_p2 = por %p1326_p8, %p1325_p5 }
  0x2c   : > { %p1328_p7 = pnand %p1327_p2, %p1321_p13 }
  0x2e   : > { %1331 = shalt.err (!%p1328_p7)
}
  0x2f   : > { %s1332_s10 = scalar_lea.vmem %s1650_s28, 2048  ;;  %s1505_s27 = smov [#allocation3]  }
  0x30   : > { %p1333_p10 = scmp.ne.s32.totalorder %s1650_s28, %s1332_s10  ;;  %s1337_s3 = sshll.u32 %s1505_s27, 4  ;;  %s1338_s3 = int_to_ptr.vmem [resolvable:$false] %s1337_s3 }
  0x31   : > { %s1339_s22 = scalar_lea.vmem %s1338_s3, 4096  ;;  %p1340_p4 = scmp.lt.s32.totalorder %s1650_s28, %s1338_s3 }
  0x32   : > { %p1335_p12 = pnand %p1333_p10, %p1319_p11  ;;  %p1341_p1 = scmp.lt.s32.totalorder %s1339_s22, %s1332_s10 }
  0x34   : > { %p1336_p6 = pneg %p1335_p12  ;;  %p1342_p3 = por %p1341_p1, %p1340_p4 }
  0x36   : > { %p1343_p8 = pnand %p1342_p3, %p1336_p6 }
  0x38   : > { %1346 = shalt.err (!%p1343_p8)
}
  0x39   : > { %s1506_s4 = smov 256   ;;  %s2015_s7 = smov 128  }
  0x3a   : > { %s2016_s11 = smov 8   ;;  %p1074_p2 = scmp.ge.s32.totalorder %s1503_s26, 1 }
  0x3b   : > { %1162 = dma.hbm_to_vmem [thread:$0]  (!%p1661_p9), %s1655_s20, 2048, %s1650_s28, %s1665_s30, %s1506_s4, %s2015_s7, %s2016_s11  }
  0x3c   : > { %p219_p4 = scmp.lt.s32.totalorder %s1503_s26, 13  ;;  %s34_s10 = sadd.s32 1, %s1495_s24 }
  0x3d   : > { %s2085_s10 = smov (!%p1608_p0, %s34_s10), %s1495_s24  ;;  %s75_s27 = sadd.s32 1, %s1463_s16 }
  0x3e   : > { %p1697_p6 = pnand %p1074_p2, %p219_p4  ;;  %p82_p7 = scmp.ne.s32.totalorder %s1463_s16, %s1459_s15 }
  0x3f   : > { %p36_p11 = scmp.ge.s32.totalorder %s2085_s10, 3  ;;  %p88_p9 = scmp.ne.s32.totalorder %s1459_s15, %s1455_s14 }
  0x40   : > { %p2037_p13 = scmp.eq.s32.totalorder %s1503_s26, 0  ;;  %s129_s20 = sadd.s32 1, %s1451_s13 }
  0x41   : > { %s2087_s10 = smov (%p36_p11, %s2085_s10), 0  ;;  %s2040_s28 = sadd.s32 1, %s1499_s25 }
  0x42   : > { %p1712_p5 = por %p82_p7, %p2037_p13  ;;  %2039 = sst [smem:[#allocation15_spill]] %s2087_s10 }
  0x43   : > { %s2089_s28 = smov (!%p36_p11, %s2040_s28), %s1499_s25  ;;  %s71_s29 = ssub.s32 %s1495_s24, %s2087_s10 }
  0x44   : > { %p2041_p0 = scmp.ne.s32.totalorder %s2030_s6, 0  ;;  %p40_p12 = scmp.ge.s32.totalorder %s2089_s28, 2 }
  0x45   : > { %s72_s14 = sor.u32 %s71_s29, %s1624_s5  ;;  %p139_p3 = scmp.ne.s32.totalorder %s1451_s13, %s1447_s12 }
  0x46   : > { %p1726_p10 = por %p88_p9, %p2041_p0  ;;  %p73_p1 = scmp.eq.s32.totalorder %s72_s14, 0 }
  0x47   : > { %s2091_s28 = smov (%p40_p12, %s2089_s28), 0  ;;  %p2045_p8 = scmp.ne.s32.totalorder %s2032_s8, 0 }
  0x48   : > { %s2042_s30 = scalar_select %p1726_p10, 1, 0 }
  0x49   : > { %2043 = sst [smem:[#allocation16_spill]] %s2091_s28  ;;  %s42_s6 = ssub.s32 %s1499_s25, %s2091_s28 }
  0x4a   : > { %s1736_s3 = scalar_select %p73_p1, %s1463_s16, %s75_s27  }
  0x4b   : > { %p1742_p2 = por %p2045_p8, %p139_p3  ;;  %s44_s4 = sor.u32 %s1624_s5, %s42_s6 }
  0x4c   : > { %2044 = sst [smem:[#allocation17_spill]] %s1736_s3  ;;  %s126_s7 = sor.u32 %s71_s29, %s42_s6 }
  0x4d   : > { %s2046_s22 = scalar_select %p1742_p2, 1, 0 }
  0x4e   : > { %p45_p4 = scmp.eq.s32.totalorder %s44_s4, 0  ;;  %p127_p7 = scmp.eq.s32.totalorder %s126_s7, 0 }
  0x4f   : > { %s189_s11 = sand.u32 1, %s1463_s16   ;;  %s1071_s14 = sshll.u32 %s1495_s24, 1 }
  0x50   : > { %s2047_s0 = sadd.s32 1, %s1475_s19  ;;  %s1069_s12 = sshll.u32 %s189_s11, 7 }
  0x51   : > { %s1752_s10 = scalar_select %p45_p4, %s1475_s19, %s2047_s0  }
  0x52   : > { %s1755_s21 = scalar_select %p127_p7, %s1451_s13, %s129_s20  }
  0x53   : > { %s1153_s27 = smul.u32 96, %s1491_s23  ;;  %s193_s3 = scalar_lea.vmem [#allocation5], %s1069_s12 }
  0x54   : > { %s203_s28 = sshll.u32 %s193_s3, 4  ;;  %p2048_p11 = scmp.lt.s32.totalorder %s1503_s26, 12  ;;  %s1766_s28 = int_to_ptr.vmem [resolvable:$true] %s203_s28 }
  0x55   : > { %s200_s5 = sadd.s32 %s1153_s27, %s1071_s14  ;;  %s1773_s12 = scalar_lea.sflag [#allocation6], %s189_s11 }
  0x56   : > { %p1762_p9 = pnand %p2048_p11, %p1712_p5  ;;  %s1073_s7 = sshll.u32 %s200_s5, 6 }
  0x57   : > { %s1771_s20 = scalar_lea.hbm %s2007_s1, %s1073_s7  ;;  %s1352_s4 = scalar_lea.hbm %s2007_s1, 12288 }
  0x58   : > { %s1347_s2 = scalar_lea.hbm %s1771_s20, 2048  ;;  %p1349_p5 = pneg %p1762_p9 }
  0x59   : > { %p1348_p13 = scmp.ne.s32.totalorder %s1771_s20, %s1347_s2  ;;  %p1353_p1 = scmp.lt.u32.totalorder %s1771_s20, %s2007_s1 }
  0x5a   : > { %p1354_p3 = scmp.lt.u32.totalorder %s1352_s4, %s1347_s2  ;;  %p1356_p4 = scmp.lt.u32.totalorder %s1347_s2, %s1771_s20 }
  0x5b   : > { %p1350_p0 = pnand %p1349_p5, %p1348_p13 }
  0x5c   : > { %p1355_p8 = por %p1354_p3, %p1353_p1 }
  0x5d   : > { %p1351_p12 = pneg %p1350_p0 }
  0x5e   : > { %p1357_p7 = por %p1356_p4, %p1355_p8 }
  0x60   : > { %p1358_p11 = pnand %p1357_p7, %p1351_p12 }
  0x62   : > { %1361 = shalt.err (!%p1358_p11)
}
  0x63   : > { %s1362_s11 = scalar_lea.vmem %s1766_s28, 2048  ;;  %s1509_s5 = smov [#allocation5]  }
  0x64   : > { %p1363_p13 = scmp.ne.s32.totalorder %s1766_s28, %s1362_s11  ;;  %s1367_s7 = sshll.u32 %s1509_s5, 4  ;;  %s1368_s7 = int_to_ptr.vmem [resolvable:$false] %s1367_s7 }
  0x65   : > { %s1369_s0 = scalar_lea.vmem %s1368_s7, 4096  ;;  %p1370_p10 = scmp.lt.s32.totalorder %s1766_s28, %s1368_s7 }
  0x66   : > { %p1365_p0 = pnand %p1363_p13, %p1349_p5  ;;  %p1371_p1 = scmp.lt.s32.totalorder %s1369_s0, %s1362_s11 }
  0x68   : > { %p1366_p2 = pneg %p1365_p0  ;;  %p1372_p3 = por %p1371_p1, %p1370_p10 }
  0x6a   : > { %p1373_p8 = pnand %p1372_p3, %p1366_p2 }
  0x6c   : > { %1376 = shalt.err (!%p1373_p8)
}
  0x6d   : > { %s1510_s29 = smov 384   ;;  %s2050_s2 = smov 8  }
  0x6e   : > { %s2051_s3 = smov 128   ;;  %223 = sbr.rel (%p1697_p6) target bundleno = 458 (0x1ca), region = 32 }
  0x6f   : > { %1165 = dma.hbm_to_vmem [thread:$0]  (!%p1762_p9), %s1771_s20, 2048, %s1766_s28, %s1773_s12, %s1510_s29, %s2051_s3, %s2050_s2  }
  0x70   : > { %s225_s6 = sand.u32 (!%p1697_p6), 1, %s1471_s18   ;;  %p2052_p10 = scmp.ne.s32.totalorder (!%p1697_p6), %s2033_s9, 0 }
  0x71   : > { %s1075_s4 = sshll.u32 (!%p1697_p6), %s225_s6, 7  ;;  %s226_s14 = scalar_lea.sflag (!%p1697_p6), [#allocation4], %s225_s6 }
  0x72   : > { %s1806_s27 = scalar_lea.vmem (!%p1697_p6), [#allocation3], %s1075_s4 }
  0x75   : > { %1438 = dma.done.wait (%p2052_p10), %s226_s14, 2048  }
  0x76   : > { %1440 = vsyncadd (%p2052_p10), %s226_s14, 4294965248  ;;  %s234_s8 = sand.u32 1, %s1459_s15   ;;  %p2053_p6 = scmp.ne.s32.totalorder %s2042_s30, 0 }
  0x77   : > { %s1076_s11 = sshll.u32 %s234_s8, 7  ;;  %s235_s28 = scalar_lea.sflag [#allocation6], %s234_s8 }
  0x78   : > { %s1813_s20 = scalar_lea.vmem [#allocation5], %s1076_s11 }
  0x79   : > { %1442 = dma.done.wait (%p2053_p6), %s235_s28, 2048  }
  0x7a   : > { %1444 = vsyncadd (%p2053_p6), %s235_s28, 4294965248  ;;  %s2054_s17 = sld [smem:[#allocation10_spill]]  ;;  %s2055_s12 = sld [smem:[#allocation12_spill]] }
  0x7b   : > { %s2056_s3 = sld [smem:[#allocation19_spill]]  ;;  %s2057_s30 = sld [smem:[#allocation11_spill]] }
  0x80   : > { %s266_s5 = sand.u32 1, %s2054_s17   ;;  %s1821_s7 = sshll.u32 %s2055_s12, 1 }
  0x81   : > { %s1077_s9 = sshll.u32 %s266_s5, 7  ;;  %p273_p2 = scmp.lt.s32.totalorder %s1821_s7, 5 }
  0x82   : > { %s1831_s4 = scalar_lea.vmem [#allocation7], %s1077_s9  ;;  %p1079_p9 = scmp.ne.s32.totalorder %s2057_s30, 0 }
  0x83   : > { %s1825_s0 = scalar_select %p273_p2, %s1821_s7, 5 }
  0x84   : > { %283 = sbr.rel (%p1079_p9) target bundleno = 149 (0x95), region = 44  ;;  %v1511_v0 = vmov (!%p1079_p9), 0.0  }
  0x85   : > { %s275_s6 = scalar_lea.vmem %s2056_s3, %s1825_s0  ;;  %284 = vst [vmem:[#allocation2] sm:$0xff] (!%p1079_p9), %v1511_v0  ;;  %285 = vst [vmem:[#allocation2 + $0x8] sm:$0xff] (!%p1079_p9), %v1511_v0 }
  0x86   : > { %286 = vst [vmem:[#allocation2 + $0x10] sm:$0xff] (!%p1079_p9), %v1511_v0  ;;  %287 = vst [vmem:[#allocation2 + $0x18] sm:$0xff] (!%p1079_p9), %v1511_v0 }
  0x87   : > { %288 = vst [vmem:[#allocation2 + $0x20] sm:$0xff] (!%p1079_p9), %v1511_v0  ;;  %289 = vst [vmem:[#allocation2 + $0x28] sm:$0xff] (!%p1079_p9), %v1511_v0 }
  0x88   : > { %290 = vst [vmem:[#allocation2 + $0x30] sm:$0xff] (!%p1079_p9), %v1511_v0  ;;  %291 = vst [vmem:[#allocation2 + $0x38] sm:$0xff] (!%p1079_p9), %v1511_v0 }
  0x89   : > { %292 = vst [vmem:[#allocation2 + $0x40] sm:$0xff] (!%p1079_p9), %v1511_v0  ;;  %293 = vst [vmem:[#allocation2 + $0x48] sm:$0xff] (!%p1079_p9), %v1511_v0 }
  0x8a   : > { %294 = vst [vmem:[#allocation2 + $0x50] sm:$0xff] (!%p1079_p9), %v1511_v0  ;;  %295 = vst [vmem:[#allocation2 + $0x58] sm:$0xff] (!%p1079_p9), %v1511_v0 }
  0x8b   : > { %296 = vst [vmem:[#allocation2 + $0x60] sm:$0xff] %v1511_v0  ;;  %297 = vst [vmem:[#allocation2 + $0x68] sm:$0xff] %v1511_v0 }
  0x8c   : > { %298 = vst [vmem:[#allocation2 + $0x70] sm:$0xff] %v1511_v0  ;;  %299 = vst [vmem:[#allocation2 + $0x78] sm:$0xff] %v1511_v0 }
  0x8d   : > { %300 = vst [vmem:[#allocation2 + $0x80] sm:$0xff] %v1511_v0  ;;  %301 = vst [vmem:[#allocation2 + $0x88] sm:$0xff] %v1511_v0 }
  0x8e   : > { %302 = vst [vmem:[#allocation2 + $0x90] sm:$0xff] %v1511_v0  ;;  %303 = vst [vmem:[#allocation2 + $0x98] sm:$0xff] %v1511_v0 }
  0x8f   : > { %304 = vst [vmem:[#allocation2 + $0xa0] sm:$0xff] %v1511_v0  ;;  %305 = vst [vmem:[#allocation2 + $0xa8] sm:$0xff] %v1511_v0 }
  0x90   : > { %306 = vst [vmem:[#allocation2 + $0xb0] sm:$0xff] %v1511_v0  ;;  %307 = vst [vmem:[#allocation2 + $0xb8] sm:$0xff] %v1511_v0 }
  0x91   : > { %308 = vst [vmem:[#allocation2 + $0xc0] sm:$0xff] %v1511_v0  ;;  %309 = vst [vmem:[#allocation2 + $0xc8] sm:$0xff] %v1511_v0 }
  0x92   : > { %310 = vst [vmem:[#allocation2 + $0xd0] sm:$0xff] %v1511_v0  ;;  %311 = vst [vmem:[#allocation2 + $0xd8] sm:$0xff] %v1511_v0 }
  0x93   : > { %312 = vst [vmem:[#allocation2 + $0xe0] sm:$0xff] %v1511_v0  ;;  %313 = vst [vmem:[#allocation2 + $0xe8] sm:$0xff] %v1511_v0 }
  0x94   : > { %314 = vst [vmem:[#allocation2 + $0xf0] sm:$0xff] %v1511_v0  ;;  %315 = vst [vmem:[#allocation2 + $0xf8] sm:$0xff] %v1511_v0 }
  0x95 PF: > { %v1293_v1 = vld [vmem:[%s1813_s20 + $0x4] ss:$8 sps:$4 sm:$0xff]   ;;  %v1295_v2 = vld [vmem:[%s1813_s20] ss:$8 sps:$4 sm:$0xff]   ;;  %v1512_v3 = vmov 0   ;;  %v350_v24 = vld [vmem:[%s1806_s27 + $0x10] sm:$0xff] }
  0x96   : > { %500 = vmatprep.mubr.bf16.mxu0 %v1512_v3  ;;  %540 = vmatprep.mubr.bf16.mxu1 %v1512_v3  ;;  %v1296_v4 = vld [vmem:[%s1813_s20 + $0x14] ss:$8 sps:$4 sm:$0xff]   ;;  %v1298_v5 = vld [vmem:[%s1813_s20 + $0x10] ss:$8 sps:$4 sm:$0xff]   ;;  %v1299_v6 = vld [vmem:[%s1813_s20 + $0x24] ss:$8 sps:$4 sm:$0xff]  }
  0x97   : > { %468 = vmatprep.subr.bf16.mxu0 %v1293_v1  ;;  %1137 = vmatprep.subr.bf16.mxu1 %v1293_v1  ;;  %v1301_v7 = vld [vmem:[%s1813_s20 + $0x20] ss:$8 sps:$4 sm:$0xff]   ;;  %v1302_v8 = vld [vmem:[%s1813_s20 + $0x34] ss:$8 sps:$4 sm:$0xff]   ;;  %v1304_v9 = vld [vmem:[%s1813_s20 + $0x30] ss:$8 sps:$4 sm:$0xff]  }
  0x98   : > { %469 = vmatpush1.bf16.msra.mxu0 %v1295_v2  ;;  %1145 = vmatpush1.bf16.msra.mxu1 %v1295_v2  ;;  %v1305_v10 = vld [vmem:[%s1813_s20 + $0x44] ss:$8 sps:$4 sm:$0xff]   ;;  %v1307_v11 = vld [vmem:[%s1813_s20 + $0x40] ss:$8 sps:$4 sm:$0xff]   ;;  %v1308_v12 = vld [vmem:[%s1813_s20 + $0x54] ss:$8 sps:$4 sm:$0xff]  }
  0x99   : > { %470 = vmatprep.subr.bf16.mxu0 %v1296_v4  ;;  %1138 = vmatprep.subr.bf16.mxu1 %v1296_v4  ;;  %v1310_v13 = vld [vmem:[%s1813_s20 + $0x50] ss:$8 sps:$4 sm:$0xff]   ;;  %v1311_v14 = vld [vmem:[%s1813_s20 + $0x64] ss:$8 sps:$4 sm:$0xff]   ;;  %v1313_v15 = vld [vmem:[%s1813_s20 + $0x60] ss:$8 sps:$4 sm:$0xff]  }
  0x9a   : > { %v1314_v16 = vld [vmem:[%s1813_s20 + $0x74] ss:$8 sps:$4 sm:$0xff]   ;;  %v1316_v17 = vld [vmem:[%s1813_s20 + $0x70] ss:$8 sps:$4 sm:$0xff]   ;;  %v348_v18 = vld [vmem:[%s1806_s27] sm:$0xff]  ;;  %s2058_s14 = sld [smem:[#allocation11_spill]] }
  0x9b   : > { %v349_v19 = vld [vmem:[%s1806_s27 + $0x8] sm:$0xff]  ;;  %v356_v20 = vld [vmem:[%s1806_s27 + $0x40] sm:$0xff]  ;;  %v351_v25 = vld [vmem:[%s1806_s27 + $0x18] sm:$0xff] }
  0x9c   : > { %471 = vmatpush1.bf16.msra.mxu0 %v1298_v5  ;;  %1146 = vmatpush1.bf16.msra.mxu1 %v1298_v5  ;;  %v357_v21 = vld [vmem:[%s1806_s27 + $0x48] sm:$0xff]  ;;  %v364_v22 = vpack.c.bf16 %v349_v19, %v348_v18  ;;  %v358_v26 = vld [vmem:[%s1806_s27 + $0x50] sm:$0xff]  ;;  %v359_v27 = vld [vmem:[%s1806_s27 + $0x58] sm:$0xff]  ;;  %v365_v28 = vpack.c.bf16 %v351_v25, %v350_v24 }
  0x9d   : > { %472 = vmatprep.subr.bf16.mxu0 %v1299_v6  ;;  %1139 = vmatprep.subr.bf16.mxu1 %v1299_v6  ;;  %v368_v23 = vpack.c.bf16 %v357_v21, %v356_v20  ;;  %v369_v29 = vpack.c.bf16 %v359_v27, %v358_v26  ;;  %v352_v30 = vld [vmem:[%s1806_s27 + $0x20] sm:$0xff]  ;;  %v353_v31 = vld [vmem:[%s1806_s27 + $0x28] sm:$0xff]  ;;  %v354_v36 = vld [vmem:[%s1806_s27 + $0x30] sm:$0xff] }
  0x9e   : > { %v360_v32 = vld [vmem:[%s1806_s27 + $0x60] sm:$0xff]  ;;  %v361_v33 = vld [vmem:[%s1806_s27 + $0x68] sm:$0xff]  ;;  %v366_v34 = vpack.c.bf16 %v353_v31, %v352_v30  ;;  %v355_v37 = vld [vmem:[%s1806_s27 + $0x38] sm:$0xff] }
  0x9f   : > { %v370_v35 = vpack.c.bf16 %v361_v33, %v360_v32  ;;  %v362_v38 = vld [vmem:[%s1806_s27 + $0x70] sm:$0xff]  ;;  %v363_v39 = vld [vmem:[%s1806_s27 + $0x78] sm:$0xff]  ;;  %v367_v40 = vpack.c.bf16 %v355_v37, %v354_v36  ;;  %v316_v42 = vld [vmem:[#allocation2] sm:$0xff] }
  0xa0   : > { %473 = vmatpush1.bf16.msra.mxu0 %v1301_v7  ;;  %1147 = vmatpush1.bf16.msra.mxu1 %v1301_v7  ;;  %v371_v41 = vpack.c.bf16 %v363_v39, %v362_v38  ;;  %v332_v43 = vld [vmem:[#allocation2 + $0x80] sm:$0xff]  ;;  %v317_v44 = vld [vmem:[#allocation2 + $0x8] sm:$0xff]  ;;  %v318_v48 = vld [vmem:[#allocation2 + $0x10] sm:$0xff]  ;;  %p1096_p5 = scmp.ne.s32.totalorder %s2058_s14, 1 }
  0xa1   : > { %474 = vmatprep.subr.bf16.mxu0 %v1302_v8  ;;  %1140 = vmatprep.subr.bf16.mxu1 %v1302_v8  ;;  %v333_v45 = vld [vmem:[#allocation2 + $0x88] sm:$0xff]  ;;  %v334_v49 = vld [vmem:[#allocation2 + $0x90] sm:$0xff]  ;;  %v319_v54 = vld [vmem:[#allocation2 + $0x18] sm:$0xff] }
  0xa2   : > { %v335_v55 = vld [vmem:[#allocation2 + $0x98] sm:$0xff]  ;;  %v320_v2 = vld [vmem:[#allocation2 + $0x20] sm:$0xff]  ;;  %v321_v4 = vld [vmem:[#allocation2 + $0x28] sm:$0xff] }
  0xa3   : > { %v337_v5 = vld [vmem:[#allocation2 + $0xa8] sm:$0xff]  ;;  %v322_v8 = vld [vmem:[#allocation2 + $0x30] sm:$0xff]  ;;  %v324_v26 = vld [vmem:[#allocation2 + $0x40] sm:$0xff] }
  0xa4   : > { %475 = vmatpush1.bf16.msra.mxu0 %v1304_v9  ;;  %1148 = vmatpush1.bf16.msra.mxu1 %v1304_v9  ;;  %v338_v9 = vld [vmem:[#allocation2 + $0xb0] sm:$0xff]  ;;  %v340_v27 = vld [vmem:[#allocation2 + $0xc0] sm:$0xff]  ;;  %v327_v38 = vld [vmem:[#allocation2 + $0x58] sm:$0xff] }
  0xa5   : > { %476 = vmatprep.subr.bf16.mxu0 %v1305_v10  ;;  %1141 = vmatprep.subr.bf16.mxu1 %v1305_v10  ;;  %v326_v32 = vld [vmem:[#allocation2 + $0x50] sm:$0xff]  ;;  %v343_v39 = vld [vmem:[#allocation2 + $0xd8] sm:$0xff] }
  0xa6   : > { %v342_v33 = vld [vmem:[#allocation2 + $0xd0] sm:$0xff] }
  0xa8   : > { %477 = vmatpush1.bf16.msra.mxu0 %v1307_v11  ;;  %1149 = vmatpush1.bf16.msra.mxu1 %v1307_v11 }
  0xa9   : > { %478 = vmatprep.subr.bf16.mxu0 %v1308_v12  ;;  %1142 = vmatprep.subr.bf16.mxu1 %v1308_v12 }
  0xac   : > { %479 = vmatpush1.bf16.msra.mxu0 %v1310_v13  ;;  %1150 = vmatpush1.bf16.msra.mxu1 %v1310_v13 }
  0xad   : > { %480 = vmatprep.subr.bf16.mxu0 %v1311_v14  ;;  %1143 = vmatprep.subr.bf16.mxu1 %v1311_v14  ;;  %v323_v14 = vld [vmem:[#allocation2 + $0x38] sm:$0xff] }
  0xb0   : > { %481 = vmatpush1.bf16.msra.mxu0 %v1313_v15  ;;  %1151 = vmatpush1.bf16.msra.mxu1 %v1313_v15  ;;  %v339_v15 = vld [vmem:[#allocation2 + $0xb8] sm:$0xff] }
  0xb1   : > { %482 = vmatprep.subr.bf16.mxu0 %v1314_v16  ;;  %1144 = vmatprep.subr.bf16.mxu1 %v1314_v16 }
  0xb4   : > { %483 = vmatpush1.bf16.msra.mxu0 %v1316_v17  ;;  %1152 = vmatpush1.bf16.msra.mxu1 %v1316_v17 }
  0xb7   : > { %501 = vmatmul.mubr.bf16.vlgmr.msra.gmra.mrb[0].mxu0 %v364_v22  ;;  %541 = vmatmul.mubr.bf16.vlgmr.msra.gmra.mrb[0].mxu1 %v368_v23 }
  0xb8   : > { %510 = vmatprep.mubr.bf16.mxu0 %v1512_v3  ;;  %550 = vmatprep.mubr.bf16.mxu1 %v1512_v3 }
  0xbf   : > { %511 = vmatmul.mubr.bf16.gmra.mrb[4].mxu0 %v365_v28  ;;  %551 = vmatmul.mubr.bf16.gmra.mrb[4].mxu1 %v369_v29  ;;  %v325_v28 = vld [vmem:[#allocation2 + $0x48] sm:$0xff] }
  0xc0   : > { %520 = vmatprep.mubr.bf16.mxu0 %v1512_v3  ;;  %560 = vmatprep.mubr.bf16.mxu1 %v1512_v3  ;;  %v341_v29 = vld [vmem:[#allocation2 + $0xc8] sm:$0xff] }
  0xc7   : > { %521 = vmatmul.mubr.bf16.gmra.mrb[8].mxu0 %v366_v34  ;;  %561 = vmatmul.mubr.bf16.gmra.mrb[8].mxu1 %v370_v35 }
  0xc8   : > { %530 = vmatprep.mubr.bf16.mxu0 %v1512_v3  ;;  %570 = vmatprep.mubr.bf16.mxu1 %v1512_v3  ;;  %v336_v3 = vld [vmem:[#allocation2 + $0xa0] sm:$0xff] }
  0xcf   : > { %531 = vmatmul.mubr.bf16.gmra.mrb[12].mxu0 %v367_v40  ;;  %571 = vmatmul.mubr.bf16.gmra.mrb[12].mxu1 %v371_v41 }
 0x18a   : > { %v502_v46 = vpop.f32.mrb[0].mxu0  ;;  %v542_v47 = vpop.f32.mrb[0].mxu1 }
 0x18b   : > { %v581_v50 = vadd.f32 %v502_v46, %v316_v42  ;;  %v597_v51 = vadd.f32 %v542_v47, %v332_v43  ;;  %v504_v52 = vpop.f32.mrb[1].mxu0  ;;  %v544_v53 = vpop.f32.mrb[1].mxu1 }
 0x18c   : > { %v582_v56 = vadd.f32 %v504_v52, %v317_v44  ;;  %v598_v57 = vadd.f32 %v544_v53, %v333_v45  ;;  %v506_v58 = vpop.f32.mrb[2].mxu0  ;;  %v546_v59 = vpop.f32.mrb[2].mxu1  ;;  %v329_v52 = vld [vmem:[#allocation2 + $0x68] sm:$0xff] }
 0x18d   : > { %613 = vst [vmem:[#allocation2] sm:$0xff] %v581_v50  ;;  %629 = vst [vmem:[#allocation2 + $0x80] sm:$0xff] %v597_v51  ;;  %v583_v60 = vadd.f32 %v506_v58, %v318_v48  ;;  %v599_v61 = vadd.f32 %v546_v59, %v334_v49  ;;  %v508_v62 = vpop.f32.mrb[3].mxu0  ;;  %v548_v63 = vpop.f32.mrb[3].mxu1  ;;  %v328_v50 = vld [vmem:[#allocation2 + $0x60] sm:$0xff]  ;;  %v345_v53 = vld [vmem:[#allocation2 + $0xe8] sm:$0xff] }
 0x18e   : > { %614 = vst [vmem:[#allocation2 + $0x8] sm:$0xff] %v582_v56  ;;  %630 = vst [vmem:[#allocation2 + $0x88] sm:$0xff] %v598_v57  ;;  %v584_v0 = vadd.f32 %v508_v62, %v319_v54  ;;  %v600_v1 = vadd.f32 %v548_v63, %v335_v55  ;;  %v344_v51 = vld [vmem:[#allocation2 + $0xe0] sm:$0xff]  ;;  %v330_v56 = vld [vmem:[#allocation2 + $0x70] sm:$0xff] }
 0x18f   : > { %615 = vst [vmem:[#allocation2 + $0x10] sm:$0xff] %v583_v60  ;;  %631 = vst [vmem:[#allocation2 + $0x90] sm:$0xff] %v599_v61  ;;  %v346_v57 = vld [vmem:[#allocation2 + $0xf0] sm:$0xff]  ;;  %v331_v62 = vld [vmem:[#allocation2 + $0x78] sm:$0xff] }
 0x190   : > { %616 = vst [vmem:[#allocation2 + $0x18] sm:$0xff] %v584_v0  ;;  %632 = vst [vmem:[#allocation2 + $0x98] sm:$0xff] %v600_v1  ;;  %v347_v63 = vld [vmem:[#allocation2 + $0xf8] sm:$0xff] }
 0x192   : > { %v512_v6 = vpop.f32.mrb[4].mxu0  ;;  %v552_v7 = vpop.f32.mrb[4].mxu1 }
 0x193   : > { %v585_v10 = vadd.f32 %v512_v6, %v320_v2  ;;  %v601_v11 = vadd.f32 %v552_v7, %v336_v3  ;;  %v514_v12 = vpop.f32.mrb[5].mxu0  ;;  %v554_v13 = vpop.f32.mrb[5].mxu1 }
 0x194   : > { %v586_v16 = vadd.f32 %v514_v12, %v321_v4  ;;  %v602_v17 = vadd.f32 %v554_v13, %v337_v5  ;;  %v516_v18 = vpop.f32.mrb[6].mxu0  ;;  %v556_v19 = vpop.f32.mrb[6].mxu1  ;;  %v681_v12 = vld [vmem:[%s275_s6] sm:$0x3] (!%p1096_p5) }
 0x195   : > { %617 = vst [vmem:[#allocation2 + $0x20] sm:$0xff] %v585_v10  ;;  %633 = vst [vmem:[#allocation2 + $0xa0] sm:$0xff] %v601_v11  ;;  %v587_v20 = vadd.f32 %v516_v18, %v322_v8  ;;  %v603_v21 = vadd.f32 %v556_v19, %v338_v9  ;;  %v518_v22 = vpop.f32.mrb[7].mxu0  ;;  %v558_v23 = vpop.f32.mrb[7].mxu1  ;;  %v683_v10 = vlaneseq (!%p1096_p5)  ;;  %v649_v13 = vld [vmem:[#allocation2] sm:$0xff] (!%p1096_p5) }
 0x196   : > { %618 = vst [vmem:[#allocation2 + $0x28] sm:$0xff] %v586_v16  ;;  %634 = vst [vmem:[#allocation2 + $0xa8] sm:$0xff] %v602_v17  ;;  %v588_v24 = vadd.f32 %v518_v22, %v323_v14  ;;  %v604_v25 = vadd.f32 %v558_v23, %v339_v15  ;;  %v650_v14 = vld [vmem:[#allocation2 + $0x8] sm:$0xff] (!%p1096_p5)  ;;  %v651_v17 = vld [vmem:[#allocation2 + $0x10] sm:$0xff] (!%p1096_p5) }
 0x197   : > { %619 = vst [vmem:[#allocation2 + $0x30] sm:$0xff] %v587_v20  ;;  %635 = vst [vmem:[#allocation2 + $0xb0] sm:$0xff] %v603_v21  ;;  %v684_v11 = vshrl.u32 (!%p1096_p5), %v683_v10, 7  ;;  %v652_v18 = vld [vmem:[#allocation2 + $0x18] sm:$0xff] (!%p1096_p5) }
 0x198   : > { %620 = vst [vmem:[#allocation2 + $0x38] sm:$0xff] %v588_v24  ;;  %636 = vst [vmem:[#allocation2 + $0xb8] sm:$0xff] %v604_v25 }
 0x199   : > { %v685_v15 = vsub.s32 (!%p1096_p5), 0, %v684_v11  ;;  %v689_v16 = vsub.s32 (!%p1096_p5), 1, %v684_v11 }
 0x19a   : > { %v522_v30 = vpop.f32.mrb[8].mxu0  ;;  %v562_v31 = vpop.f32.mrb[8].mxu1 }
 0x19b   : > { %v589_v34 = vadd.f32 %v522_v30, %v324_v26  ;;  %v605_v35 = vadd.f32 %v562_v31, %v340_v27  ;;  %v524_v36 = vpop.f32.mrb[9].mxu0  ;;  %v564_v37 = vpop.f32.mrb[9].mxu1  ;;  %v1880_v20 = vrot.slane (!%p1096_p5), %v681_v12, %v685_v15  ;;  %v1882_v21 = vrot.slane (!%p1096_p5), %v681_v12, %v689_v16 }
 0x19c   : > { %v590_v40 = vadd.f32 %v524_v36, %v325_v28  ;;  %v606_v41 = vadd.f32 %v564_v37, %v341_v29  ;;  %v526_v42 = vpop.f32.mrb[10].mxu0  ;;  %v566_v43 = vpop.f32.mrb[10].mxu1  ;;  %v653_v19 = vld [vmem:[#allocation2 + $0x20] sm:$0xff] (!%p1096_p5) }
 0x19d   : > { %621 = vst [vmem:[#allocation2 + $0x40] sm:$0xff] %v589_v34  ;;  %637 = vst [vmem:[#allocation2 + $0xc0] sm:$0xff] %v605_v35  ;;  %v591_v44 = vadd.f32 %v526_v42, %v326_v32  ;;  %v607_v45 = vadd.f32 %v566_v43, %v342_v33  ;;  %v528_v46 = vpop.f32.mrb[11].mxu0  ;;  %v568_v47 = vpop.f32.mrb[11].mxu1  ;;  %v654_v22 = vld [vmem:[#allocation2 + $0x28] sm:$0xff] (!%p1096_p5)  ;;  %v693_v27 = vadd.f32 (!%p1096_p5), %v1880_v20, %v649_v13 }
 0x19e   : > { %622 = vst [vmem:[#allocation2 + $0x48] sm:$0xff] %v590_v40  ;;  %638 = vst [vmem:[#allocation2 + $0xc8] sm:$0xff] %v606_v41  ;;  %v592_v48 = vadd.f32 %v528_v46, %v327_v38  ;;  %v608_v49 = vadd.f32 %v568_v47, %v343_v39  ;;  %v655_v23 = vld [vmem:[#allocation2 + $0x30] sm:$0xff] (!%p1096_p5)  ;;  %v694_v28 = vadd.f32 (!%p1096_p5), %v1882_v21, %v650_v14  ;;  %v666_v46 = vld [vmem:[#allocation2 + $0x88] sm:$0xff] (!%p1096_p5) }
 0x19f   : > { %623 = vst [vmem:[#allocation2 + $0x50] sm:$0xff] %v591_v44  ;;  %639 = vst [vmem:[#allocation2 + $0xd0] sm:$0xff] %v607_v45  ;;  %v656_v24 = vld [vmem:[#allocation2 + $0x38] sm:$0xff] (!%p1096_p5)  ;;  %v695_v29 = vadd.f32 (!%p1096_p5), %v1880_v20, %v651_v17  ;;  %v696_v30 = vadd.f32 (!%p1096_p5), %v1882_v21, %v652_v18  ;;  %v697_v33 = vadd.f32 (!%p1096_p5), %v1880_v20, %v653_v19  ;;  %v665_v45 = vld [vmem:[#allocation2 + $0x80] sm:$0xff] (!%p1096_p5) }
 0x1a0   : > { %624 = vst [vmem:[#allocation2 + $0x58] sm:$0xff] %v592_v48  ;;  %640 = vst [vmem:[#allocation2 + $0xd8] sm:$0xff] %v608_v49  ;;  %v698_v34 = vadd.f32 (!%p1096_p5), %v1882_v21, %v654_v22  ;;  %v699_v35 = vadd.f32 (!%p1096_p5), %v1880_v20, %v655_v23  ;;  %v700_v36 = vadd.f32 (!%p1096_p5), %v1882_v21, %v656_v24 }
 0x1a1   : > { %v1121_v40 = vpack.c.bf16 (!%p1096_p5), %v694_v28, %v693_v27  ;;  %v1122_v41 = vpack.c.bf16 (!%p1096_p5), %v696_v30, %v695_v29 }
 0x1a2   : > { %v532_v54 = vpop.f32.mrb[12].mxu0  ;;  %v572_v55 = vpop.f32.mrb[12].mxu1  ;;  %648 = sbr.rel (%p1096_p5) target bundleno = 438 (0x1b6), region = 48  ;;  %v1123_v47 = vpack.c.bf16 (!%p1096_p5), %v698_v34, %v697_v33  ;;  %v1124_v48 = vpack.c.bf16 (!%p1096_p5), %v700_v36, %v699_v35 }
 0x1a3   : > { %v593_v58 = vadd.f32 %v532_v54, %v328_v50  ;;  %v609_v59 = vadd.f32 %v572_v55, %v344_v51  ;;  %v534_v60 = vpop.f32.mrb[13].mxu0  ;;  %v574_v61 = vpop.f32.mrb[13].mxu1  ;;  %v667_v51 = vld [vmem:[#allocation2 + $0x90] sm:$0xff] (!%p1096_p5)  ;;  %821 = vst [vmem:[%s1831_s4] sm:$0xff] (!%p1096_p5), %v1121_v40  ;;  %822 = vst [vmem:[%s1831_s4 + $0x8] sm:$0xff] (!%p1096_p5), %v1122_v41 }
 0x1a4   : > { %v594_v0 = vadd.f32 %v534_v60, %v329_v52  ;;  %v610_v1 = vadd.f32 %v574_v61, %v345_v53  ;;  %v536_v2 = vpop.f32.mrb[14].mxu0  ;;  %v576_v3 = vpop.f32.mrb[14].mxu1  ;;  %v657_v25 = vld [vmem:[#allocation2 + $0x40] sm:$0xff] (!%p1096_p5)  ;;  %v668_v52 = vld [vmem:[#allocation2 + $0x98] sm:$0xff] (!%p1096_p5)  ;;  %823 = vst [vmem:[%s1831_s4 + $0x10] sm:$0xff] (!%p1096_p5), %v1123_v47  ;;  %824 = vst [vmem:[%s1831_s4 + $0x18] sm:$0xff] (!%p1096_p5), %v1124_v48 }
 0x1a5   : > { %625 = vst [vmem:[#allocation2 + $0x60] sm:$0xff] %v593_v58  ;;  %641 = vst [vmem:[#allocation2 + $0xe0] sm:$0xff] %v609_v59  ;;  %v595_v4 = vadd.f32 %v536_v2, %v330_v56  ;;  %v611_v5 = vadd.f32 %v576_v3, %v346_v57  ;;  %v538_v6 = vpop.f32.mrb[15].mxu0  ;;  %v578_v7 = vpop.f32.mrb[15].mxu1  ;;  %v658_v26 = vld [vmem:[#allocation2 + $0x48] sm:$0xff] (!%p1096_p5)  ;;  %v701_v42 = vadd.f32 (!%p1096_p5), %v1880_v20, %v657_v25  ;;  %v669_v53 = vld [vmem:[#allocation2 + $0xa0] sm:$0xff] (!%p1096_p5) }
 0x1a6   : > { %626 = vst [vmem:[#allocation2 + $0x68] sm:$0xff] %v594_v0  ;;  %642 = vst [vmem:[#allocation2 + $0xe8] sm:$0xff] %v610_v1  ;;  %v596_v8 = vadd.f32 %v538_v6, %v331_v62  ;;  %v612_v9 = vadd.f32 %v578_v7, %v347_v63  ;;  %v659_v31 = vld [vmem:[#allocation2 + $0x50] sm:$0xff] (!%p1096_p5)  ;;  %v702_v43 = vadd.f32 (!%p1096_p5), %v1882_v21, %v658_v26  ;;  %v670_v58 = vld [vmem:[#allocation2 + $0xa8] sm:$0xff] (!%p1096_p5) }
 0x1a7   : > { %627 = vst [vmem:[#allocation2 + $0x70] sm:$0xff] %v595_v4  ;;  %643 = vst [vmem:[#allocation2 + $0xf0] sm:$0xff] %v611_v5  ;;  %v660_v32 = vld [vmem:[#allocation2 + $0x58] sm:$0xff] (!%p1096_p5)  ;;  %v703_v49 = vadd.f32 (!%p1096_p5), %v1880_v20, %v659_v31  ;;  %v671_v59 = vld [vmem:[#allocation2 + $0xb0] sm:$0xff] (!%p1096_p5)  ;;  %v709_v62 = vadd.f32 (!%p1096_p5), %v1880_v20, %v665_v45  ;;  %v710_v63 = vadd.f32 (!%p1096_p5), %v1882_v21, %v666_v46 }
 0x1a8   : > { %628 = vst [vmem:[#allocation2 + $0x78] sm:$0xff] %v596_v8  ;;  %644 = vst [vmem:[#allocation2 + $0xf8] sm:$0xff] %v612_v9  ;;  %v704_v50 = vadd.f32 (!%p1096_p5), %v1882_v21, %v660_v32  ;;  %v1125_v54 = vpack.c.bf16 (!%p1096_p5), %v702_v43, %v701_v42  ;;  %v672_v0 = vld [vmem:[#allocation2 + $0xb8] sm:$0xff] (!%p1096_p5)  ;;  %v673_v1 = vld [vmem:[#allocation2 + $0xc0] sm:$0xff] (!%p1096_p5)  ;;  %v711_v4 = vadd.f32 (!%p1096_p5), %v1880_v20, %v667_v51 }
 0x1a9   : > { %v674_v2 = vld [vmem:[#allocation2 + $0xc8] sm:$0xff]  ;;  %v712_v5 = vadd.f32 %v1882_v21, %v668_v52  ;;  %v713_v6 = vadd.f32 %v1880_v20, %v669_v53  ;;  %v675_v7 = vld [vmem:[#allocation2 + $0xd0] sm:$0xff]  ;;  %v676_v8 = vld [vmem:[#allocation2 + $0xd8] sm:$0xff]  ;;  %v1129_v11 = vpack.c.bf16 %v710_v63, %v709_v62  ;;  %v714_v12 = vadd.f32 %v1882_v21, %v670_v58 }
 0x1aa   : > { %v1126_v60 = vpack.c.bf16 %v704_v50, %v703_v49  ;;  %825 = vst [vmem:[%s1831_s4 + $0x20] sm:$0xff] %v1125_v54  ;;  %v715_v13 = vadd.f32 %v1880_v20, %v671_v59  ;;  %v716_v17 = vadd.f32 %v1882_v21, %v672_v0  ;;  %v717_v18 = vadd.f32 %v1880_v20, %v673_v1 }
 0x1ab   : > { %v1130_v16 = vpack.c.bf16 %v712_v5, %v711_v4  ;;  %v718_v19 = vadd.f32 %v1882_v21, %v674_v2  ;;  %829 = vst [vmem:[%s1831_s4 + $0x40] sm:$0xff] %v1129_v11  ;;  %v1131_v23 = vpack.c.bf16 %v714_v12, %v713_v6  ;;  %v719_v24 = vadd.f32 %v1880_v20, %v675_v7 }
 0x1ac   : > { %v661_v37 = vld [vmem:[#allocation2 + $0x60] sm:$0xff]  ;;  %826 = vst [vmem:[%s1831_s4 + $0x28] sm:$0xff] %v1126_v60  ;;  %v720_v25 = vadd.f32 %v1882_v21, %v676_v8  ;;  %v1132_v27 = vpack.c.bf16 %v716_v17, %v715_v13 }
 0x1ad   : > { %v662_v38 = vld [vmem:[#allocation2 + $0x68] sm:$0xff]  ;;  %v705_v55 = vadd.f32 %v1880_v20, %v661_v37  ;;  %v677_v9 = vld [vmem:[#allocation2 + $0xe0] sm:$0xff]  ;;  %830 = vst [vmem:[%s1831_s4 + $0x48] sm:$0xff] %v1130_v16  ;;  %v1133_v28 = vpack.c.bf16 %v718_v19, %v717_v18  ;;  %831 = vst [vmem:[%s1831_s4 + $0x50] sm:$0xff] %v1131_v23 }
 0x1ae   : > { %v663_v39 = vld [vmem:[#allocation2 + $0x70] sm:$0xff]  ;;  %v706_v56 = vadd.f32 %v1882_v21, %v662_v38  ;;  %v678_v14 = vld [vmem:[#allocation2 + $0xe8] sm:$0xff]  ;;  %v721_v26 = vadd.f32 %v1880_v20, %v677_v9  ;;  %v1134_v31 = vpack.c.bf16 %v720_v25, %v719_v24  ;;  %832 = vst [vmem:[%s1831_s4 + $0x58] sm:$0xff] %v1132_v27 }
 0x1af   : > { %v664_v44 = vld [vmem:[#allocation2 + $0x78] sm:$0xff]  ;;  %v707_v57 = vadd.f32 %v1880_v20, %v663_v39  ;;  %v679_v15 = vld [vmem:[#allocation2 + $0xf0] sm:$0xff]  ;;  %v722_v29 = vadd.f32 %v1882_v21, %v678_v14  ;;  %833 = vst [vmem:[%s1831_s4 + $0x60] sm:$0xff] %v1133_v28 }
 0x1b0   : > { %v708_v61 = vadd.f32 %v1882_v21, %v664_v44  ;;  %v1127_v3 = vpack.c.bf16 %v706_v56, %v705_v55  ;;  %v680_v22 = vld [vmem:[#allocation2 + $0xf8] sm:$0xff]  ;;  %v723_v30 = vadd.f32 %v1880_v20, %v679_v15  ;;  %834 = vst [vmem:[%s1831_s4 + $0x68] sm:$0xff] %v1134_v31 }
 0x1b1   : > { %v724_v32 = vadd.f32 %v1882_v21, %v680_v22  ;;  %v1135_v33 = vpack.c.bf16 %v722_v29, %v721_v26 }
 0x1b2   : > { %v1128_v10 = vpack.c.bf16 %v708_v61, %v707_v57  ;;  %827 = vst [vmem:[%s1831_s4 + $0x30] sm:$0xff] %v1127_v3 }
 0x1b3   : > { %v1136_v34 = vpack.c.bf16 %v724_v32, %v723_v30  ;;  %835 = vst [vmem:[%s1831_s4 + $0x70] sm:$0xff] %v1135_v33 }
 0x1b4   : > { %828 = vst [vmem:[%s1831_s4 + $0x38] sm:$0xff] %v1128_v10 }
 0x1b5   : > { %836 = vst [vmem:[%s1831_s4 + $0x78] sm:$0xff] %v1136_v34 }
 0x1b6 PF: > { %p2060_p12 = scmp.ne.s32.totalorder %s2046_s22, 0 }
 0x1b7   : > { %s2061_s28 = sld [smem:[#allocation13_spill]] (%p2060_p12)  ;;  %v907_v20 = vld [vmem:[%s1831_s4] sm:$0xff] (%p2060_p12)  ;;  %v909_v21 = vld [vmem:[%s1831_s4 + $0x8] sm:$0xff] (%p2060_p12)  ;;  %v927_v43 = vld [vmem:[%s1831_s4 + $0x50] sm:$0xff] (%p2060_p12) }
 0x1b8   : > { %843 = sbr.rel (!%p2060_p12) target bundleno = 458 (0x1ca), region = 52  ;;  %v911_v35 = vld [vmem:[%s1831_s4 + $0x10] sm:$0xff] (%p2060_p12)  ;;  %v913_v36 = vld [vmem:[%s1831_s4 + $0x18] sm:$0xff] (%p2060_p12)  ;;  %v915_v37 = vld [vmem:[%s1831_s4 + $0x20] sm:$0xff] (%p2060_p12)  ;;  %s2062_s9 = sld [smem:[#allocation20_spill]] (%p2060_p12) }
 0x1b9   : > { %v917_v38 = vld [vmem:[%s1831_s4 + $0x28] sm:$0xff] (%p2060_p12)  ;;  %v919_v39 = vld [vmem:[%s1831_s4 + $0x30] sm:$0xff] (%p2060_p12)  ;;  %v923_v41 = vld [vmem:[%s1831_s4 + $0x40] sm:$0xff] (%p2060_p12) }
 0x1ba   : > { %v925_v42 = vld [vmem:[%s1831_s4 + $0x48] sm:$0xff] (%p2060_p12)  ;;  %v929_v44 = vld [vmem:[%s1831_s4 + $0x58] sm:$0xff] (%p2060_p12)  ;;  %v931_v45 = vld [vmem:[%s1831_s4 + $0x60] sm:$0xff] (%p2060_p12) }
 0x1bb   : > { %v921_v40 = vld [vmem:[%s1831_s4 + $0x38] sm:$0xff] (%p2060_p12)  ;;  %v933_v46 = vld [vmem:[%s1831_s4 + $0x68] sm:$0xff] (%p2060_p12)  ;;  %v935_v47 = vld [vmem:[%s1831_s4 + $0x70] sm:$0xff] (%p2060_p12) }
 0x1bc   : > { %v937_v48 = vld [vmem:[%s1831_s4 + $0x78] sm:$0xff] (%p2060_p12) }
 0x1bd   : > { %s1154_s20 = smul.u32 (%p2060_p12), 96, %s2061_s28 }
 0x1bf   : > { %s847_s22 = sadd.s32 %s1154_s20, %s1821_s7 }
 0x1c0   : > { %s1117_s17 = sshll.u32 %s847_s22, 2 }
 0x1c1   : > { %s849_s0 = scalar_lea.vmem %s2062_s9, %s1117_s17 }
 0x1c2   : > { %908 = vst [vmem:[%s849_s0] sm:$0xff] %v907_v20  ;;  %910 = vst [vmem:[%s849_s0 + $0x18] sm:$0xff] %v909_v21 }
 0x1c3   : > { %912 = vst [vmem:[%s849_s0 + $0x30] sm:$0xff] %v911_v35  ;;  %914 = vst [vmem:[%s849_s0 + $0x48] sm:$0xff] %v913_v36 }
 0x1c4   : > { %916 = vst [vmem:[%s849_s0 + $0x60] sm:$0xff] %v915_v37  ;;  %918 = vst [vmem:[%s849_s0 + $0x78] sm:$0xff] %v917_v38 }
 0x1c5   : > { %920 = vst [vmem:[%s849_s0 + $0x90] sm:$0xff] %v919_v39  ;;  %922 = vst [vmem:[%s849_s0 + $0xa8] sm:$0xff] %v921_v40 }
 0x1c6   : > { %924 = vst [vmem:[%s849_s0 + $0xc0] sm:$0xff] %v923_v41  ;;  %926 = vst [vmem:[%s849_s0 + $0xd8] sm:$0xff] %v925_v42 }
 0x1c7   : > { %928 = vst [vmem:[%s849_s0 + $0xf0] sm:$0xff] %v927_v43  ;;  %930 = vst [vmem:[%s849_s0 + $0x108] sm:$0xff] %v929_v44 }
 0x1c8   : > { %932 = vst [vmem:[%s849_s0 + $0x120] sm:$0xff] %v931_v45  ;;  %934 = vst [vmem:[%s849_s0 + $0x138] sm:$0xff] %v933_v46 }
 0x1c9   : > { %936 = vst [vmem:[%s849_s0 + $0x150] sm:$0xff] %v935_v47  ;;  %938 = vst [vmem:[%s849_s0 + $0x168] sm:$0xff] %v937_v48 }
 0x1ca PF: > { %s19_s26 = sadd.s32 1, %s1503_s26   ;;  %s2064_s29 = sld [smem:[#allocation17_spill]] }
 0x1cb   : > { %p1956_p4 = scmp.ge.s32.totalorder %s19_s26, 14   ;;  %s2065_s2 = sld [smem:[#allocation14_spill]] }
 0x1cc   : > { %s2066_s3 = sld [smem:[#allocation15_spill]]  ;;  %s2067_s6 = sld [smem:[#allocation16_spill]] }
 0x1cd   : > { %s2068_s12 = smov %s1451_s13  ;;  %s2069_s13 = smov %s1755_s21 }
 0x1ce   : > { %s2070_s14 = smov %s1459_s15  ;;  %s2071_s15 = smov %s1463_s16 }
 0x1cf   : > { %s2073_s17 = smov %s1471_s18  ;;  %s2074_s18 = smov %s1475_s19 }
 0x1d0   : > { %s2072_s16 = smov %s2064_s29  ;;  %s2075_s19 = smov %s1752_s10 }
 0x1d1   : > { %s2076_s20 = smov %s1491_s23  ;;  %s2077_s21 = smov %s1495_s24 }
 0x1d2   : > { %s2078_s22 = smov %s1499_s25  ;;  %s2079_s23 = smov %s2065_s2 }
 0x1d3   : > { %s2080_s24 = smov %s2066_s3  ;;  %s2081_s25 = smov %s2067_s6 }
 0x1d4   :  { %18 = sbr.rel (!%p1956_p4) target bundleno = 15 (0xf), region = 134 }
 0x1db   :  { %954 = vsyncpa [#allocation4], 1 }
 0x1dc   :  { %956 = vsyncpa [#allocation4 + $0x1], 1 }
 0x1dd   :  { %957 = vsyncpa [#allocation6], 1 }
 0x1de   :  { %959 = vsyncpa [#allocation6 + $0x1], 1 }

// kernel: causal_self_attention.5
= control target key start
LH: loop header
LB: loop body
LE: loop exit
PB: predicated region body
PF: predicated region fallthrough
CT: control target
= control target key end

     0   :  { %8 = vsyncpa [#allocation5], 0  ;;  %s1645_s0 = inlined_call_operand.vmem [shape: bf16[256,256], index: 0, kind: input, shape index: {}]   ;;  %s1646_s1 = inlined_call_operand.vmem [shape: bf16[256,256], index: 1, kind: input, shape index: {}]   ;;  %s1647_s2 = inlined_call_operand.vmem [shape: f32[1,256], index: 2, kind: input, shape index: {}]   ;;  %s1648_s3 = inlined_call_operand.hbm [shape: f32[256,256], index: 3, kind: output, shape index: {}]  }
   0x1   :  { %10 = vsyncpa [#allocation5 + $0x1], 0  ;;  %s1338_s12 = smov 0   ;;  %s1340_s13 = smov 0  }
   0x2   :  { %s1342_s14 = smov 0   ;;  %s1344_s15 = smov 0  }
   0x3   :  { %s1346_s16 = smov 0   ;;  %s1348_s17 = smov 0  }
   0x4   :  { %s1350_s18 = smov 0   ;;  %s1352_s19 = smov 0  }
   0x5   :  { %s1354_s20 = smov 0   ;;  %s1356_s21 = smov 0  }
   0x6 LB: > { %s1011_s22 = sadd.s32 4294967295, %s1311_s21   ;;  %s1012_s23 = sadd.s32 4294967294, %s1311_s21   ;;  %s1311_s21 = sphi %s1356_s21, %s16_s21   ;;  %s1307_s20 = sphi %s1354_s20, %s1660_s20   ;;  %s1303_s19 = sphi %s1352_s19, %s1659_s19   ;;  %s1299_s18 = sphi %s1350_s18, %s1658_s18   ;;  %s1295_s17 = sphi %s1348_s17, %s1657_s17   ;;  %s1291_s16 = sphi %s1346_s16, %s1656_s16   ;;  %s1287_s15 = sphi %s1344_s15, %s1655_s15   ;;  %s1283_s14 = sphi %s1342_s14, %s1654_s14   ;;  %s1279_s13 = sphi %s1340_s13, %s1653_s13   ;;  %s1275_s12 = sphi %s1338_s12, %s1652_s12  }
   0x7   : > { %s28_s24 = sadd.s32 1, %s1303_s19  ;;  %s35_s25 = sadd.s32 1, %s1307_s20 }
   0x8   : > { %p29_p0 = scmp.ge.s32.totalorder %s28_s24, 2  ;;  %s44_s26 = sadd.s32 1, %s1291_s16 }
   0x9   : > { %p51_p1 = scmp.ne.s32.totalorder %s1291_s16, %s1287_s15  ;;  %p52_p2 = scmp.eq.s32.totalorder %s1311_s21, 0 }
   0xa   : > { %s1662_s24 = smov (%p29_p0, %s28_s24), 0  ;;  %s1664_s25 = smov (!%p29_p0, %s35_s25), %s1307_s20 }
   0xb   : > { %s40_s27 = ssub.s32 %s1303_s19, %s1662_s24  ;;  %p1401_p3 = por %p52_p2, %p51_p1 }
   0xc   : > { %p37_p4 = scmp.ge.s32.totalorder %s1664_s25, 2  ;;  %s126_s29 = sadd.s32 1, %s1283_s14 }
   0xd   : > { %p136_p5 = scmp.ne.s32.totalorder %s1283_s14, %s1279_s13  ;;  %p137_p6 = scmp.eq.s32.totalorder %s1011_s22, 3 }
   0xe   : > { %s1666_s25 = smov (%p37_p4, %s1664_s25), 0  ;;  %p142_p8 = scmp.ne.s32.totalorder %s1279_s13, %s1275_s12 }
   0xf   : > { %p1410_p7 = por %p137_p6, %p136_p5  ;;  %s39_s4 = ssub.s32 %s1307_s20, %s1666_s25 }
  0x10   : > { %p143_p9 = scmp.eq.s32.totalorder %s1012_s23, 3  ;;  %s41_s5 = sor.u32 %s40_s27, %s39_s4 }
  0x11   : > { %p124_p10 = scmp.eq.s32.totalorder %s39_s4, 0  ;;  %p42_p11 = scmp.eq.s32.totalorder %s41_s5, 0 }
  0x12   : > { %p1418_p12 = por %p143_p9, %p142_p8  ;;  %p1015_p13 = scmp.ge.s32.totalorder %s1311_s21, 4 }
  0x13   : > { %s1423_s7 = scalar_select %p124_p10, %s1283_s14, %s126_s29  }
  0x14   : > { %s1426_s8 = scalar_select %p42_p11, %s1291_s16, %s44_s26  }
  0x15   : > { %167 = sbr.rel (%p1015_p13) target bundleno = 44 (0x2c), region = 20 }
  0x1c   : > { %170 = sbr.rel (!%p1401_p3) target bundleno = 44 (0x2c), region = 24  ;;  %s172_s9 = sand.u32 (%p1401_p3), 1, %s1291_s16  }
  0x1d   : > { %s1058_s10 = sshll.u32 (%p1401_p3), %s1307_s20, 5  ;;  %s1016_s11 = sshll.u32 (%p1401_p3), %s172_s9, 6 }
  0x1e   : > { %s177_s22 = sadd.s32 (%p1401_p3), %s1303_s19, %s1058_s10  ;;  %s174_s26 = scalar_lea.vmem (%p1401_p3), [#allocation3], %s1016_s11 }
  0x1f   : > { %s1019_s23 = sshll.u32 (%p1401_p3), %s177_s22, 2 }
  0x20   : > { %s1437_s29 = scalar_lea.vmem (%p1401_p3), %s1645_s0, %s1019_s23 }
  0x21   : > { %v195_v0 = vld [vmem:[%s1437_s29] sm:$0xf] (%p1401_p3)  ;;  %v197_v1 = vld [vmem:[%s1437_s29 + $0x8] sm:$0xf] (%p1401_p3)  ;;  %v199_v2 = vld [vmem:[%s1437_s29 + $0x10] sm:$0xf] (%p1401_p3) }
  0x22   : > { %196 = vst [vmem:[%s174_s26] sm:$0xf] (%p1401_p3), %v195_v0  ;;  %198 = vst [vmem:[%s174_s26 + $0x4] sm:$0xf] (%p1401_p3), %v197_v1  ;;  %v201_v3 = vld [vmem:[%s1437_s29 + $0x18] sm:$0xf] (%p1401_p3) }
  0x23   : > { %200 = vst [vmem:[%s174_s26 + $0x8] sm:$0xf] %v199_v2  ;;  %v203_v4 = vld [vmem:[%s1437_s29 + $0x20] sm:$0xf]  ;;  %v205_v5 = vld [vmem:[%s1437_s29 + $0x28] sm:$0xf] }
  0x24   : > { %202 = vst [vmem:[%s174_s26 + $0xc] sm:$0xf] %v201_v3  ;;  %204 = vst [vmem:[%s174_s26 + $0x10] sm:$0xf] %v203_v4  ;;  %v207_v6 = vld [vmem:[%s1437_s29 + $0x30] sm:$0xf] }
  0x25   : > { %206 = vst [vmem:[%s174_s26 + $0x14] sm:$0xf] %v205_v5  ;;  %v209_v7 = vld [vmem:[%s1437_s29 + $0x38] sm:$0xf]  ;;  %v211_v8 = vld [vmem:[%s1437_s29 + $0x40] sm:$0xf] }
  0x26   : > { %208 = vst [vmem:[%s174_s26 + $0x18] sm:$0xf] %v207_v6  ;;  %210 = vst [vmem:[%s174_s26 + $0x1c] sm:$0xf] %v209_v7  ;;  %v213_v9 = vld [vmem:[%s1437_s29 + $0x48] sm:$0xf] }
  0x27   : > { %212 = vst [vmem:[%s174_s26 + $0x20] sm:$0xf] %v211_v8  ;;  %v215_v10 = vld [vmem:[%s1437_s29 + $0x50] sm:$0xf]  ;;  %v217_v11 = vld [vmem:[%s1437_s29 + $0x58] sm:$0xf] }
  0x28   : > { %214 = vst [vmem:[%s174_s26 + $0x24] sm:$0xf] %v213_v9  ;;  %216 = vst [vmem:[%s174_s26 + $0x28] sm:$0xf] %v215_v10  ;;  %v219_v12 = vld [vmem:[%s1437_s29 + $0x60] sm:$0xf] }
  0x29   : > { %218 = vst [vmem:[%s174_s26 + $0x2c] sm:$0xf] %v217_v11  ;;  %v221_v13 = vld [vmem:[%s1437_s29 + $0x68] sm:$0xf]  ;;  %v223_v14 = vld [vmem:[%s1437_s29 + $0x70] sm:$0xf] }
  0x2a   : > { %220 = vst [vmem:[%s174_s26 + $0x30] sm:$0xf] %v219_v12  ;;  %222 = vst [vmem:[%s174_s26 + $0x34] sm:$0xf] %v221_v13  ;;  %v225_v15 = vld [vmem:[%s1437_s29 + $0x78] sm:$0xf] }
  0x2b   : > { %224 = vst [vmem:[%s174_s26 + $0x38] sm:$0xf] %v223_v14  ;;  %226 = vst [vmem:[%s174_s26 + $0x3c] sm:$0xf] %v225_v15 }
  0x2c PF: > { %p1020_p0 = scmp.ge.s32.totalorder %s1311_s21, 1  ;;  %p295_p1 = scmp.lt.s32.totalorder %s1311_s21, 5 }
  0x2e   : > { %p296_p2 = pnand %p1020_p0, %p295_p1 }
  0x2f   : > { %s302_s28 = sand.u32 (!%p296_p2), 1, %s1287_s15   ;;  %s336_s5 = sand.u32 (!%p296_p2), 1, %s1279_s13  }
  0x30   : > { %299 = sbr.rel (%p296_p2) target bundleno = 386 (0x182), region = 69  ;;  %s1021_s9 = sshll.u32 (!%p296_p2), %s302_s28, 6 }
  0x31   : > { %s1022_s10 = sshll.u32 (!%p296_p2), %s336_s5, 8  ;;  %s1023_s11 = sshll.u32 (!%p296_p2), %s1295_s17, 4 }
  0x32   : > { %p342_p3 = scmp.lt.s32.totalorder (!%p296_p2), %s1023_s11, 31  ;;  %s1467_s29 = scalar_lea.vmem (!%p296_p2), [#allocation3], %s1021_s9 }
  0x33   : > { %s1469_s26 = scalar_lea.vmem (!%p296_p2), [#allocation4], %s1022_s10  ;;  %p1026_p4 = scmp.ne.s32.totalorder (!%p296_p2), %s1295_s17, 0 }
  0x37   : > { %s1668_s11 = smov (!%p342_p3, %s1023_s11), 31  ;;  %363 = sbr.rel (%p1026_p4) target bundleno = 73 (0x49), region = 77 }
  0x38   : > { %s1059_s22 = sshll.u32 %s1668_s11, 3  ;;  %v1313_v16 = vmov (!%p1026_p4), 0.0  }
  0x39   : > { %s1465_s4 = scalar_lea.vmem %s1646_s1, %s1059_s22  ;;  %364 = vst [vmem:[#allocation2] sm:$0xff] (!%p1026_p4), %v1313_v16  ;;  %365 = vst [vmem:[#allocation2 + $0x8] sm:$0xff] (!%p1026_p4), %v1313_v16 }
  0x3a   : > { %366 = vst [vmem:[#allocation2 + $0x10] sm:$0xff] (!%p1026_p4), %v1313_v16  ;;  %367 = vst [vmem:[#allocation2 + $0x18] sm:$0xff] (!%p1026_p4), %v1313_v16 }
  0x3b   : > { %368 = vst [vmem:[#allocation2 + $0x20] sm:$0xff] (!%p1026_p4), %v1313_v16  ;;  %369 = vst [vmem:[#allocation2 + $0x28] sm:$0xff] (!%p1026_p4), %v1313_v16 }
  0x3c   : > { %370 = vst [vmem:[#allocation2 + $0x30] sm:$0xff] (!%p1026_p4), %v1313_v16  ;;  %371 = vst [vmem:[#allocation2 + $0x38] sm:$0xff] (!%p1026_p4), %v1313_v16 }
  0x3d   : > { %372 = vst [vmem:[#allocation2 + $0x40] sm:$0xff] (!%p1026_p4), %v1313_v16  ;;  %373 = vst [vmem:[#allocation2 + $0x48] sm:$0xff] (!%p1026_p4), %v1313_v16 }
  0x3e   : > { %374 = vst [vmem:[#allocation2 + $0x50] sm:$0xff] %v1313_v16  ;;  %375 = vst [vmem:[#allocation2 + $0x58] sm:$0xff] %v1313_v16 }
  0x3f   : > { %376 = vst [vmem:[#allocation2 + $0x60] sm:$0xff] %v1313_v16  ;;  %377 = vst [vmem:[#allocation2 + $0x68] sm:$0xff] %v1313_v16 }
  0x40   : > { %378 = vst [vmem:[#allocation2 + $0x70] sm:$0xff] %v1313_v16  ;;  %379 = vst [vmem:[#allocation2 + $0x78] sm:$0xff] %v1313_v16 }
  0x41   : > { %380 = vst [vmem:[#allocation2 + $0x80] sm:$0xff] %v1313_v16  ;;  %381 = vst [vmem:[#allocation2 + $0x88] sm:$0xff] %v1313_v16 }
  0x42   : > { %382 = vst [vmem:[#allocation2 + $0x90] sm:$0xff] %v1313_v16  ;;  %383 = vst [vmem:[#allocation2 + $0x98] sm:$0xff] %v1313_v16 }
  0x43   : > { %384 = vst [vmem:[#allocation2 + $0xa0] sm:$0xff] %v1313_v16  ;;  %385 = vst [vmem:[#allocation2 + $0xa8] sm:$0xff] %v1313_v16 }
  0x44   : > { %386 = vst [vmem:[#allocation2 + $0xb0] sm:$0xff] %v1313_v16  ;;  %387 = vst [vmem:[#allocation2 + $0xb8] sm:$0xff] %v1313_v16 }
  0x45   : > { %388 = vst [vmem:[#allocation2 + $0xc0] sm:$0xff] %v1313_v16  ;;  %389 = vst [vmem:[#allocation2 + $0xc8] sm:$0xff] %v1313_v16 }
  0x46   : > { %390 = vst [vmem:[#allocation2 + $0xd0] sm:$0xff] %v1313_v16  ;;  %391 = vst [vmem:[#allocation2 + $0xd8] sm:$0xff] %v1313_v16 }
  0x47   : > { %392 = vst [vmem:[#allocation2 + $0xe0] sm:$0xff] %v1313_v16  ;;  %393 = vst [vmem:[#allocation2 + $0xe8] sm:$0xff] %v1313_v16 }
  0x48   : > { %394 = vst [vmem:[#allocation2 + $0xf0] sm:$0xff] %v1313_v16  ;;  %395 = vst [vmem:[#allocation2 + $0xf8] sm:$0xff] %v1313_v16 }
  0x49 PF: > { %v1169_v17 = vld [vmem:[%s1465_s4 + $0x4] ss:$8 sps:$4 sm:$0xff]   ;;  %v1171_v18 = vld [vmem:[%s1465_s4] ss:$8 sps:$4 sm:$0xff]   ;;  %v1314_v19 = vmov 0   ;;  %v1197_v38 = vld [vmem:[%s1467_s29 + $0x10] sm:$0xff]  }
  0x4a   : > { %620 = vmatprep.mubr.bf16.mxu0 %v1314_v19  ;;  %660 = vmatprep.mubr.bf16.mxu1 %v1314_v19  ;;  %v1172_v20 = vld [vmem:[%s1465_s4 + $0x14] ss:$8 sps:$4 sm:$0xff]   ;;  %v1174_v21 = vld [vmem:[%s1465_s4 + $0x10] ss:$8 sps:$4 sm:$0xff]   ;;  %v1175_v22 = vld [vmem:[%s1465_s4 + $0x24] ss:$8 sps:$4 sm:$0xff]  }
  0x4b   : > { %588 = vmatprep.subr.bf16.mxu0 %v1169_v17  ;;  %1062 = vmatprep.subr.bf16.mxu1 %v1169_v17  ;;  %v1177_v23 = vld [vmem:[%s1465_s4 + $0x20] ss:$8 sps:$4 sm:$0xff]   ;;  %v1178_v24 = vld [vmem:[%s1465_s4 + $0x34] ss:$8 sps:$4 sm:$0xff]   ;;  %v1180_v25 = vld [vmem:[%s1465_s4 + $0x30] ss:$8 sps:$4 sm:$0xff]  }
  0x4c   : > { %589 = vmatpush1.bf16.msra.mxu0 %v1171_v18  ;;  %1070 = vmatpush1.bf16.msra.mxu1 %v1171_v18  ;;  %v1181_v26 = vld [vmem:[%s1465_s4 + $0x44] ss:$8 sps:$4 sm:$0xff]   ;;  %v1183_v27 = vld [vmem:[%s1465_s4 + $0x40] ss:$8 sps:$4 sm:$0xff]   ;;  %v1184_v28 = vld [vmem:[%s1465_s4 + $0x54] ss:$8 sps:$4 sm:$0xff]  }
  0x4d   : > { %590 = vmatprep.subr.bf16.mxu0 %v1172_v20  ;;  %1063 = vmatprep.subr.bf16.mxu1 %v1172_v20  ;;  %v1186_v29 = vld [vmem:[%s1465_s4 + $0x50] ss:$8 sps:$4 sm:$0xff]   ;;  %v1187_v30 = vld [vmem:[%s1465_s4 + $0x64] ss:$8 sps:$4 sm:$0xff]   ;;  %v1189_v31 = vld [vmem:[%s1465_s4 + $0x60] ss:$8 sps:$4 sm:$0xff]  }
  0x4e   : > { %v1190_v32 = vld [vmem:[%s1465_s4 + $0x74] ss:$8 sps:$4 sm:$0xff]   ;;  %v1192_v33 = vld [vmem:[%s1465_s4 + $0x70] ss:$8 sps:$4 sm:$0xff]   ;;  %v1193_v34 = vld [vmem:[%s1467_s29] sm:$0xff]   ;;  %p1051_p5 = scmp.ne.s32.totalorder %s1295_s17, 1 }
  0x4f   : > { %v1194_v35 = vld [vmem:[%s1467_s29 + $0x20] sm:$0xff]   ;;  %v1195_v36 = vld [vmem:[%s1467_s29 + $0x8] sm:$0xff]   ;;  %v1198_v39 = vld [vmem:[%s1467_s29 + $0x30] sm:$0xff]  }
  0x50   : > { %591 = vmatpush1.bf16.msra.mxu0 %v1174_v21  ;;  %1071 = vmatpush1.bf16.msra.mxu1 %v1174_v21  ;;  %v1196_v37 = vld [vmem:[%s1467_s29 + $0x28] sm:$0xff]   ;;  %v1199_v40 = vld [vmem:[%s1467_s29 + $0x18] sm:$0xff]   ;;  %v396_v42 = vld [vmem:[#allocation2] sm:$0xff] }
  0x51   : > { %592 = vmatprep.subr.bf16.mxu0 %v1175_v22  ;;  %1064 = vmatprep.subr.bf16.mxu1 %v1175_v22  ;;  %v1200_v41 = vld [vmem:[%s1467_s29 + $0x38] sm:$0xff]   ;;  %v412_v43 = vld [vmem:[#allocation2 + $0x80] sm:$0xff]  ;;  %v397_v44 = vld [vmem:[#allocation2 + $0x8] sm:$0xff] }
  0x52   : > { %v413_v45 = vld [vmem:[#allocation2 + $0x88] sm:$0xff]  ;;  %v398_v48 = vld [vmem:[#allocation2 + $0x10] sm:$0xff]  ;;  %v399_v54 = vld [vmem:[#allocation2 + $0x18] sm:$0xff] }
  0x53   : > { %v414_v49 = vld [vmem:[#allocation2 + $0x90] sm:$0xff]  ;;  %v415_v55 = vld [vmem:[#allocation2 + $0x98] sm:$0xff]  ;;  %v400_v2 = vld [vmem:[#allocation2 + $0x20] sm:$0xff] }
  0x54   : > { %593 = vmatpush1.bf16.msra.mxu0 %v1177_v23  ;;  %1072 = vmatpush1.bf16.msra.mxu1 %v1177_v23  ;;  %v416_v3 = vld [vmem:[#allocation2 + $0xa0] sm:$0xff]  ;;  %v401_v4 = vld [vmem:[#allocation2 + $0x28] sm:$0xff]  ;;  %v402_v8 = vld [vmem:[#allocation2 + $0x30] sm:$0xff] }
  0x55   : > { %594 = vmatprep.subr.bf16.mxu0 %v1178_v24  ;;  %1065 = vmatprep.subr.bf16.mxu1 %v1178_v24  ;;  %v417_v5 = vld [vmem:[#allocation2 + $0xa8] sm:$0xff]  ;;  %v418_v9 = vld [vmem:[#allocation2 + $0xb0] sm:$0xff]  ;;  %v403_v14 = vld [vmem:[#allocation2 + $0x38] sm:$0xff] }
  0x56   : > { %v419_v15 = vld [vmem:[#allocation2 + $0xb8] sm:$0xff] }
  0x58   : > { %595 = vmatpush1.bf16.msra.mxu0 %v1180_v25  ;;  %1073 = vmatpush1.bf16.msra.mxu1 %v1180_v25 }
  0x59   : > { %596 = vmatprep.subr.bf16.mxu0 %v1181_v26  ;;  %1066 = vmatprep.subr.bf16.mxu1 %v1181_v26  ;;  %v404_v26 = vld [vmem:[#allocation2 + $0x40] sm:$0xff] }
  0x5c   : > { %597 = vmatpush1.bf16.msra.mxu0 %v1183_v27  ;;  %1074 = vmatpush1.bf16.msra.mxu1 %v1183_v27  ;;  %v420_v27 = vld [vmem:[#allocation2 + $0xc0] sm:$0xff] }
  0x5d   : > { %598 = vmatprep.subr.bf16.mxu0 %v1184_v28  ;;  %1067 = vmatprep.subr.bf16.mxu1 %v1184_v28  ;;  %v405_v28 = vld [vmem:[#allocation2 + $0x48] sm:$0xff] }
  0x60   : > { %599 = vmatpush1.bf16.msra.mxu0 %v1186_v29  ;;  %1075 = vmatpush1.bf16.msra.mxu1 %v1186_v29  ;;  %v421_v29 = vld [vmem:[#allocation2 + $0xc8] sm:$0xff] }
  0x61   : > { %600 = vmatprep.subr.bf16.mxu0 %v1187_v30  ;;  %1068 = vmatprep.subr.bf16.mxu1 %v1187_v30 }
  0x64   : > { %601 = vmatpush1.bf16.msra.mxu0 %v1189_v31  ;;  %1076 = vmatpush1.bf16.msra.mxu1 %v1189_v31 }
  0x65   : > { %602 = vmatprep.subr.bf16.mxu0 %v1190_v32  ;;  %1069 = vmatprep.subr.bf16.mxu1 %v1190_v32  ;;  %v406_v32 = vld [vmem:[#allocation2 + $0x50] sm:$0xff] }
  0x68   : > { %603 = vmatpush1.bf16.msra.mxu0 %v1192_v33  ;;  %1077 = vmatpush1.bf16.msra.mxu1 %v1192_v33  ;;  %v422_v33 = vld [vmem:[#allocation2 + $0xd0] sm:$0xff] }
  0x6b   : > { %621 = vmatmul.mubr.bf16.vlgmr.msra.gmra.mrb[0].mxu0 %v1193_v34  ;;  %661 = vmatmul.mubr.bf16.vlgmr.msra.gmra.mrb[0].mxu1 %v1194_v35 }
  0x6c   : > { %630 = vmatprep.mubr.bf16.mxu0 %v1314_v19  ;;  %670 = vmatprep.mubr.bf16.mxu1 %v1314_v19 }
  0x73   : > { %631 = vmatmul.mubr.bf16.gmra.mrb[4].mxu0 %v1195_v36  ;;  %671 = vmatmul.mubr.bf16.gmra.mrb[4].mxu1 %v1196_v37 }
  0x74   : > { %640 = vmatprep.mubr.bf16.mxu0 %v1314_v19  ;;  %680 = vmatprep.mubr.bf16.mxu1 %v1314_v19 }
  0x7b   : > { %641 = vmatmul.mubr.bf16.gmra.mrb[8].mxu0 %v1197_v38  ;;  %681 = vmatmul.mubr.bf16.gmra.mrb[8].mxu1 %v1198_v39  ;;  %v407_v38 = vld [vmem:[#allocation2 + $0x58] sm:$0xff] }
  0x7c   : > { %650 = vmatprep.mubr.bf16.mxu0 %v1314_v19  ;;  %690 = vmatprep.mubr.bf16.mxu1 %v1314_v19  ;;  %v423_v39 = vld [vmem:[#allocation2 + $0xd8] sm:$0xff] }
  0x83   : > { %651 = vmatmul.mubr.bf16.gmra.mrb[12].mxu0 %v1199_v40  ;;  %691 = vmatmul.mubr.bf16.gmra.mrb[12].mxu1 %v1200_v41 }
 0x13e   : > { %v622_v46 = vpop.f32.mrb[0].mxu0  ;;  %v662_v47 = vpop.f32.mrb[0].mxu1 }
 0x13f   : > { %v701_v50 = vadd.f32 %v622_v46, %v396_v42  ;;  %v717_v51 = vadd.f32 %v662_v47, %v412_v43  ;;  %v624_v52 = vpop.f32.mrb[1].mxu0  ;;  %v664_v53 = vpop.f32.mrb[1].mxu1 }
 0x140   : > { %v702_v56 = vadd.f32 %v624_v52, %v397_v44  ;;  %v718_v57 = vadd.f32 %v664_v53, %v413_v45  ;;  %v626_v58 = vpop.f32.mrb[2].mxu0  ;;  %v666_v59 = vpop.f32.mrb[2].mxu1  ;;  %v409_v52 = vld [vmem:[#allocation2 + $0x68] sm:$0xff] }
 0x141   : > { %733 = vst [vmem:[#allocation2] sm:$0xff] %v701_v50  ;;  %749 = vst [vmem:[#allocation2 + $0x80] sm:$0xff] %v717_v51  ;;  %v703_v60 = vadd.f32 %v626_v58, %v398_v48  ;;  %v719_v61 = vadd.f32 %v666_v59, %v414_v49  ;;  %v628_v62 = vpop.f32.mrb[3].mxu0  ;;  %v668_v63 = vpop.f32.mrb[3].mxu1  ;;  %v408_v50 = vld [vmem:[#allocation2 + $0x60] sm:$0xff]  ;;  %v425_v53 = vld [vmem:[#allocation2 + $0xe8] sm:$0xff] }
 0x142   : > { %734 = vst [vmem:[#allocation2 + $0x8] sm:$0xff] %v702_v56  ;;  %750 = vst [vmem:[#allocation2 + $0x88] sm:$0xff] %v718_v57  ;;  %v704_v0 = vadd.f32 %v628_v62, %v399_v54  ;;  %v720_v1 = vadd.f32 %v668_v63, %v415_v55  ;;  %v424_v51 = vld [vmem:[#allocation2 + $0xe0] sm:$0xff]  ;;  %v410_v56 = vld [vmem:[#allocation2 + $0x70] sm:$0xff] }
 0x143   : > { %735 = vst [vmem:[#allocation2 + $0x10] sm:$0xff] %v703_v60  ;;  %751 = vst [vmem:[#allocation2 + $0x90] sm:$0xff] %v719_v61  ;;  %v426_v57 = vld [vmem:[#allocation2 + $0xf0] sm:$0xff]  ;;  %v411_v62 = vld [vmem:[#allocation2 + $0x78] sm:$0xff] }
 0x144   : > { %736 = vst [vmem:[#allocation2 + $0x18] sm:$0xff] %v704_v0  ;;  %752 = vst [vmem:[#allocation2 + $0x98] sm:$0xff] %v720_v1  ;;  %v427_v63 = vld [vmem:[#allocation2 + $0xf8] sm:$0xff] }
 0x146   : > { %v632_v6 = vpop.f32.mrb[4].mxu0  ;;  %v672_v7 = vpop.f32.mrb[4].mxu1 }
 0x147   : > { %v705_v10 = vadd.f32 %v632_v6, %v400_v2  ;;  %v721_v11 = vadd.f32 %v672_v7, %v416_v3  ;;  %v634_v12 = vpop.f32.mrb[5].mxu0  ;;  %v674_v13 = vpop.f32.mrb[5].mxu1 }
 0x148   : > { %v706_v16 = vadd.f32 %v634_v12, %v401_v4  ;;  %v722_v17 = vadd.f32 %v674_v13, %v417_v5  ;;  %v636_v18 = vpop.f32.mrb[6].mxu0  ;;  %v676_v19 = vpop.f32.mrb[6].mxu1  ;;  %v769_v13 = vld [vmem:[#allocation2] sm:$0xff] (!%p1051_p5) }
 0x149   : > { %737 = vst [vmem:[#allocation2 + $0x20] sm:$0xff] %v705_v10  ;;  %753 = vst [vmem:[#allocation2 + $0xa0] sm:$0xff] %v721_v11  ;;  %v707_v20 = vadd.f32 %v636_v18, %v402_v8  ;;  %v723_v21 = vadd.f32 %v676_v19, %v418_v9  ;;  %v638_v22 = vpop.f32.mrb[7].mxu0  ;;  %v678_v23 = vpop.f32.mrb[7].mxu1  ;;  %v803_v10 = vlaneseq (!%p1051_p5)  ;;  %v801_v11 = vld [vmem:[%s1647_s2] sm:$0x3] (!%p1051_p5) }
 0x14a   : > { %738 = vst [vmem:[#allocation2 + $0x28] sm:$0xff] %v706_v16  ;;  %754 = vst [vmem:[#allocation2 + $0xa8] sm:$0xff] %v722_v17  ;;  %v708_v24 = vadd.f32 %v638_v22, %v403_v14  ;;  %v724_v25 = vadd.f32 %v678_v23, %v419_v15  ;;  %v770_v14 = vld [vmem:[#allocation2 + $0x8] sm:$0xff] (!%p1051_p5)  ;;  %v771_v15 = vld [vmem:[#allocation2 + $0x10] sm:$0xff] (!%p1051_p5) }
 0x14b   : > { %739 = vst [vmem:[#allocation2 + $0x30] sm:$0xff] %v707_v20  ;;  %755 = vst [vmem:[#allocation2 + $0xb0] sm:$0xff] %v723_v21  ;;  %v804_v12 = vshrl.u32 (!%p1051_p5), %v803_v10, 7  ;;  %v772_v16 = vld [vmem:[#allocation2 + $0x18] sm:$0xff] (!%p1051_p5) }
 0x14c   : > { %740 = vst [vmem:[#allocation2 + $0x38] sm:$0xff] %v708_v24  ;;  %756 = vst [vmem:[#allocation2 + $0xb8] sm:$0xff] %v724_v25 }
 0x14d   : > { %v805_v17 = vsub.s32 (!%p1051_p5), 0, %v804_v12  ;;  %v809_v18 = vsub.s32 (!%p1051_p5), 1, %v804_v12 }
 0x14e   : > { %v642_v30 = vpop.f32.mrb[8].mxu0  ;;  %v682_v31 = vpop.f32.mrb[8].mxu1 }
 0x14f   : > { %v709_v34 = vadd.f32 %v642_v30, %v404_v26  ;;  %v725_v35 = vadd.f32 %v682_v31, %v420_v27  ;;  %v644_v36 = vpop.f32.mrb[9].mxu0  ;;  %v684_v37 = vpop.f32.mrb[9].mxu1  ;;  %v1508_v26 = vrot.slane (!%p1051_p5), %v801_v11, %v805_v17  ;;  %v1510_v27 = vrot.slane (!%p1051_p5), %v801_v11, %v809_v18 }
 0x150   : > { %v710_v40 = vadd.f32 %v644_v36, %v405_v28  ;;  %v726_v41 = vadd.f32 %v684_v37, %v421_v29  ;;  %v646_v42 = vpop.f32.mrb[10].mxu0  ;;  %v686_v43 = vpop.f32.mrb[10].mxu1  ;;  %v773_v19 = vld [vmem:[#allocation2 + $0x20] sm:$0xff] (!%p1051_p5) }
 0x151   : > { %741 = vst [vmem:[#allocation2 + $0x40] sm:$0xff] %v709_v34  ;;  %757 = vst [vmem:[#allocation2 + $0xc0] sm:$0xff] %v725_v35  ;;  %v711_v44 = vadd.f32 %v646_v42, %v406_v32  ;;  %v727_v45 = vadd.f32 %v686_v43, %v422_v33  ;;  %v648_v46 = vpop.f32.mrb[11].mxu0  ;;  %v688_v47 = vpop.f32.mrb[11].mxu1  ;;  %v774_v20 = vld [vmem:[#allocation2 + $0x28] sm:$0xff] (!%p1051_p5)  ;;  %v785_v33 = vld [vmem:[#allocation2 + $0x80] sm:$0xff] (!%p1051_p5)  ;;  %v813_v34 = vadd.f32 (!%p1051_p5), %v1508_v26, %v769_v13 }
 0x152   : > { %742 = vst [vmem:[#allocation2 + $0x48] sm:$0xff] %v710_v40  ;;  %758 = vst [vmem:[#allocation2 + $0xc8] sm:$0xff] %v726_v41  ;;  %v712_v48 = vadd.f32 %v648_v46, %v407_v38  ;;  %v728_v49 = vadd.f32 %v688_v47, %v423_v39  ;;  %v775_v21 = vld [vmem:[#allocation2 + $0x30] sm:$0xff] (!%p1051_p5)  ;;  %v814_v35 = vadd.f32 (!%p1051_p5), %v1510_v27, %v770_v14  ;;  %v786_v38 = vld [vmem:[#allocation2 + $0x88] sm:$0xff] (!%p1051_p5) }
 0x153   : > { %743 = vst [vmem:[#allocation2 + $0x50] sm:$0xff] %v711_v44  ;;  %759 = vst [vmem:[#allocation2 + $0xd0] sm:$0xff] %v727_v45  ;;  %v776_v22 = vld [vmem:[#allocation2 + $0x38] sm:$0xff] (!%p1051_p5)  ;;  %v815_v36 = vadd.f32 (!%p1051_p5), %v1508_v26, %v771_v15  ;;  %v816_v37 = vadd.f32 (!%p1051_p5), %v1510_v27, %v772_v16  ;;  %v787_v39 = vld [vmem:[#allocation2 + $0x90] sm:$0xff] (!%p1051_p5)  ;;  %v817_v41 = vadd.f32 (!%p1051_p5), %v1508_v26, %v773_v19 }
 0x154   : > { %744 = vst [vmem:[#allocation2 + $0x58] sm:$0xff] %v712_v48  ;;  %760 = vst [vmem:[#allocation2 + $0xd8] sm:$0xff] %v728_v49  ;;  %v788_v40 = vld [vmem:[#allocation2 + $0x98] sm:$0xff] (!%p1051_p5)  ;;  %v818_v42 = vadd.f32 (!%p1051_p5), %v1510_v27, %v774_v20  ;;  %v819_v43 = vadd.f32 (!%p1051_p5), %v1508_v26, %v775_v21  ;;  %v820_v44 = vadd.f32 (!%p1051_p5), %v1510_v27, %v776_v22  ;;  %v789_v45 = vld [vmem:[#allocation2 + $0xa0] sm:$0xff] (!%p1051_p5) }
 0x155   : > { %v790_v46 = vld [vmem:[#allocation2 + $0xa8] sm:$0xff] (!%p1051_p5)  ;;  %v791_v47 = vld [vmem:[#allocation2 + $0xb0] sm:$0xff] (!%p1051_p5)  ;;  %845 = vst [vmem:[%s1469_s26] sm:$0xff] (!%p1051_p5), %v813_v34  ;;  %846 = vst [vmem:[%s1469_s26 + $0x8] sm:$0xff] (!%p1051_p5), %v814_v35 }
 0x156   : > { %v652_v54 = vpop.f32.mrb[12].mxu0  ;;  %v692_v55 = vpop.f32.mrb[12].mxu1  ;;  %768 = sbr.rel (%p1051_p5) target bundleno = 361 (0x169), region = 81  ;;  %847 = vst [vmem:[%s1469_s26 + $0x10] sm:$0xff] (!%p1051_p5), %v815_v36  ;;  %848 = vst [vmem:[%s1469_s26 + $0x18] sm:$0xff] (!%p1051_p5), %v816_v37 }
 0x157   : > { %v713_v58 = vadd.f32 %v652_v54, %v408_v50  ;;  %v729_v59 = vadd.f32 %v692_v55, %v424_v51  ;;  %v654_v60 = vpop.f32.mrb[13].mxu0  ;;  %v694_v61 = vpop.f32.mrb[13].mxu1  ;;  %849 = vst [vmem:[%s1469_s26 + $0x20] sm:$0xff] (!%p1051_p5), %v817_v41  ;;  %850 = vst [vmem:[%s1469_s26 + $0x28] sm:$0xff] (!%p1051_p5), %v818_v42 }
 0x158   : > { %v714_v0 = vadd.f32 %v654_v60, %v409_v52  ;;  %v730_v1 = vadd.f32 %v694_v61, %v425_v53  ;;  %v656_v2 = vpop.f32.mrb[14].mxu0  ;;  %v696_v3 = vpop.f32.mrb[14].mxu1  ;;  %v777_v23 = vld [vmem:[#allocation2 + $0x40] sm:$0xff] (!%p1051_p5)  ;;  %v792_v52 = vld [vmem:[#allocation2 + $0xb8] sm:$0xff] (!%p1051_p5)  ;;  %851 = vst [vmem:[%s1469_s26 + $0x30] sm:$0xff] (!%p1051_p5), %v819_v43  ;;  %852 = vst [vmem:[%s1469_s26 + $0x38] sm:$0xff] (!%p1051_p5), %v820_v44 }
 0x159   : > { %745 = vst [vmem:[#allocation2 + $0x60] sm:$0xff] %v713_v58  ;;  %761 = vst [vmem:[#allocation2 + $0xe0] sm:$0xff] %v729_v59  ;;  %v715_v4 = vadd.f32 %v656_v2, %v410_v56  ;;  %v731_v5 = vadd.f32 %v696_v3, %v426_v57  ;;  %v658_v6 = vpop.f32.mrb[15].mxu0  ;;  %v698_v7 = vpop.f32.mrb[15].mxu1  ;;  %v778_v24 = vld [vmem:[#allocation2 + $0x48] sm:$0xff] (!%p1051_p5)  ;;  %v821_v48 = vadd.f32 (!%p1051_p5), %v1508_v26, %v777_v23  ;;  %v793_v53 = vld [vmem:[#allocation2 + $0xc0] sm:$0xff] (!%p1051_p5) }
 0x15a   : > { %746 = vst [vmem:[#allocation2 + $0x68] sm:$0xff] %v714_v0  ;;  %762 = vst [vmem:[#allocation2 + $0xe8] sm:$0xff] %v730_v1  ;;  %v716_v8 = vadd.f32 %v658_v6, %v411_v62  ;;  %v732_v9 = vadd.f32 %v698_v7, %v427_v63  ;;  %v779_v25 = vld [vmem:[#allocation2 + $0x50] sm:$0xff] (!%p1051_p5)  ;;  %v822_v49 = vadd.f32 (!%p1051_p5), %v1510_v27, %v778_v24  ;;  %v794_v54 = vld [vmem:[#allocation2 + $0xc8] sm:$0xff] (!%p1051_p5) }
 0x15b   : > { %747 = vst [vmem:[#allocation2 + $0x70] sm:$0xff] %v715_v4  ;;  %763 = vst [vmem:[#allocation2 + $0xf0] sm:$0xff] %v731_v5  ;;  %v780_v28 = vld [vmem:[#allocation2 + $0x58] sm:$0xff] (!%p1051_p5)  ;;  %v823_v50 = vadd.f32 (!%p1051_p5), %v1508_v26, %v779_v25  ;;  %v795_v59 = vld [vmem:[#allocation2 + $0xd0] sm:$0xff] (!%p1051_p5)  ;;  %v829_v62 = vadd.f32 (!%p1051_p5), %v1508_v26, %v785_v33  ;;  %v830_v63 = vadd.f32 (!%p1051_p5), %v1510_v27, %v786_v38 }
 0x15c   : > { %748 = vst [vmem:[#allocation2 + $0x78] sm:$0xff] %v716_v8  ;;  %764 = vst [vmem:[#allocation2 + $0xf8] sm:$0xff] %v732_v9  ;;  %v824_v51 = vadd.f32 (!%p1051_p5), %v1510_v27, %v780_v28  ;;  %v796_v60 = vld [vmem:[#allocation2 + $0xd8] sm:$0xff] (!%p1051_p5)  ;;  %v831_v0 = vadd.f32 (!%p1051_p5), %v1508_v26, %v787_v39  ;;  %v832_v1 = vadd.f32 (!%p1051_p5), %v1510_v27, %v788_v40 }
 0x15d   : > { %853 = vst [vmem:[%s1469_s26 + $0x40] sm:$0xff] %v821_v48  ;;  %854 = vst [vmem:[%s1469_s26 + $0x48] sm:$0xff] %v822_v49  ;;  %v833_v5 = vadd.f32 %v1508_v26, %v789_v45  ;;  %v834_v6 = vadd.f32 %v1510_v27, %v790_v46  ;;  %v835_v7 = vadd.f32 %v1508_v26, %v791_v47 }
 0x15e   : > { %855 = vst [vmem:[%s1469_s26 + $0x50] sm:$0xff] %v823_v50  ;;  %856 = vst [vmem:[%s1469_s26 + $0x58] sm:$0xff] %v824_v51  ;;  %v836_v8 = vadd.f32 %v1510_v27, %v792_v52  ;;  %v837_v9 = vadd.f32 %v1508_v26, %v793_v53  ;;  %v838_v10 = vadd.f32 %v1510_v27, %v794_v54 }
 0x15f   : > { %861 = vst [vmem:[%s1469_s26 + $0x80] sm:$0xff] %v829_v62  ;;  %862 = vst [vmem:[%s1469_s26 + $0x88] sm:$0xff] %v830_v63  ;;  %v839_v11 = vadd.f32 %v1508_v26, %v795_v59  ;;  %v840_v12 = vadd.f32 %v1510_v27, %v796_v60 }
 0x160   : > { %v781_v29 = vld [vmem:[#allocation2 + $0x60] sm:$0xff]  ;;  %863 = vst [vmem:[%s1469_s26 + $0x90] sm:$0xff] %v831_v0  ;;  %864 = vst [vmem:[%s1469_s26 + $0x98] sm:$0xff] %v832_v1 }
 0x161   : > { %v782_v30 = vld [vmem:[#allocation2 + $0x68] sm:$0xff]  ;;  %v825_v55 = vadd.f32 %v1508_v26, %v781_v29  ;;  %v797_v61 = vld [vmem:[#allocation2 + $0xe0] sm:$0xff]  ;;  %865 = vst [vmem:[%s1469_s26 + $0xa0] sm:$0xff] %v833_v5  ;;  %866 = vst [vmem:[%s1469_s26 + $0xa8] sm:$0xff] %v834_v6 }
 0x162   : > { %v783_v31 = vld [vmem:[#allocation2 + $0x70] sm:$0xff]  ;;  %v826_v56 = vadd.f32 %v1510_v27, %v782_v30  ;;  %v798_v2 = vld [vmem:[#allocation2 + $0xe8] sm:$0xff]  ;;  %867 = vst [vmem:[%s1469_s26 + $0xb0] sm:$0xff] %v835_v7  ;;  %868 = vst [vmem:[%s1469_s26 + $0xb8] sm:$0xff] %v836_v8  ;;  %v841_v13 = vadd.f32 %v1508_v26, %v797_v61 }
 0x163   : > { %v784_v32 = vld [vmem:[#allocation2 + $0x78] sm:$0xff]  ;;  %v827_v57 = vadd.f32 %v1508_v26, %v783_v31  ;;  %v799_v3 = vld [vmem:[#allocation2 + $0xf0] sm:$0xff]  ;;  %857 = vst [vmem:[%s1469_s26 + $0x60] sm:$0xff] %v825_v55  ;;  %v842_v14 = vadd.f32 %v1510_v27, %v798_v2  ;;  %869 = vst [vmem:[%s1469_s26 + $0xc0] sm:$0xff] %v837_v9 }
 0x164   : > { %v828_v58 = vadd.f32 %v1510_v27, %v784_v32  ;;  %v800_v4 = vld [vmem:[#allocation2 + $0xf8] sm:$0xff]  ;;  %858 = vst [vmem:[%s1469_s26 + $0x68] sm:$0xff] %v826_v56  ;;  %v843_v15 = vadd.f32 %v1508_v26, %v799_v3  ;;  %870 = vst [vmem:[%s1469_s26 + $0xc8] sm:$0xff] %v838_v10 }
 0x165   : > { %859 = vst [vmem:[%s1469_s26 + $0x70] sm:$0xff] %v827_v57  ;;  %v844_v16 = vadd.f32 %v1510_v27, %v800_v4  ;;  %871 = vst [vmem:[%s1469_s26 + $0xd0] sm:$0xff] %v839_v11 }
 0x166   : > { %860 = vst [vmem:[%s1469_s26 + $0x78] sm:$0xff] %v828_v58  ;;  %872 = vst [vmem:[%s1469_s26 + $0xd8] sm:$0xff] %v840_v12 }
 0x167   : > { %873 = vst [vmem:[%s1469_s26 + $0xe0] sm:$0xff] %v841_v13  ;;  %874 = vst [vmem:[%s1469_s26 + $0xe8] sm:$0xff] %v842_v14 }
 0x168   : > { %875 = vst [vmem:[%s1469_s26 + $0xf0] sm:$0xff] %v843_v15  ;;  %876 = vst [vmem:[%s1469_s26 + $0xf8] sm:$0xff] %v844_v16 }
 0x169 PF: > { %s1061_s17 = sshll.u32 %s1299_s18, 12  ;;  %s894_s22 = sshll.u32 %s1469_s26, 4  ;;  %s1583_s22 = int_to_ptr.vmem [resolvable:$true] %s894_s22 }
 0x16a   : > { %s1580_s11 = scalar_lea.hbm %s1648_s3, %s1061_s17  ;;  %s1587_s23 = scalar_lea.sflag [#allocation5], %s336_s5 }
 0x16b   : > { %s1201_s27 = scalar_lea.vmem %s1583_s22, 4096  ;;  %s1315_s18 = smov [#allocation4]  }
 0x16c   : > { %p1202_p6 = scmp.ne.s32.totalorder %s1583_s22, %s1201_s27  ;;  %s1205_s4 = sshll.u32 %s1315_s18, 4  ;;  %s1206_s4 = int_to_ptr.vmem [resolvable:$false] %s1205_s4 }
 0x16d   : > { %s1207_s29 = scalar_lea.vmem %s1206_s4, 8192  ;;  %p1208_p10 = scmp.lt.s32.totalorder %s1583_s22, %s1206_s4 }
 0x16e   : > { %p1203_p8 = pnand %p1202_p6, %p1410_p7  ;;  %p1209_p11 = scmp.lt.s32.totalorder %s1207_s29, %s1201_s27 }
 0x170   : > { %p1204_p9 = pneg %p1203_p8  ;;  %p1210_p13 = por %p1209_p11, %p1208_p10 }
 0x172   : > { %p1211_p0 = pnand %p1210_p13, %p1204_p9 }
 0x174   : > { %1214 = shalt.err (!%p1211_p0)
}
 0x175   : > { %s1215_s5 = scalar_lea.hbm %s1580_s11, 4096  ;;  %s1219_s28 = scalar_lea.hbm %s1648_s3, 8192 }
 0x176   : > { %p1216_p1 = scmp.ne.s32.totalorder %s1580_s11, %s1215_s5  ;;  %p1220_p4 = scmp.lt.u32.totalorder %s1580_s11, %s1648_s3 }
 0x177   : > { %p1221_p5 = scmp.lt.u32.totalorder %s1219_s28, %s1215_s5  ;;  %p1223_p8 = scmp.lt.u32.totalorder %s1215_s5, %s1580_s11 }
 0x178   : > { %p1217_p2 = pnand %p1216_p1, %p1410_p7 }
 0x179   : > { %p1222_p6 = por %p1221_p5, %p1220_p4 }
 0x17a   : > { %p1218_p3 = pneg %p1217_p2 }
 0x17b   : > { %p1224_p9 = por %p1223_p8, %p1222_p6 }
 0x17d   : > { %p1225_p10 = pnand %p1224_p9, %p1218_p3 }
 0x17f   : > { %1228 = shalt.err (!%p1225_p10)
}
 0x180   : > { %s1316_s10 = smov 256   ;;  %s1317_s27 = smov 16  }
 0x181   : > { %1078 = dma.vmem_to_hbm [thread:$0]  (%p1410_p7), %s1583_s22, 4096, %s1580_s11, %s1587_s23, %s1316_s10, %s1316_s10, %s1317_s27  }
 0x182 PF: > { %p1084_p11 = scmp.ge.s32.totalorder %s1311_s21, 2  ;;  %s909_s18 = sand.u32 1, %s1275_s12  }
 0x183   : > { %s910_s4 = scalar_lea.sflag [#allocation5], %s909_s18 }
 0x184   : > { %p1081_p13 = pnand %p1084_p11, %p1418_p12 }
 0x186   : > { %1270 = dma.done.wait (!%p1081_p13), %s910_s4, 4096  }
 0x187   : > { %1272 = vsyncadd (!%p1081_p13), %s910_s4, 4294963200  ;;  %s16_s21 = sadd.s32 1, %s1311_s21   ;;  %s1652_s12 = smov %s1279_s13 }
 0x188   : > { %p13_p0 = scmp.ge.s32.totalorder %s16_s21, 6   ;;  %s1653_s13 = smov %s1283_s14 }
 0x189   : > { %s1654_s14 = smov %s1423_s7  ;;  %s1655_s15 = smov %s1291_s16 }
 0x18a   : > { %s1656_s16 = smov %s1426_s8  ;;  %s1657_s17 = smov %s1303_s19 }
 0x18b   : > { %s1658_s18 = smov %s1307_s20  ;;  %s1659_s19 = smov %s1662_s24 }
 0x18c   : > { %s1660_s20 = smov %s1666_s25  ;;  %15 = sbr.rel (!%p13_p0) target bundleno = 6 (0x6), region = 127 }
 0x193   :  { %915 = vsyncpa [#allocation5], 1 }
 0x194   :  { %917 = vsyncpa [#allocation5 + $0x1], 1 }

// kernel: causal_self_attention.4
= control target key start
LH: loop header
LB: loop body
LE: loop exit
PB: predicated region body
PF: predicated region fallthrough
CT: control target
= control target key end

     0   :  { %s3533_s0 = inlined_call_operand.vmem [shape: s32[3], index: 0, kind: input, shape index: {}]   ;;  %s3534_s4 = inlined_call_operand.vmem [shape: bf16[2,128,768], index: 4, kind: input, shape index: {}, may-alias: {4,5,6}]   ;;  %s3535_s5 = inlined_call_operand.vmem [shape: bf16[2,128,768], index: 5, kind: input, shape index: {}, may-alias: {4,5,6}]   ;;  %s3536_s6 = inlined_call_operand.vmem [shape: bf16[2,128,768], index: 6, kind: input, shape index: {}, may-alias: {4,5,6}]   ;;  %s3537_s7 = inlined_call_operand.vmem [shape: f32[128,128], index: 7, kind: input, shape index: {}]   ;;  %s3538_s8 = inlined_call_operand.vmem [shape: f32[128,128], index: 8, kind: input, shape index: {}]   ;;  %s3539_s9 = inlined_call_operand.vmem [shape: bf16[2,128,256], index: 9, kind: output, shape index: {}]   ;;  %s3540_s1 = inlined_call_operand.vmem [shape: s32[3], index: 1, kind: input, shape index: {}, may-alias: {1,2}]   ;;  %s3541_s2 = inlined_call_operand.vmem [shape: s32[3], index: 2, kind: input, shape index: {}, may-alias: {1,2}]   ;;  %s3542_s3 = inlined_call_operand.vmem [shape: s32[3], index: 3, kind: input, shape index: {}]  }
   0x1   :  { %3551 = sst [smem:[#allocation28_spill]] %s3535_s5  ;;  %s14_s11 = sshll.u32 %s3533_s0, 4  ;;  %s15_s11 = int_to_ptr.vmem [resolvable:$true] %s14_s11 }
   0x2   :  { %3552 = sst [smem:[#allocation29_spill]] %s3536_s6  ;;  %s18_s14 = sshll.u32 %s3540_s1, 4  ;;  %s19_s14 = int_to_ptr.vmem [resolvable:$true] %s18_s14 }
   0x3   :  { %3553 = sst [smem:[#allocation30_spill]] %s3537_s7  ;;  %s2593_s15 = scalar_lea.vmem %s15_s11, 16 }
   0x4   :  { %3554 = sst [smem:[#allocation31_spill]] %s3538_s8  ;;  %p2594_p0 = scmp.ne.s32.totalorder %s15_s11, %s2593_s15 }
   0x5   :  { %3555 = sst [smem:[#allocation32_spill]] %s3539_s9  ;;  %p2598_p1 = scmp.lt.s32.totalorder %s15_s11, %s15_s11 }
   0x6   :  { %p2599_p2 = scmp.lt.s32.totalorder %s2593_s15, %s2593_s15 }
   0x8   :  { %p2600_p3 = por %p2599_p2, %p2598_p1 }
   0xa   :  { %p2601_p4 = pnand %p2600_p3, %p2594_p0 }
   0xc   :  { %2604 = shalt.err (!%p2601_p4)  }
   0xd   :  { %s2763_s16 = smov [#allocation7]   ;;  %s2605_s17 = scalar_lea.vmem %s19_s14, 16 }
   0xe   :  { %17 = dma.vmem_to_smem %s15_s11, 16, %s2763_s16, [#allocation6] }
   0xf   :  { %p2606_p5 = scmp.ne.s32.totalorder %s19_s14, %s2605_s17  ;;  %p2610_p6 = scmp.lt.s32.totalorder %s19_s14, %s19_s14 }
  0x10   :  { %p2611_p7 = scmp.lt.s32.totalorder %s2605_s17, %s2605_s17 }
  0x12   :  { %p2612_p8 = por %p2611_p7, %p2610_p6 }
  0x14   :  { %p2613_p9 = pnand %p2612_p8, %p2606_p5 }
  0x16   :  { %2616 = shalt.err (!%p2613_p9)  }
  0x17   :  { %s2764_s0 = smov [#allocation8]   ;;  %s22_s19 = sshll.u32 %s3541_s2, 4  ;;  %s23_s19 = int_to_ptr.vmem [resolvable:$true] %s22_s19 }
  0x18   :  { %21 = dma.vmem_to_smem %s19_s14, 16, %s2764_s0, [#allocation6] }
  0x19   :  { %s26_s22 = sshll.u32 %s3542_s3, 4  ;;  %s2617_s23 = scalar_lea.vmem %s23_s19, 16  ;;  %s27_s22 = int_to_ptr.vmem [resolvable:$true] %s26_s22 }
  0x1a   :  { %p2618_p10 = scmp.ne.s32.totalorder %s23_s19, %s2617_s23  ;;  %p2622_p11 = scmp.lt.s32.totalorder %s23_s19, %s23_s19 }
  0x1b   :  { %p2623_p12 = scmp.lt.s32.totalorder %s2617_s23, %s2617_s23 }
  0x1d   :  { %p2624_p13 = por %p2623_p12, %p2622_p11 }
  0x1f   :  { %p2625_p0 = pnand %p2624_p13, %p2618_p10 }
  0x21   :  { %2628 = shalt.err (!%p2625_p0)  }
  0x22   :  { %s2765_s24 = smov [#allocation9]   ;;  %s2629_s25 = scalar_lea.vmem %s27_s22, 16 }
  0x23   :  { %25 = dma.vmem_to_smem %s23_s19, 16, %s2765_s24, [#allocation6] }
  0x24   :  { %p2630_p1 = scmp.ne.s32.totalorder %s27_s22, %s2629_s25  ;;  %p2634_p2 = scmp.lt.s32.totalorder %s27_s22, %s27_s22 }
  0x25   :  { %p2635_p3 = scmp.lt.s32.totalorder %s2629_s25, %s2629_s25 }
  0x27   :  { %p2636_p4 = por %p2635_p3, %p2634_p2 }
  0x29   :  { %p2637_p5 = pnand %p2636_p4, %p2630_p1 }
  0x2b   :  { %2640 = shalt.err (!%p2637_p5)  }
  0x2c   :  { %s2766_s2 = smov [#allocation10]  }
  0x2d   :  { %29 = dma.vmem_to_smem %s27_s22, 16, %s2766_s2, [#allocation6] }
  0x2e   :  { %2701 = dma.done.wait [#allocation6], 64 }
  0x2f   :  { %2702 = vsyncadd [#allocation6], 4294967232 }
  0x30   :  { %31 = sfence }
  0x31   :  { %s2836_s3 = smov 0   ;;  %s2838_s26 = smov 0  }
  0x32   :  { %s2840_s27 = smov 0   ;;  %s2842_s28 = smov 0  }
  0x33   :  { %s2844_s29 = smov 0   ;;  %s2846_s30 = smov 0  }
  0x34   :  { %s2848_s10 = smov 0   ;;  %s2850_s11 = smov 0  }
  0x35   :  { %s2852_s12 = smov 0   ;;  %s2854_s13 = smov 0  }
  0x36   :  { %s2856_s14 = smov 0   ;;  %s2858_s15 = smov 0  }
  0x37   :  { %s2860_s16 = smov 0   ;;  %s2862_s17 = smov 0  }
  0x38   :  { %s2864_s0 = smov 0  }
  0x39 LB: > { %3556 = sst [smem:[#allocation16_spill]] %s2713_s27  ;;  %s49_s1 = sadd.s32 1, %s2749_s15  ;;  %s2761_s0 = sphi %s2864_s0, %s37_s0   ;;  %s2757_s17 = sphi %s2862_s17, %s3610_s17   ;;  %s2753_s16 = sphi %s2860_s16, %s3609_s16   ;;  %s2749_s15 = sphi %s2858_s15, %s3608_s15   ;;  %s2745_s14 = sphi %s2856_s14, %s3607_s14   ;;  %s2741_s13 = sphi %s2854_s13, %s3606_s13   ;;  %s2737_s12 = sphi %s2852_s12, %s3605_s12   ;;  %s2733_s11 = sphi %s2850_s11, %s3604_s11   ;;  %s2729_s10 = sphi %s2848_s10, %s3603_s10   ;;  %s2725_s30 = sphi %s2846_s30, %s3602_s30   ;;  %s2721_s29 = sphi %s2844_s29, %s3592_s29   ;;  %s2717_s28 = sphi %s2842_s28, %s3601_s28   ;;  %s2713_s27 = sphi %s2840_s27, %s3600_s27   ;;  %s2709_s26 = sphi %s2838_s26, %s3599_s26   ;;  %s2705_s3 = sphi %s2836_s3, %s3598_s3  }
  0x3a   : > { %3557 = sst [smem:[#allocation17_spill]] %s2721_s29  ;;  %p50_p6 = scmp.ge.s32.totalorder %s49_s1, 3 }
  0x3b   : > { %3558 = sst [smem:[#allocation18_spill]] %s2725_s30  ;;  %s52_s18 = sadd.s32 1, %s2753_s16 }
  0x3c   : > { %3559 = sst [smem:[#allocation19_spill]] %s2729_s10  ;;  %s3612_s1 = smov (%p50_p6, %s49_s1), 0 }
  0x3d   : > { %3560 = sst [smem:[#allocation20_spill]] %s2737_s12  ;;  %s3614_s18 = smov (!%p50_p6, %s52_s18), %s2753_s16 }
  0x3e   : > { %3561 = sst [smem:[#allocation21_spill]] %s2741_s13  ;;  %s56_s20 = sadd.s32 1, %s2757_s17 }
  0x3f   : > { %3562 = sst [smem:[#allocation22_spill]] %s2745_s14  ;;  %p54_p7 = scmp.ge.s32.totalorder %s3614_s18, 2 }
  0x40   : > { %s60_s19 = sld [smem:[#allocation7 + %s2749_s15]]  ;;  %p76_p8 = scmp.ne.s32.totalorder %s2733_s11, %s2729_s10 }
  0x41   : > { %3563 = sst [smem:[#allocation23_spill]] %s3612_s1  ;;  %s69_s22 = sadd.s32 1, %s2733_s11 }
  0x42   : > { %s61_s21 = sld [smem:[#allocation7 + %s3612_s1]]  ;;  %p77_p9 = scmp.eq.s32.totalorder %s2761_s0, 0 }
  0x43   : > { %s3616_s18 = smov (%p54_p7, %s3614_s18), 0  ;;  %s3618_s20 = smov (!%p54_p7, %s56_s20), %s2757_s17 }
  0x44   : > { %3564 = sst [smem:[#allocation24_spill]] %s3616_s18  ;;  %p2928_p10 = por %p77_p9, %p76_p8 }
  0x45   : > { %s92_s24 = sld [smem:[#allocation8 + %s2749_s15]]  ;;  %p58_p11 = scmp.ge.s32.totalorder %s3618_s20, 2 }
  0x46   : > { %s93_s2 = sadd.s32 2, %s2753_s16  ;;  %s94_s9 = sld [smem:[#allocation8 + %s3612_s1]] }
  0x47   : > { %s3620_s20 = smov (%p58_p11, %s3618_s20), 0  ;;  %s2939_s13 = ssub.s32 %s2753_s16, %s3616_s18 }
  0x48   : > { %s63_s25 = ssub.s32 %s60_s19, %s61_s21  ;;  %3566 = sst [smem:[#allocation25_spill]] %s3620_s20 }
  0x49   : > { %s95_s14 = sadd.s32 2, %s3616_s18  ;;  %s2944_s8 = ssub.s32 %s2757_s17, %s3620_s20 }
  0x4a   : > { %s99_s7 = ssub.s32 %s93_s2, %s95_s14  ;;  %s64_s19 = sor.u32 %s63_s25, %s2944_s8 }
  0x4b   : > { %p110_p12 = scmp.ne.s32.totalorder %s2725_s30, %s2721_s29  ;;  %s66_s21 = sor.u32 %s2939_s13, %s64_s19 }
  0x4c   : > { %s126_s12 = sld [smem:[#allocation8 + %s2749_s15]]  ;;  %p67_p13 = scmp.eq.s32.totalorder %s66_s21, 0 }
  0x4d   : > { %s97_s10 = ssub.s32 %s92_s24, %s94_s9  ;;  %p2954_p0 = por %p110_p12, %p77_p9 }
  0x4e   : > { %s98_s6 = sor.u32 %s97_s10, %s2944_s8  ;;  %s103_s2 = sadd.s32 1, %s2725_s30 }
  0x4f   : > { %s2959_s14 = scalar_select %p67_p13, %s2733_s11, %s69_s22  }
  0x50   : > { %s100_s25 = sor.u32 %s99_s7, %s98_s6  ;;  %s128_s19 = sld [smem:[#allocation8 + %s3612_s1]] }
  0x51   : > { %3568 = sst [smem:[#allocation26_spill]] %s2959_s14  ;;  %p101_p1 = scmp.eq.s32.totalorder %s100_s25, 0 }
  0x52   : > { %s127_s29 = sadd.s32 4, %s2753_s16  ;;  %s129_s21 = sadd.s32 4, %s3616_s18 }
  0x53   : > { %s2966_s9 = scalar_select %p101_p1, %s2725_s30, %s103_s2  }
  0x54   : > { %s2089_s10 = sadd.s32 4294967295, %s2761_s0   ;;  %p144_p2 = scmp.ne.s32.totalorder %s2717_s28, %s2713_s27 }
  0x55   : > { %3569 = sst [smem:[#allocation27_spill]] %s2966_s9  ;;  %s133_s22 = ssub.s32 %s127_s29, %s129_s21 }
  0x56   : > { %s202_s24 = sld [smem:[#allocation7 + %s2749_s15]]  ;;  %p2975_p3 = por %p144_p2, %p77_p9 }
  0x57   : > { %s203_s5 = sld [smem:[#allocation7 + %s3612_s1]]  ;;  %s131_s7 = ssub.s32 %s126_s12, %s128_s19 }
  0x58   : > { %p221_p4 = scmp.ne.s32.totalorder %s2709_s26, %s2705_s3  ;;  %s132_s25 = sor.u32 %s131_s7, %s2944_s8 }
  0x59   : > { %p222_p5 = scmp.eq.s32.totalorder %s2089_s10, 11  ;;  %s134_s2 = sor.u32 %s133_s22, %s132_s25 }
  0x5a   : > { %s137_s18 = sadd.s32 1, %s2717_s28  ;;  %p135_p6 = scmp.eq.s32.totalorder %s134_s2, 0 }
  0x5b   : > { %p2983_p7 = por %p222_p5, %p221_p4  ;;  %s211_s27 = sadd.s32 1, %s2709_s26 }
  0x5c   : > { %s2988_s1 = scalar_select %p135_p6, %s2717_s28, %s137_s18  }
  0x5d   : > { %s205_s9 = ssub.s32 %s202_s24, %s203_s5  ;;  %p2092_p9 = scmp.ge.s32.totalorder %s2761_s0, 12 }
  0x5e   : > { %s206_s29 = sor.u32 %s205_s9, %s2944_s8 }
  0x5f   : > { %s208_s21 = sor.u32 %s206_s29, %s2939_s13  ;;  %250 = sbr.rel (%p2092_p9) target bundleno = 157 (0x9d), region = 24 }
  0x60   : > { %p209_p8 = scmp.eq.s32.totalorder %s208_s21, 0 }
  0x62   : > { %s2994_s30 = scalar_select %p209_p8, %s2709_s26, %s211_s27  }
  0x66   : > { %253 = sbr.rel (!%p2928_p10) target bundleno = 120 (0x78), region = 28  ;;  %s258_s12 = sld [smem:[#allocation7 + %s2749_s15]] (%p2928_p10) }
  0x67   : > { %s255_s5 = sand.u32 (%p2928_p10), 1, %s2733_s11   ;;  %s2327_s18 = smul.u32 (%p2928_p10), 96, %s2757_s17 }
  0x68   : > { %s2093_s8 = sshll.u32 (%p2928_p10), %s255_s5, 5 }
  0x69   : > { %s257_s23 = scalar_lea.vmem (%p2928_p10), [#allocation11], %s2093_s8 }
  0x6c   : > { %s2326_s19 = smul.u32 (%p2928_p10), 48, %s258_s12 }
  0x6e   : > { %s261_s13 = sadd.s32 %s2753_s16, %s2326_s19 }
  0x6f   : > { %s263_s9 = sadd.s32 %s2327_s18, %s261_s13 }
  0x70   : > { %s2096_s10 = sshll.u32 %s263_s9, 2 }
  0x71   : > { %s265_s22 = scalar_lea.vmem %s3534_s4, %s2096_s10 }
  0x72   : > { %v281_v0 = vld [vmem:[%s265_s22] sm:$0xf]  ;;  %v283_v1 = vld [vmem:[%s265_s22 + $0x18] sm:$0xf]  ;;  %v285_v2 = vld [vmem:[%s265_s22 + $0x30] sm:$0xf] }
  0x73   : > { %282 = vst [vmem:[%s257_s23] sm:$0xf] %v281_v0  ;;  %284 = vst [vmem:[%s257_s23 + $0x4] sm:$0xf] %v283_v1  ;;  %v287_v3 = vld [vmem:[%s265_s22 + $0x48] sm:$0xf] }
  0x74   : > { %286 = vst [vmem:[%s257_s23 + $0x8] sm:$0xf] %v285_v2  ;;  %v289_v4 = vld [vmem:[%s265_s22 + $0x60] sm:$0xf]  ;;  %v291_v5 = vld [vmem:[%s265_s22 + $0x78] sm:$0xf] }
  0x75   : > { %288 = vst [vmem:[%s257_s23 + $0xc] sm:$0xf] %v287_v3  ;;  %290 = vst [vmem:[%s257_s23 + $0x10] sm:$0xf] %v289_v4  ;;  %v293_v6 = vld [vmem:[%s265_s22 + $0x90] sm:$0xf] }
  0x76   : > { %292 = vst [vmem:[%s257_s23 + $0x14] sm:$0xf] %v291_v5  ;;  %v295_v7 = vld [vmem:[%s265_s22 + $0xa8] sm:$0xf]  ;;  %294 = vst [vmem:[%s257_s23 + $0x18] sm:$0xf] %v293_v6 }
  0x77   : > { %296 = vst [vmem:[%s257_s23 + $0x1c] sm:$0xf] %v295_v7 }
  0x78 PF: > { %335 = sbr.rel (!%p2954_p0) target bundleno = 139 (0x8b), region = 69  ;;  %s3572_s7 = sld [smem:[#allocation18_spill]] (%p2954_p0) }
  0x79   : > { %s340_s25 = sld [smem:[#allocation8 + %s2749_s15]] (%p2954_p0)  ;;  %s1977_s29 = smul.u32 (%p2954_p0), 96, %s2757_s17 }
  0x7a   : > { %s3573_s9 = sld [smem:[#allocation28_spill]] (%p2954_p0) }
  0x7e   : > { %s337_s2 = sand.u32 (%p2954_p0), 1, %s3572_s7  }
  0x7f   : > { %s1975_s21 = smul.u32 48, %s340_s25  ;;  %s2097_s12 = sshll.u32 %s337_s2, 5 }
  0x80   : > { %s339_s20 = scalar_lea.vmem [#allocation12], %s2097_s12 }
  0x81   : > { %s1976_s5 = sadd.s32 %s2753_s16, %s1975_s21 }
  0x82   : > { %s1978_s18 = sadd.s32 %s1977_s29, %s1976_s5 }
  0x83   : > { %s2098_s19 = sshll.u32 %s1978_s18, 2 }
  0x84   : > { %s1980_s10 = scalar_lea.vmem %s3573_s9, %s2098_s19 }
  0x85   : > { %v2099_v8 = vld [vmem:[%s1980_s10 + $0x8] sm:$0xf]  ;;  %v2100_v9 = vld [vmem:[%s1980_s10 + $0x20] sm:$0xf]  ;;  %v2101_v10 = vld [vmem:[%s1980_s10 + $0x38] sm:$0xf] }
  0x86   : > { %365 = vst [vmem:[%s339_s20] sm:$0xf] %v2099_v8  ;;  %367 = vst [vmem:[%s339_s20 + $0x4] sm:$0xf] %v2100_v9  ;;  %v2102_v11 = vld [vmem:[%s1980_s10 + $0x50] sm:$0xf] }
  0x87   : > { %369 = vst [vmem:[%s339_s20 + $0x8] sm:$0xf] %v2101_v10  ;;  %v2103_v12 = vld [vmem:[%s1980_s10 + $0x68] sm:$0xf]  ;;  %v2104_v13 = vld [vmem:[%s1980_s10 + $0x80] sm:$0xf] }
  0x88   : > { %371 = vst [vmem:[%s339_s20 + $0xc] sm:$0xf] %v2102_v11  ;;  %373 = vst [vmem:[%s339_s20 + $0x10] sm:$0xf] %v2103_v12  ;;  %v2105_v14 = vld [vmem:[%s1980_s10 + $0x98] sm:$0xf] }
  0x89   : > { %375 = vst [vmem:[%s339_s20 + $0x14] sm:$0xf] %v2104_v13  ;;  %v2106_v15 = vld [vmem:[%s1980_s10 + $0xb0] sm:$0xf]  ;;  %377 = vst [vmem:[%s339_s20 + $0x18] sm:$0xf] %v2105_v14 }
  0x8a   : > { %379 = vst [vmem:[%s339_s20 + $0x1c] sm:$0xf] %v2106_v15 }
  0x8b PF: > { %418 = sbr.rel (!%p2975_p3) target bundleno = 157 (0x9d), region = 110  ;;  %s423_s27 = sld [smem:[#allocation8 + %s2749_s15]] (%p2975_p3) }
  0x8c   : > { %s420_s24 = sand.u32 (%p2975_p3), 1, %s2717_s28   ;;  %s1986_s22 = smul.u32 (%p2975_p3), 96, %s2757_s17 }
  0x8d   : > { %s2107_s7 = sshll.u32 (%p2975_p3), %s420_s24, 5  ;;  %s3574_s5 = sld [smem:[#allocation29_spill]] (%p2975_p3) }
  0x8e   : > { %s422_s6 = scalar_lea.vmem (%p2975_p3), [#allocation13], %s2107_s7 }
  0x91   : > { %s1984_s23 = smul.u32 (%p2975_p3), 48, %s423_s27 }
  0x93   : > { %s1985_s25 = sadd.s32 %s2753_s16, %s1984_s23 }
  0x94   : > { %s1987_s2 = sadd.s32 %s1986_s22, %s1985_s25 }
  0x95   : > { %s2108_s29 = sshll.u32 %s1987_s2, 2 }
  0x96   : > { %s1989_s18 = scalar_lea.vmem %s3574_s5, %s2108_s29 }
  0x97   : > { %v2109_v16 = vld [vmem:[%s1989_s18 + $0x10] sm:$0xf]  ;;  %v2110_v17 = vld [vmem:[%s1989_s18 + $0x28] sm:$0xf]  ;;  %v2111_v18 = vld [vmem:[%s1989_s18 + $0x40] sm:$0xf] }
  0x98   : > { %448 = vst [vmem:[%s422_s6] sm:$0xf] %v2109_v16  ;;  %450 = vst [vmem:[%s422_s6 + $0x4] sm:$0xf] %v2110_v17  ;;  %v2112_v19 = vld [vmem:[%s1989_s18 + $0x58] sm:$0xf] }
  0x99   : > { %452 = vst [vmem:[%s422_s6 + $0x8] sm:$0xf] %v2111_v18  ;;  %v2113_v20 = vld [vmem:[%s1989_s18 + $0x70] sm:$0xf]  ;;  %v2114_v21 = vld [vmem:[%s1989_s18 + $0x88] sm:$0xf] }
  0x9a   : > { %454 = vst [vmem:[%s422_s6 + $0xc] sm:$0xf] %v2112_v19  ;;  %456 = vst [vmem:[%s422_s6 + $0x10] sm:$0xf] %v2113_v20  ;;  %v2115_v22 = vld [vmem:[%s1989_s18 + $0xa0] sm:$0xf] }
  0x9b   : > { %458 = vst [vmem:[%s422_s6 + $0x14] sm:$0xf] %v2114_v21  ;;  %v2116_v23 = vld [vmem:[%s1989_s18 + $0xb8] sm:$0xf]  ;;  %460 = vst [vmem:[%s422_s6 + $0x18] sm:$0xf] %v2115_v22 }
  0x9c   : > { %462 = vst [vmem:[%s422_s6 + $0x1c] sm:$0xf] %v2116_v23 }
  0x9d PF: > { %p2117_p10 = scmp.ge.s32.totalorder %s2761_s0, 1  ;;  %p500_p11 = scmp.lt.s32.totalorder %s2761_s0, 13 }
  0x9f   : > { %p501_p12 = pnand %p2117_p10, %p500_p11 }
  0xa0   : > { %s3575_s19 = sld [smem:[#allocation19_spill]] (!%p501_p12)  ;;  %s3576_s8 = sld [smem:[#allocation17_spill]] (!%p501_p12) }
  0xa1   : > { %504 = sbr.rel (%p501_p12) target bundleno = 2177 (0x881), region = 151  ;;  %s3577_s13 = sld [smem:[#allocation16_spill]] (!%p501_p12) }
  0xa2   : > { %s3578_s9 = sld [smem:[#allocation20_spill]] (!%p501_p12)  ;;  %s552_s23 = sand.u32 (!%p501_p12), 1, %s2705_s3  }
  0xa3   : > { %s2121_s25 = sshll.u32 (!%p501_p12), %s552_s23, 5 }
  0xa6   : > { %s507_s10 = sand.u32 (!%p501_p12), 1, %s3575_s19   ;;  %s514_s20 = sand.u32 (!%p501_p12), 1, %s3576_s8  }
  0xa7   : > { %s2118_s27 = sshll.u32 (!%p501_p12), %s507_s10, 5  ;;  %s2119_s24 = sshll.u32 (!%p501_p12), %s514_s20, 5 }
  0xa8   : > { %s521_s22 = sand.u32 1, %s3577_s13   ;;  %s3031_s2 = sld [smem:[#allocation7 + %s3578_s9]] }
  0xa9   : > { %s2120_s7 = sshll.u32 %s521_s22, 5  ;;  %s3034_s29 = sld [smem:[#allocation8 + %s3578_s9]] }
  0xaa   : > { %s3037_s21 = sld [smem:[#allocation9 + %s3578_s9]]  ;;  %s509_s5 = scalar_lea.vmem [#allocation11], %s2118_s27 }
  0xab   : > { %s3040_s12 = sld [smem:[#allocation10 + %s3578_s9]]  ;;  %s3042_s18 = scalar_lea.vmem [#allocation12], %s2119_s24 }
  0xac   : > { %s3044_s6 = scalar_lea.vmem [#allocation13], %s2120_s7  ;;  %s3046_s19 = scalar_lea.vmem [#allocation14], %s2121_s25 }
  0xaf   : > { %p2122_p13 = scmp.ne.s32.totalorder %s3034_s29, 0 }
  0xb0   : > { %v2222_v24 = vld [vmem:[%s509_s5 + $0x10] sm:$0xff] (!%p2122_p13)   ;;  %v2170_v25 = vld [vmem:[%s509_s5] sm:$0xff] (!%p2122_p13)   ;;  %v3049_v26 = vld [vmem:[%s509_s5 + $0x18] sm:$0xff] (!%p2122_p13)   ;;  %s2767_s3 = smov (!%p2122_p13), 64   ;;  %vm665_vm0 = vcmask (!%p2122_p13), 7168   ;;  %v2768_v40 = vmov (!%p2122_p13), -inf  }
  0xb1   : > { %573 = sbr.rel (%p2122_p13) target bundleno = 313 (0x139), region = 167  ;;  %v2179_v27 = vunpack.c.l.bf16 (!%p2122_p13), %v2222_v24  ;;  %v2180_v28 = vunpack.c.h.bf16 (!%p2122_p13), %v2222_v24  ;;  %v2171_v29 = vunpack.c.l.bf16 (!%p2122_p13), %v2170_v25  ;;  %v2172_v30 = vunpack.c.h.bf16 (!%p2122_p13), %v2170_v25  ;;  %v3051_v31 = vld [vmem:[%s509_s5 + $0x8] sm:$0xff] (!%p2122_p13)   ;;  %666 = vst.msk [vmem:[#allocation3] sm:$0xff] (!%p2122_p13), %vm665_vm0, %v2768_v40  ;;  %667 = vst.msk [vmem:[#allocation3 + $0x8] sm:$0xff] (!%p2122_p13), %vm665_vm0, %v2768_v40  ;;  %s2123_s8 = sshll.u32 (!%p2122_p13), %s3031_s2, 6 }
  0xb2   : > { %v2183_v32 = vunpack.c.l.bf16 (!%p2122_p13), %v3049_v26  ;;  %v2184_v33 = vunpack.c.h.bf16 (!%p2122_p13), %v3049_v26  ;;  %v2175_v34 = vunpack.c.l.bf16 (!%p2122_p13), %v3051_v31  ;;  %v2176_v35 = vunpack.c.h.bf16 (!%p2122_p13), %v3051_v31  ;;  %668 = vst.msk [vmem:[#allocation3 + $0x10] sm:$0xff] (!%p2122_p13), %vm665_vm0, %v2768_v40  ;;  %669 = vst.msk [vmem:[#allocation3 + $0x18] sm:$0xff] (!%p2122_p13), %vm665_vm0, %v2768_v40  ;;  %s3579_s10 = sld [smem:[#allocation30_spill]] (!%p2122_p13)  ;;  %s3580_s22 = sld [smem:[#allocation31_spill]] (!%p2122_p13) }
  0xb3   : > { %v2469_v36 = vpack.i.bf16 (!%p2122_p13), %v2180_v28, %v2179_v27  ;;  %v2459_v37 = vpack.i.bf16 (!%p2122_p13), %v2172_v30, %v2171_v29  ;;  %670 = vst.msk [vmem:[#allocation3 + $0x20] sm:$0xff] (!%p2122_p13), %vm665_vm0, %v2768_v40  ;;  %671 = vst.msk [vmem:[#allocation3 + $0x28] sm:$0xff] (!%p2122_p13), %vm665_vm0, %v2768_v40  ;;  %v2769_v41 = vmov (!%p2122_p13), 0.0  }
  0xb4   : > { %v2474_v38 = vpack.i.bf16 (!%p2122_p13), %v2184_v33, %v2183_v32  ;;  %v2464_v39 = vpack.i.bf16 (!%p2122_p13), %v2176_v35, %v2175_v34  ;;  %672 = vst.msk [vmem:[#allocation3 + $0x30] sm:$0xff] (!%p2122_p13), %vm665_vm0, %v2768_v40  ;;  %673 = vst.msk [vmem:[#allocation3 + $0x38] sm:$0xff] (!%p2122_p13), %vm665_vm0, %v2768_v40 }
  0xb5   : > { %2470 = vrot.lane.b32.xlu1 (!%p2122_p13), %v2469_v36, %s2767_s3  ;;  %2460 = vrot.lane.b32.xlu0 (!%p2122_p13), %v2459_v37, %s2767_s3  ;;  %674 = vst.msk [vmem:[#allocation4] sm:$0xff] (!%p2122_p13), %vm665_vm0, %v2769_v41  ;;  %675 = vst.msk [vmem:[#allocation4 + $0x8] sm:$0xff] (!%p2122_p13), %vm665_vm0, %v2769_v41 }
  0xb6   : > { %676 = vst.msk [vmem:[#allocation4 + $0x10] sm:$0xff] (!%p2122_p13), %vm665_vm0, %v2769_v41  ;;  %677 = vst.msk [vmem:[#allocation4 + $0x18] sm:$0xff] (!%p2122_p13), %vm665_vm0, %v2769_v41 }
  0xb7   : > { %678 = vst.msk [vmem:[#allocation4 + $0x20] sm:$0xff] (!%p2122_p13), %vm665_vm0, %v2769_v41  ;;  %679 = vst.msk [vmem:[#allocation4 + $0x28] sm:$0xff] (!%p2122_p13), %vm665_vm0, %v2769_v41 }
  0xb8   : > { %680 = vst.msk [vmem:[#allocation4 + $0x30] sm:$0xff] %vm665_vm0, %v2769_v41  ;;  %681 = vst.msk [vmem:[#allocation4 + $0x38] sm:$0xff] %vm665_vm0, %v2769_v41  ;;  %s3085_s20 = scalar_lea.vmem %s3579_s10, %s2123_s8  ;;  %s3091_s23 = scalar_lea.vmem %s3580_s22, %s2123_s8 }
  0xb9   : > { %2475 = vrot.lane.b32.xlu1 %v2474_v38, %s2767_s3  ;;  %2465 = vrot.lane.b32.xlu0 %v2464_v39, %s2767_s3  ;;  %682 = vst [vmem:[#allocation5] sm:$0xff] %v2769_v41  ;;  %683 = vst [vmem:[#allocation5 + $0x8] sm:$0xff] %v2769_v41  ;;  %v580_v42 = vld [vmem:[%s3085_s20 + $0x20] sm:$0xff]  ;;  %v581_v43 = vld [vmem:[%s3085_s20 + $0x28] sm:$0xff] }
  0xba   : > { %684 = vst [vmem:[#allocation5 + $0x10] sm:$0xff] %v2769_v41  ;;  %685 = vst [vmem:[#allocation5 + $0x18] sm:$0xff] %v2769_v41  ;;  %v576_v44 = vld [vmem:[%s3085_s20] sm:$0xff]  ;;  %v577_v45 = vld [vmem:[%s3085_s20 + $0x8] sm:$0xff]  ;;  %v613_v47 = vmul.f32 %v2179_v27, %v580_v42  ;;  %v614_v48 = vmul.f32 %v2180_v28, %v581_v43 }
  0xbb   : > { %686 = vst [vmem:[#allocation5 + $0x20] sm:$0xff] %v2769_v41  ;;  %687 = vst [vmem:[#allocation5 + $0x28] sm:$0xff] %v2769_v41  ;;  %v589_v46 = vld [vmem:[%s3091_s23 + $0x20] sm:$0xff]  ;;  %v609_v49 = vmul.f32 %v2171_v29, %v576_v44  ;;  %v610_v50 = vmul.f32 %v2172_v30, %v577_v45  ;;  %v590_v52 = vld [vmem:[%s3091_s23 + $0x28] sm:$0xff] }
  0xbc   : > { %688 = vst [vmem:[#allocation5 + $0x30] sm:$0xff] %v2769_v41  ;;  %689 = vst [vmem:[#allocation5 + $0x38] sm:$0xff] %v2769_v41  ;;  %v585_v54 = vld [vmem:[%s3091_s23] sm:$0xff]  ;;  %v586_v55 = vld [vmem:[%s3091_s23 + $0x8] sm:$0xff] }
  0xbd   : > { %v582_v60 = vld [vmem:[%s3085_s20 + $0x30] sm:$0xff]  ;;  %v583_v61 = vld [vmem:[%s3085_s20 + $0x38] sm:$0xff] }
  0xbe   : > { %v578_v62 = vld [vmem:[%s3085_s20 + $0x10] sm:$0xff]  ;;  %v615_v4 = vmul.f32 %v2183_v32, %v582_v60  ;;  %v616_v5 = vmul.f32 %v2184_v33, %v583_v61  ;;  %v579_v7 = vld [vmem:[%s3085_s20 + $0x18] sm:$0xff] }
  0xbf   : > { %v611_v8 = vmul.f32 %v2175_v34, %v578_v62  ;;  %v591_v13 = vld [vmem:[%s3091_s23 + $0x30] sm:$0xff]  ;;  %v592_v14 = vld [vmem:[%s3091_s23 + $0x38] sm:$0xff]  ;;  %v612_v24 = vmul.f32 %v2176_v35, %v579_v7 }
  0xc0   : > { %v587_v15 = vld [vmem:[%s3091_s23 + $0x10] sm:$0xff]  ;;  %v588_v20 = vld [vmem:[%s3091_s23 + $0x18] sm:$0xff] }
 0x127   : > { %v2471_v51 = vpop.permute.xlu1 %2470  ;;  %v2461_v53 = vpop.permute.xlu0 %2460 }
 0x128   : > { %v2473_v56 = vunpack.i.h.bf16 %v2471_v51  ;;  %v2472_v57 = vunpack.i.l.bf16 %v2471_v51  ;;  %v2463_v58 = vunpack.i.h.bf16 %v2461_v53  ;;  %v2462_v59 = vunpack.i.l.bf16 %v2461_v53 }
 0x12a   : > { %v637_v63 = vmul.f32 %v2472_v57, %v589_v46  ;;  %v638_v0 = vmul.f32 %v2473_v56, %v590_v52  ;;  %v633_v1 = vmul.f32 %v2462_v59, %v585_v54  ;;  %v634_v2 = vmul.f32 %v2463_v58, %v586_v55 }
 0x12b   : > { %v2476_v3 = vpop.permute.xlu1 %2475  ;;  %v2466_v6 = vpop.permute.xlu0 %2465 }
 0x12c   : > { %v645_v9 = vadd.f32 %v637_v63, %v613_v47  ;;  %v646_v10 = vadd.f32 %v638_v0, %v614_v48  ;;  %v641_v11 = vadd.f32 %v633_v1, %v609_v49  ;;  %v642_v12 = vadd.f32 %v634_v2, %v610_v50 }
 0x12d   : > { %v2478_v16 = vunpack.i.h.bf16 %v2476_v3  ;;  %v2477_v17 = vunpack.i.l.bf16 %v2476_v3  ;;  %v2468_v18 = vunpack.i.h.bf16 %v2466_v6  ;;  %v2467_v19 = vunpack.i.l.bf16 %v2466_v6 }
 0x12e   : > { %v653_v21 = vmul.f32 0.088388346, %v645_v9  ;;  %v654_v22 = vmul.f32 0.088388346, %v646_v10  ;;  %v649_v23 = vmul.f32 0.088388346, %v641_v11 }
 0x12f   : > { %v650_v25 = vmul.f32 0.088388346, %v642_v12  ;;  %v639_v26 = vmul.f32 %v2477_v17, %v591_v13  ;;  %v640_v27 = vmul.f32 %v2478_v16, %v592_v14  ;;  %v635_v28 = vmul.f32 %v2467_v19, %v587_v15 }
 0x130   : > { %v659_v29 = vpack.c.bf16 %v654_v22, %v653_v21  ;;  %v636_v30 = vmul.f32 %v2468_v18, %v588_v20 }
 0x131   : > { %v657_v32 = vpack.c.bf16 %v650_v25, %v649_v23  ;;  %v647_v33 = vadd.f32 %v639_v26, %v615_v4  ;;  %v648_v34 = vadd.f32 %v640_v27, %v616_v5  ;;  %v643_v36 = vadd.f32 %v635_v28, %v611_v8 }
 0x132   : > { %663 = vst [vmem:[#allocation2 + $0x10] sm:$0xff] %v659_v29  ;;  %v644_v37 = vadd.f32 %v636_v30, %v612_v24 }
 0x133   : > { %661 = vst [vmem:[#allocation2] sm:$0xff] %v657_v32  ;;  %v655_v38 = vmul.f32 0.088388346, %v647_v33  ;;  %v656_v39 = vmul.f32 0.088388346, %v648_v34 }
 0x134   : > { %v651_v40 = vmul.f32 0.088388346, %v643_v36  ;;  %v652_v41 = vmul.f32 0.088388346, %v644_v37 }
 0x135   : > { %v660_v42 = vpack.c.bf16 %v656_v39, %v655_v38 }
 0x136   : > { %v658_v31 = vpack.c.bf16 %v652_v41, %v651_v40 }
 0x137   : > { %664 = vst [vmem:[#allocation2 + $0x18] sm:$0xff] %v660_v42 }
 0x138   : > { %662 = vst [vmem:[#allocation2 + $0x8] sm:$0xff] %v658_v31 }
 0x139 PF: > { %v2225_v35 = vld [vmem:[%s3042_s18 + $0x10] sm:$0xff]   ;;  %v2186_v43 = vld [vmem:[%s3042_s18] sm:$0xff]   ;;  %v2226_v44 = vld [vmem:[%s3042_s18 + $0x18] sm:$0xff]   ;;  %s2770_s7 = smov 64   ;;  %s3121_s25 = sshll.u32 %s3034_s29, 6 }
 0x13a   : > { %v2195_v45 = vunpack.c.l.bf16 %v2225_v35  ;;  %v2196_v46 = vunpack.c.h.bf16 %v2225_v35  ;;  %v2187_v47 = vunpack.c.l.bf16 %v2186_v43  ;;  %v2188_v48 = vunpack.c.h.bf16 %v2186_v43  ;;  %v2224_v49 = vld [vmem:[%s3042_s18 + $0x8] sm:$0xff]   ;;  %s3581_s8 = sld [smem:[#allocation30_spill]]  ;;  %s3582_s10 = sld [smem:[#allocation31_spill]] }
 0x13b   : > { %v2199_v50 = vunpack.c.l.bf16 %v2226_v44  ;;  %v2200_v51 = vunpack.c.h.bf16 %v2226_v44  ;;  %v2191_v52 = vunpack.c.l.bf16 %v2224_v49  ;;  %v2192_v53 = vunpack.c.h.bf16 %v2224_v49  ;;  %p2125_p0 = scmp.ne.s32.totalorder %s3037_s21, 0 }
 0x13c   : > { %v2489_v54 = vpack.i.bf16 %v2196_v46, %v2195_v45  ;;  %v2479_v55 = vpack.i.bf16 %v2188_v48, %v2187_v47  ;;  %vm850_vm1 = vcmask (!%p2125_p0), 523264   ;;  %vm1019_vm2 = vcmask (!%p2125_p0), 7168  }
 0x13d   : > { %v2494_v56 = vpack.i.bf16 %v2200_v51, %v2199_v50  ;;  %v2484_v57 = vpack.i.bf16 %v2192_v53, %v2191_v52 }
 0x13e   : > { %2490 = vrot.lane.b32.xlu1 %v2489_v54, %s2770_s7  ;;  %2480 = vrot.lane.b32.xlu0 %v2479_v55, %s2770_s7 }
 0x140   : > { %s691_s18 = scalar_lea.vmem %s3581_s8, %s3121_s25  ;;  %s3131_s20 = scalar_lea.vmem %s3582_s10, %s3121_s25 }
 0x141   : > { %v696_v58 = vld [vmem:[%s691_s18 + $0x20] sm:$0xff]  ;;  %v697_v59 = vld [vmem:[%s691_s18 + $0x28] sm:$0xff]  ;;  %v698_v8 = vld [vmem:[%s691_s18 + $0x30] sm:$0xff] }
 0x142   : > { %2495 = vrot.lane.b32.xlu1 %v2494_v56, %s2770_s7  ;;  %2485 = vrot.lane.b32.xlu0 %v2484_v57, %s2770_s7  ;;  %v692_v60 = vld [vmem:[%s691_s18] sm:$0xff]  ;;  %v693_v61 = vld [vmem:[%s691_s18 + $0x8] sm:$0xff]  ;;  %v729_v0 = vmul.f32 %v2195_v45, %v696_v58  ;;  %v730_v1 = vmul.f32 %v2196_v46, %v697_v59  ;;  %v731_v22 = vmul.f32 %v2199_v50, %v698_v8 }
 0x143   : > { %v705_v62 = vld [vmem:[%s3131_s20 + $0x20] sm:$0xff]  ;;  %v706_v63 = vld [vmem:[%s3131_s20 + $0x28] sm:$0xff]  ;;  %v725_v2 = vmul.f32 %v2187_v47, %v692_v60  ;;  %v726_v3 = vmul.f32 %v2188_v48, %v693_v61  ;;  %v699_v13 = vld [vmem:[%s691_s18 + $0x38] sm:$0xff] }
 0x144   : > { %v701_v6 = vld [vmem:[%s3131_s20] sm:$0xff]  ;;  %v702_v7 = vld [vmem:[%s3131_s20 + $0x8] sm:$0xff]  ;;  %v694_v14 = vld [vmem:[%s691_s18 + $0x10] sm:$0xff]  ;;  %v732_v23 = vmul.f32 %v2200_v51, %v699_v13 }
 0x145   : > { %v695_v15 = vld [vmem:[%s691_s18 + $0x18] sm:$0xff]  ;;  %v707_v21 = vld [vmem:[%s3131_s20 + $0x30] sm:$0xff]  ;;  %v727_v25 = vmul.f32 %v2191_v52, %v694_v14  ;;  %v773_v50 = vld [vmem:[#allocation2] sm:$0xff] (!%p2125_p0) }
 0x146   : > { %v728_v26 = vmul.f32 %v2192_v53, %v695_v15  ;;  %v708_v32 = vld [vmem:[%s3131_s20 + $0x38] sm:$0xff]  ;;  %v703_v33 = vld [vmem:[%s3131_s20 + $0x10] sm:$0xff]  ;;  %2270 = vmatprep.mubr.bf16.mxu0 (!%p2125_p0), %v773_v50  ;;  %v774_v51 = vld [vmem:[#allocation2 + $0x8] sm:$0xff] (!%p2125_p0) }
 0x147   : > { %v704_v34 = vld [vmem:[%s3131_s20 + $0x18] sm:$0xff]  ;;  %v775_v52 = vld [vmem:[#allocation2 + $0x10] sm:$0xff] (!%p2125_p0)  ;;  %v842_v8 = vld [vmem:[#allocation3] sm:$0xff] (!%p2125_p0) }
 0x148   : > { %v776_v53 = vld [vmem:[#allocation2 + $0x18] sm:$0xff] (!%p2125_p0)  ;;  %v843_v14 = vld [vmem:[#allocation3 + $0x8] sm:$0xff] (!%p2125_p0) }
 0x149   : > { %v845_v13 = vld [vmem:[#allocation3 + $0x18] sm:$0xff] (!%p2125_p0) }
 0x1b0   : > { %v2491_v4 = vpop.permute.xlu1 %2490  ;;  %v2481_v5 = vpop.permute.xlu0 %2480 }
 0x1b1   : > { %v2493_v9 = vunpack.i.h.bf16 %v2491_v4  ;;  %v2492_v10 = vunpack.i.l.bf16 %v2491_v4  ;;  %v2483_v11 = vunpack.i.h.bf16 %v2481_v5  ;;  %v2482_v12 = vunpack.i.l.bf16 %v2481_v5 }
 0x1b3   : > { %v753_v16 = vmul.f32 %v2492_v10, %v705_v62  ;;  %v754_v17 = vmul.f32 %v2493_v9, %v706_v63  ;;  %v749_v18 = vmul.f32 %v2482_v12, %v701_v6  ;;  %v750_v19 = vmul.f32 %v2483_v11, %v702_v7  ;;  %v844_v7 = vld [vmem:[#allocation3 + $0x10] sm:$0xff] (!%p2125_p0) }
 0x1b4   : > { %v2496_v20 = vpop.permute.xlu1 %2495  ;;  %v2486_v24 = vpop.permute.xlu0 %2485  ;;  %v2771_v6 = vmov (!%p2125_p0), 0  }
 0x1b5   : > { %v761_v27 = vadd.f32 %v753_v16, %v729_v0  ;;  %v762_v28 = vadd.f32 %v754_v17, %v730_v1  ;;  %v757_v29 = vadd.f32 %v749_v18, %v725_v2  ;;  %v758_v30 = vadd.f32 %v750_v19, %v726_v3  ;;  %2499 = vset.pattern.permute.xlu0 (!%p2125_p0), %v2771_v6 }
 0x1b6   : > { %v2498_v36 = vunpack.i.h.bf16 %v2496_v20  ;;  %v2497_v37 = vunpack.i.l.bf16 %v2496_v20  ;;  %v2488_v38 = vunpack.i.h.bf16 %v2486_v24  ;;  %v2487_v39 = vunpack.i.l.bf16 %v2486_v24  ;;  %772 = sbr.rel (%p2125_p0) target bundleno = 1218 (0x4c2), region = 171  ;;  %2500 = vset.pattern.permute.xlu1 (!%p2125_p0), %v2771_v6 }
 0x1b7   : > { %v3141_v40 = vpack.c.bf16 %v762_v28, %v761_v27  ;;  %v3143_v41 = vpack.c.bf16 %v758_v30, %v757_v29  ;;  %v3194_v28 = vld [vmem:[#allocation3 + $0x30] sm:$0xff] (!%p2125_p0)  ;;  %v2501_v29 = vld [vmem:[%s3044_s6] sm:$0xff] (!%p2125_p0)  }
 0x1b8   : > { %v755_v42 = vmul.f32 %v2497_v37, %v707_v21  ;;  %v756_v31 = vmul.f32 %v2498_v36, %v708_v32  ;;  %v751_v35 = vmul.f32 %v2487_v39, %v703_v33  ;;  %v752_v43 = vmul.f32 %v2488_v38, %v704_v34  ;;  %v3198_v34 = vld [vmem:[#allocation3 + $0x38] sm:$0xff] (!%p2125_p0)  ;;  %2278 = vmatprep.subr.bf16.mxu1 (!%p2125_p0), %v2501_v29  ;;  %v2502_v39 = vld [vmem:[%s3044_s6 + $0x8] sm:$0xff] (!%p2125_p0)  }
 0x1b9   : > { %2262 = vmatprep.subr.bf16.mxu0 (!%p2125_p0), %v3143_v41  ;;  %2279 = vmatpush3.bf16.msra.mxu1 (!%p2125_p0), %v2501_v29 }
 0x1ba   : > { %v763_v44 = vadd.f32 %v755_v42, %v731_v22  ;;  %v764_v45 = vadd.f32 %v756_v31, %v732_v23  ;;  %v759_v46 = vadd.f32 %v751_v35, %v727_v25  ;;  %v760_v47 = vadd.f32 %v752_v43, %v728_v26  ;;  %2263 = vmatpush3.bf16.xpose.msra.mxu0 (!%p2125_p0), %v3143_v41  ;;  %v846_v22 = vld [vmem:[#allocation3 + $0x20] sm:$0xff] (!%p2125_p0)  ;;  %v847_v25 = vld [vmem:[#allocation3 + $0x28] sm:$0xff] (!%p2125_p0) }
 0x1bb   : > { %2280 = vmatprep.subr.bf16.mxu1 (!%p2125_p0), %v2502_v39 }
 0x1bc   : > { %v3145_v48 = vpack.c.bf16 %v764_v45, %v763_v44  ;;  %v3147_v49 = vpack.c.bf16 %v760_v47, %v759_v46  ;;  %v2503_v47 = vld [vmem:[%s3044_s6 + $0x10] sm:$0xff] (!%p2125_p0)  }
 0x1bd   : > { %2281 = vmatpush3.bf16.msra.mxu1 %v2502_v39 }
 0x1be   : > { %2264 = vmatprep.subr.bf16.mxu0 %v3147_v49  ;;  %2282 = vmatprep.subr.bf16.mxu1 %v2503_v47 }
 0x1c1   : > { %2283 = vmatpush3.bf16.msra.mxu1 %v2503_v47 }
 0x1c2   : > { %2265 = vmatpush3.bf16.xpose.msra.mxu0 %v3147_v49 }
 0x1c3   : > { %2266 = vmatprep.subr.bf16.mxu0 %v3141_v40 }
 0x1ca   : > { %2267 = vmatpush3.bf16.xpose.msra.mxu0 %v3141_v40 }
 0x1cb   : > { %2268 = vmatprep.subr.bf16.mxu0 %v3145_v48 }
 0x1d2   : > { %2269 = vmatpush3.bf16.xpose.msra.mxu0 %v3145_v48 }
 0x1d9   : > { %2271 = vmatmul.mubr.bf16.vlgmr.msra.gmra.mrb[0].mxu0 %v774_v51 }
 0x1da   : > { %2274 = vmatprep.mubr.bf16.mxu0 %v775_v52 }
 0x1e1   : > { %2275 = vmatmul.mubr.bf16.gmra.mrb[4].mxu0 %v776_v53  ;;  %v2504_v53 = vld [vmem:[%s3044_s6 + $0x18] sm:$0xff]  }
 0x1e2   : > { %2284 = vmatprep.subr.bf16.mxu1 %v2504_v53 }
 0x1e3   : > { %2285 = vmatpush3.bf16.msra.mxu1 %v2504_v53 }
 0x2ac   : > { %v3158_v54 = vpop.f32.mrb[0].mxu0 }
 0x2ad   : > { %v3160_v55 = vpop.f32.mrb[1].mxu0  ;;  %v857_v56 = vsel %vm850_vm1, %v3158_v54, -inf }
 0x2ae   : > { %858 = vmax.xlane.f32.xlu1 %v857_v56  ;;  %v3164_v57 = vpop.f32.mrb[2].mxu0  ;;  %v851_v58 = vsel %vm850_vm1, %v3160_v55, -inf }
 0x2af   : > { %852 = vmax.xlane.f32.xlu0 %v851_v58  ;;  %v3168_v59 = vpop.f32.mrb[3].mxu0  ;;  %v860_v60 = vsel %vm850_vm1, %v3164_v57, -inf }
 0x2b0   : > { %v854_v61 = vsel %vm850_vm1, %v3168_v59, -inf }
 0x2b2   : > { %861 = vmax.xlane.f32.xlu1 %v860_v60 }
 0x2b3   : > { %855 = vmax.xlane.f32.xlu0 %v854_v61 }
 0x2b4   : > { %v3174_v62 = vpop.f32.mrb[4].mxu0 }
 0x2b5   : > { %v3176_v63 = vpop.f32.mrb[5].mxu0  ;;  %v869_v4 = vsel %vm850_vm1, %v3174_v62, -inf }
 0x2b6   : > { %v3178_v0 = vpop.f32.mrb[6].mxu0  ;;  %v863_v1 = vsel %vm850_vm1, %v3176_v63, -inf }
 0x2b7   : > { %864 = vmax.xlane.f32.xlu0 %v863_v1  ;;  %v3182_v2 = vpop.f32.mrb[7].mxu0  ;;  %v872_v5 = vsel %vm850_vm1, %v3178_v0, -inf }
 0x2b8   : > { %v866_v3 = vsel %vm850_vm1, %v3182_v2, -inf }
 0x2b9   : > { %867 = vmax.xlane.f32.xlu1 %v866_v3 }
 0x2bb   : > { %870 = vmax.xlane.f32.xlu0 %v869_v4 }
 0x2bd   : > { %873 = vmax.xlane.f32.xlu1 %v872_v5 }
 0x33b   : > { %v859_v9 = vpop.xlane.xlu1 %858 }
 0x33c   : > { %v877_v10 = vmax.f32 %v844_v7, %v859_v9  ;;  %v853_v11 = vpop.xlane.xlu0 %852 }
 0x33d   : > { %v875_v12 = vmax.f32 %v842_v8, %v853_v11 }
 0x33e   : > { %1215 = vst.msk [vmem:[#allocation3 + $0x10] sm:$0xff] %vm1019_vm2, %v877_v10  ;;  %919 = vperm.xlu1 %2500, %v877_v10   ;;  %v885_v32 = vsub.f32 %v844_v7, %v877_v10 }
 0x33f   : > { %v883_v15 = vsub.f32 %v842_v8, %v875_v12  ;;  %1213 = vst.msk [vmem:[#allocation3] sm:$0xff] %vm1019_vm2, %v875_v12  ;;  %v862_v16 = vpop.xlane.xlu1 %861  ;;  %909 = vperm.xlu0 %2499, %v875_v12  }
 0x340   : > { %v878_v17 = vmax.f32 %v845_v13, %v862_v16  ;;  %v856_v18 = vpop.xlane.xlu0 %855  ;;  %v895_v43 = vmul.f32 1.442695, %v885_v32 }
 0x341   : > { %v891_v19 = vmul.f32 1.442695, %v883_v15  ;;  %v876_v20 = vmax.f32 %v843_v14, %v856_v18 }
 0x342   : > { %v886_v21 = vsub.f32 %v845_v13, %v878_v17  ;;  %1216 = vst.msk [vmem:[#allocation3 + $0x18] sm:$0xff] %vm1019_vm2, %v878_v17  ;;  %924 = vperm.xlu1 %2500, %v878_v17  }
 0x343   : > { %2505 = vpow2.f32 %v891_v19  ;;  %1214 = vst.msk [vmem:[#allocation3 + $0x8] sm:$0xff] %vm1019_vm2, %v876_v20  ;;  %v884_v44 = vsub.f32 %v843_v14, %v876_v20 }
 0x344   : > { %v897_v23 = vmul.f32 1.442695, %v886_v21  ;;  %v865_v24 = vpop.xlane.xlu0 %864 }
 0x345   : > { %v879_v26 = vmax.f32 %v846_v22, %v865_v24  ;;  %v893_v51 = vmul.f32 1.442695, %v884_v44 }
 0x346   : > { %2507 = vpow2.f32 %v897_v23  ;;  %914 = vperm.xlu1 %2500, %v876_v20   ;;  %v868_v27 = vpop.xlane.xlu1 %867 }
 0x347   : > { %1217 = vst.msk [vmem:[#allocation3 + $0x20] sm:$0xff] %vm1019_vm2, %v879_v26  ;;  %v880_v30 = vmax.f32 %v847_v25, %v868_v27  ;;  %v887_v52 = vsub.f32 %v846_v22, %v879_v26 }
 0x348   : > { %v871_v33 = vpop.xlane.xlu0 %870 }
 0x349   : > { %v888_v36 = vsub.f32 %v847_v25, %v880_v30  ;;  %1218 = vst.msk [vmem:[#allocation3 + $0x28] sm:$0xff] %vm1019_vm2, %v880_v30  ;;  %v3202_v37 = vmax.f32 %v3194_v28, %v871_v33  ;;  %v899_v56 = vmul.f32 1.442695, %v887_v52 }
 0x34a   : > { %v874_v38 = vpop.xlane.xlu1 %873 }
 0x34b   : > { %v901_v42 = vmul.f32 1.442695, %v888_v36  ;;  %v889_v31 = vsub.f32 %v3194_v28, %v3202_v37  ;;  %1219 = vst.msk [vmem:[#allocation3 + $0x30] sm:$0xff] %vm1019_vm2, %v3202_v37  ;;  %v3210_v35 = vmax.f32 %v3198_v34, %v874_v38  ;;  %939 = vperm.xlu1 %2500, %v3202_v37  }
 0x34d   : > { %v3213_v45 = vpop.eup %2505  ;;  %2509 = vpow2.f32 %v901_v42  ;;  %v890_v46 = vsub.f32 %v3198_v34, %v3210_v35  ;;  %1220 = vst.msk [vmem:[#allocation3 + $0x38] sm:$0xff] %vm1019_vm2, %v3210_v35  ;;  %v903_v52 = vmul.f32 1.442695, %v889_v31 }
 0x34e   : > { %1038 = vperm.xlu0 %2499, %v3213_v45   ;;  %2511 = vpow2.f32 %v895_v43 }
 0x34f   : > { %929 = vperm.xlu1 %2500, %v879_v26   ;;  %2513 = vpow2.f32 %v893_v51 }
 0x350   : > { %v3221_v50 = vpop.eup %2507  ;;  %2515 = vpow2.f32 %v899_v56 }
 0x352   : > { %1053 = vperm.xlu0 %2499, %v3221_v50  }
 0x353   : > { %934 = vperm.xlu1 %2500, %v880_v30  }
 0x357   : > { %v3225_v58 = vpop.eup %2509  ;;  %944 = vperm.xlu1 %2500, %v3210_v35  }
 0x358   : > { %1063 = vperm.xlu0 %2499, %v3225_v58   ;;  %v3229_v60 = vpop.eup %2511 }
 0x359   : > { %v3232_v61 = vpop.eup %2513 }
 0x35a   : > { %v3235_v1 = vpop.eup %2515 }
 0x35b   : > { %1048 = vperm.xlu1 %2500, %v3229_v60  }
 0x35f   : > { %1043 = vperm.xlu1 %2500, %v3232_v61  }
 0x363   : > { %1058 = vperm.xlu1 %2500, %v3235_v1  }
 0x3bd   : > { %v920_v3 = vpop.permute.xlu1 %919 }
 0x3be   : > { %v949_v4 = vsub.f32 %v3158_v54, %v920_v3  ;;  %v910_v5 = vpop.permute.xlu0 %909 }
 0x3bf   : > { %v947_v6 = vsub.f32 %v3160_v55, %v910_v5  ;;  %v973_v5 = vld [vmem:[#allocation4 + $0x10] sm:$0xff] }
 0x3c0   : > { %v959_v7 = vmul.f32 1.442695, %v949_v4 }
 0x3c1   : > { %v955_v8 = vmul.f32 1.442695, %v947_v6  ;;  %v925_v9 = vpop.permute.xlu1 %924 }
 0x3c2   : > { %2517 = vpow2.f32 %v959_v7  ;;  %v950_v10 = vsub.f32 %v3164_v57, %v925_v9  ;;  %v971_v7 = vld [vmem:[#allocation4] sm:$0xff] }
 0x3c3   : > { %2519 = vpow2.f32 %v955_v8  ;;  %v981_v8 = vmul.f32 %v3229_v60, %v973_v5  ;;  %v979_v28 = vmul.f32 %v3213_v45, %v971_v7  ;;  %v977_v45 = vld [vmem:[#allocation4 + $0x30] sm:$0xff] }
 0x3c4   : > { %v961_v11 = vmul.f32 1.442695, %v950_v10  ;;  %v974_v10 = vld [vmem:[#allocation4 + $0x18] sm:$0xff] }
 0x3c5   : > { %v915_v12 = vpop.permute.xlu1 %914 }
 0x3c6   : > { %2521 = vpow2.f32 %v961_v11  ;;  %v948_v13 = vsub.f32 %v3168_v59, %v915_v12  ;;  %v982_v12 = vmul.f32 %v3221_v50, %v974_v10 }
 0x3c8   : > { %v957_v14 = vmul.f32 1.442695, %v948_v13  ;;  %v972_v13 = vld [vmem:[#allocation4 + $0x8] sm:$0xff] }
 0x3ca   : > { %2523 = vpow2.f32 %v957_v14  ;;  %v940_v15 = vpop.permute.xlu1 %939 }
 0x3cb   : > { %v953_v54 = vsub.f32 %v3174_v62, %v940_v15 }
 0x3cc   : > { %v2518_v16 = vpop.eup %2517 }
 0x3cd   : > { %v2520_v17 = vpop.eup %2519  ;;  %v967_v55 = vmul.f32 1.442695, %v953_v54  ;;  %v993_v18 = vsel %vm850_vm1, %v2518_v16, 0.0  ;;  %v1039_v35 = vpop.permute.xlu0 %1038  ;;  %v980_v54 = vmul.f32 %v3232_v61, %v972_v13  ;;  %v978_v61 = vld [vmem:[#allocation4 + $0x38] sm:$0xff] }
 0x3ce   : > { %994 = vadd.xlane.f32.xlu0 %v993_v18  ;;  %v930_v19 = vpop.permute.xlu1 %929  ;;  %v987_v57 = vsel %vm850_vm1, %v2520_v17, 0.0  ;;  %v975_v18 = vld [vmem:[#allocation4 + $0x20] sm:$0xff] }
 0x3cf   : > { %2525 = vpow2.f32 %v967_v55  ;;  %v951_v20 = vsub.f32 %v3176_v63, %v930_v19  ;;  %988 = vadd.xlane.f32.xlu1 %v987_v57  ;;  %v983_v50 = vmul.f32 %v3235_v1, %v975_v18  ;;  %v1031_v1 = vld [vmem:[#allocation5 + $0x18] sm:$0xff] }
 0x3d0   : > { %v2522_v21 = vpop.eup %2521 }
 0x3d1   : > { %v963_v59 = vmul.f32 1.442695, %v951_v20  ;;  %v996_v22 = vsel %vm850_vm1, %v2522_v21, 0.0  ;;  %v1085_v23 = vpack.c.bf16 %v2522_v21, %v2518_v16  ;;  %v1054_v3 = vpop.permute.xlu0 %1053 }
 0x3d2   : > { %v935_v24 = vpop.permute.xlu1 %934 }
 0x3d3   : > { %2527 = vpow2.f32 %v963_v59  ;;  %v952_v62 = vsub.f32 %v3182_v2, %v935_v24  ;;  %997 = vadd.xlane.f32.xlu1 %v996_v22  ;;  %v976_v22 = vld [vmem:[#allocation4 + $0x28] sm:$0xff] }
 0x3d4   : > { %v2524_v25 = vpop.eup %2523  ;;  %v984_v24 = vmul.f32 %v3225_v58, %v976_v22 }
 0x3d5   : > { %v965_v26 = vmul.f32 1.442695, %v952_v62  ;;  %v990_v27 = vsel %vm850_vm1, %v2524_v25, 0.0  ;;  %v1084_v29 = vpack.c.bf16 %v2524_v25, %v2520_v17 }
 0x3d6   : > { %991 = vadd.xlane.f32.xlu0 %v990_v27  ;;  %v945_v30 = vpop.permute.xlu1 %944  ;;  %v1028_v27 = vld [vmem:[#allocation5] sm:$0xff] }
 0x3d7   : > { %2529 = vpow2.f32 %v965_v26  ;;  %v954_v63 = vsub.f32 %v3178_v0, %v945_v30  ;;  %2286 = vmatprep.mubr.msk.bf16.mxu1 %vm850_vm1, %v1084_v29  ;;  %v905_v0 = vmul.f32 1.442695, %v890_v46  ;;  %v3264_v4 = vpop.permute.xlu0 %1063  ;;  %v1030_v26 = vld [vmem:[#allocation5 + $0x10] sm:$0xff]  ;;  %v1029_v30 = vld [vmem:[#allocation5 + $0x8] sm:$0xff] }
 0x3d8   : > { %2287 = vmatmul.mubr.msk.bf16.vlgmr.msra.gmra.mrb[0].mxu1 %vm850_vm1, %v1085_v23 }
 0x3d9   : > { %v2526_v32 = vpop.eup %2525  ;;  %v969_v33 = vmul.f32 1.442695, %v954_v63  ;;  %v1076_v63 = vmul.f32 %v1039_v35, %v1028_v27 }
 0x3da   : > { %v1005_v36 = vsel %vm850_vm1, %v2526_v32, 0.0  ;;  %v1049_v34 = vpop.permute.xlu1 %1048 }
 0x3db   : > { %2531 = vpow2.f32 %v969_v33  ;;  %1006 = vadd.xlane.f32.xlu0 %v1005_v36  ;;  %v1078_v29 = vmul.f32 %v1049_v34, %v1030_v26  ;;  %v1079_v33 = vmul.f32 %v1054_v3, %v1031_v1 }
 0x3dc   : > { %2533 = vpow2.f32 %v905_v0 }
 0x3dd   : > { %v2528_v2 = vpop.eup %2527  ;;  %2535 = vpow2.f32 %v903_v52  ;;  %v1035_v52 = vld [vmem:[#allocation5 + $0x38] sm:$0xff] }
 0x3de   : > { %v999_v38 = vsel %vm850_vm1, %v2528_v2, 0.0  ;;  %v1044_v46 = vpop.permute.xlu1 %1043 }
 0x3df   : > { %1000 = vadd.xlane.f32.xlu0 %v999_v38  ;;  %v1077_v38 = vmul.f32 %v1044_v46, %v1029_v30 }
 0x3e1   : > { %v2530_v39 = vpop.eup %2529 }
 0x3e2   : > { %v1086_v42 = vpack.c.bf16 %v2530_v39, %v2528_v2  ;;  %v1002_v51 = vsel %vm850_vm1, %v2530_v39, 0.0  ;;  %v3266_v6 = vpop.permute.xlu1 %1058 }
 0x3e4   : > { %2290 = vmatprep.mubr.msk.bf16.mxu1 %vm850_vm1, %v1086_v42 }
 0x3e5   : > { %v2532_v43 = vpop.eup %2531 }
 0x3e6   : > { %v1008_v44 = vsel %vm850_vm1, %v2532_v43, 0.0  ;;  %v1087_v47 = vpack.c.bf16 %v2532_v43, %v2526_v32  ;;  %v2534_v53 = vpop.eup %2533 }
 0x3e7   : > { %1009 = vadd.xlane.f32.xlu1 %v1008_v44  ;;  %v2536_v56 = vpop.eup %2535  ;;  %v986_v21 = vmul.f32 %v2534_v53, %v978_v61  ;;  %v1034_v44 = vld [vmem:[#allocation5 + $0x30] sm:$0xff] }
 0x3e8   : > { %2291 = vmatmul.mubr.msk.bf16.gmra.mrb[4].mxu1 %vm850_vm1, %v1087_v47  ;;  %v985_v17 = vmul.f32 %v2536_v56, %v977_v45 }
 0x3eb   : > { %1003 = vadd.xlane.f32.xlu1 %v1002_v51  ;;  %v1032_v51 = vld [vmem:[#allocation5 + $0x20] sm:$0xff] }
 0x3ec   : > { %v1080_v35 = vmul.f32 %v3266_v6, %v1032_v51 }
 0x3f5   : > { %1073 = vperm.xlu0 %2499, %v2534_v53  }
 0x3fc   : > { %1068 = vperm.xlu1 %2500, %v2536_v56   ;;  %v1033_v56 = vld [vmem:[#allocation5 + $0x28] sm:$0xff] }
 0x45b   : > { %v995_v9 = vpop.xlane.xlu0 %994 }
 0x45c   : > { %v1013_v37 = vadd.f32 %v995_v9, %v981_v8  ;;  %v989_v31 = vpop.xlane.xlu1 %988  ;;  %v1081_v8 = vmul.f32 %v3264_v4, %v1033_v56 }
 0x45d   : > { %v1011_v11 = vadd.f32 %v989_v31, %v979_v28 }
 0x45e   : > { %1022 = vst.msk [vmem:[#allocation4 + $0x10] sm:$0xff] %vm1019_vm2, %v1013_v37 }
 0x45f   : > { %1020 = vst.msk [vmem:[#allocation4] sm:$0xff] %vm1019_vm2, %v1011_v11 }
 0x460   : > { %v998_v14 = vpop.xlane.xlu1 %997 }
 0x461   : > { %v1014_v15 = vadd.f32 %v998_v14, %v982_v12 }
 0x463   : > { %1023 = vst.msk [vmem:[#allocation4 + $0x18] sm:$0xff] %vm1019_vm2, %v1014_v15  ;;  %v992_v60 = vpop.xlane.xlu0 %991 }
 0x464   : > { %v1012_v16 = vadd.f32 %v992_v60, %v980_v54 }
 0x466   : > { %1021 = vst.msk [vmem:[#allocation4 + $0x8] sm:$0xff] %vm1019_vm2, %v1012_v16 }
 0x468   : > { %v1007_v55 = vpop.xlane.xlu0 %1006 }
 0x469   : > { %v1017_v19 = vadd.f32 %v1007_v55, %v985_v17 }
 0x46b   : > { %1026 = vst.msk [vmem:[#allocation4 + $0x30] sm:$0xff] %vm1019_vm2, %v1017_v19 }
 0x46c   : > { %v1001_v57 = vpop.xlane.xlu0 %1000 }
 0x46d   : > { %v1015_v20 = vadd.f32 %v1001_v57, %v983_v50 }
 0x46f   : > { %1024 = vst.msk [vmem:[#allocation4 + $0x20] sm:$0xff] %vm1019_vm2, %v1015_v20 }
 0x474   : > { %v1010_v59 = vpop.xlane.xlu1 %1009  ;;  %v1074_v53 = vpop.permute.xlu0 %1073 }
 0x475   : > { %v1018_v23 = vadd.f32 %v1010_v59, %v986_v21  ;;  %v1083_v46 = vmul.f32 %v1074_v53, %v1035_v52 }
 0x477   : > { %1027 = vst.msk [vmem:[#allocation4 + $0x38] sm:$0xff] %vm1019_vm2, %v1018_v23 }
 0x478   : > { %v1004_v62 = vpop.xlane.xlu1 %1003 }
 0x479   : > { %v1016_v25 = vadd.f32 %v1004_v62, %v984_v24 }
 0x47b   : > { %1025 = vst.msk [vmem:[#allocation4 + $0x28] sm:$0xff] %vm1019_vm2, %v1016_v25 }
 0x47c   : > { %v1069_v47 = vpop.permute.xlu1 %1068 }
 0x47d   : > { %v1082_v34 = vmul.f32 %v1069_v47, %v1034_v44 }
 0x4ab   : > { %v2288_v32 = vpop.f32.mrb[0].mxu1 }
 0x4ac   : > { %v1199_v36 = vadd.f32 %v2288_v32, %v1078_v29  ;;  %v1166_v2 = vpop.f32.mrb[1].mxu1 }
 0x4ad   : > { %v1197_v39 = vadd.f32 %v1166_v2, %v1076_v63  ;;  %v2289_v42 = vpop.f32.mrb[2].mxu1 }
 0x4ae   : > { %1207 = vst [vmem:[#allocation5 + $0x10] sm:$0xff] %v1199_v36  ;;  %v1200_v43 = vadd.f32 %v2289_v42, %v1079_v33  ;;  %v1169_v58 = vpop.f32.mrb[3].mxu1 }
 0x4af   : > { %1205 = vst [vmem:[#allocation5] sm:$0xff] %v1197_v39  ;;  %v1198_v0 = vadd.f32 %v1169_v58, %v1077_v38 }
 0x4b0   : > { %1208 = vst [vmem:[#allocation5 + $0x18] sm:$0xff] %v1200_v43 }
 0x4b1   : > { %1206 = vst [vmem:[#allocation5 + $0x8] sm:$0xff] %v1198_v0 }
 0x4bb   : > { %v2292_v3 = vpop.f32.mrb[4].mxu1 }
 0x4bc   : > { %v1203_v5 = vadd.f32 %v2292_v3, %v1082_v34  ;;  %v1182_v7 = vpop.f32.mrb[5].mxu1 }
 0x4bd   : > { %v1201_v9 = vadd.f32 %v1182_v7, %v1080_v35  ;;  %v2293_v28 = vpop.f32.mrb[6].mxu1 }
 0x4be   : > { %1211 = vst [vmem:[#allocation5 + $0x30] sm:$0xff] %v1203_v5  ;;  %v1204_v37 = vadd.f32 %v2293_v28, %v1083_v46  ;;  %v1185_v31 = vpop.f32.mrb[7].mxu1 }
 0x4bf   : > { %1209 = vst [vmem:[#allocation5 + $0x20] sm:$0xff] %v1201_v9  ;;  %v1202_v10 = vadd.f32 %v1185_v31, %v1081_v8 }
 0x4c0   : > { %1212 = vst [vmem:[#allocation5 + $0x38] sm:$0xff] %v1204_v37 }
 0x4c1   : > { %1210 = vst [vmem:[#allocation5 + $0x28] sm:$0xff] %v1202_v10 }
 0x4c2 PF: > { %p2134_p1 = scmp.ne.s32.totalorder %s3037_s21, 1 }
 0x4c3   : > { %2294 = vmatprep.subr.bf16.mxu0 (!%p2134_p1), %v3143_v41  ;;  %v1225_v6 = vld [vmem:[#allocation2] sm:$0xff] (!%p2134_p1)  ;;  %v1226_v4 = vld [vmem:[#allocation2 + $0x8] sm:$0xff] (!%p2134_p1)  ;;  %v1227_v11 = vld [vmem:[#allocation2 + $0x10] sm:$0xff] (!%p2134_p1)  ;;  %v1295_v12 = vlaneseq (!%p2134_p1)  ;;  %s2135_s29 = sshll.u32 (!%p2134_p1), %s3031_s2, 6  ;;  %v1315_v54 = vstv (!%p2134_p1), %s3121_s25  ;;  %vm1384_vm2 = vcmask (!%p2134_p1), 523264   ;;  %v2772_v56 = vmov (!%p2134_p1), 0  }
 0x4c4   : > { %1224 = sbr.rel (%p2134_p1) target bundleno = 1997 (0x7cd), region = 175  ;;  %2295 = vmatpush3.bf16.xpose.msra.mxu0 (!%p2134_p1), %v3143_v41  ;;  %2302 = vmatprep.mubr.bf16.mxu0 (!%p2134_p1), %v1225_v6  ;;  %v1228_v41 = vld [vmem:[#allocation2 + $0x18] sm:$0xff] (!%p2134_p1)  ;;  %v1304_v15 = vstv (!%p2134_p1), %s2135_s29  ;;  %v1378_v34 = vld [vmem:[#allocation3 + $0x10] sm:$0xff] (!%p2134_p1)  ;;  %v1376_v35 = vld [vmem:[#allocation3] sm:$0xff] (!%p2134_p1) }
 0x4c5   : > { %2296 = vmatprep.subr.bf16.mxu0 (!%p2134_p1), %v3147_v49  ;;  %v1296_v13 = vshrl.u32 (!%p2134_p1), %v1295_v12, 7  ;;  %2537 = vset.pattern.permute.xlu0 (!%p2134_p1), %v2772_v56  ;;  %v1379_v8 = vld [vmem:[#allocation3 + $0x18] sm:$0xff] (!%p2134_p1)  ;;  %v1377_v9 = vld [vmem:[#allocation3 + $0x8] sm:$0xff] (!%p2134_p1) }
 0x4c6   : > { %2538 = vset.pattern.permute.xlu1 (!%p2134_p1), %v2772_v56 }
 0x4c7   : > { %v1298_v14 = vadd.s32 (!%p2134_p1), 16, %v1296_v13  ;;  %v1297_v45 = vadd.s32 (!%p2134_p1), 8, %v1296_v13  ;;  %v1302_v18 = vadd.s32 (!%p2134_p1), 48, %v1296_v13  ;;  %v1300_v19 = vadd.s32 (!%p2134_p1), 32, %v1296_v13 }
 0x4c8   : > { %v1301_v20 = vadd.s32 (!%p2134_p1), 40, %v1296_v13  ;;  %v1303_v21 = vadd.s32 (!%p2134_p1), 56, %v1296_v13 }
 0x4c9   : > { %v1307_v60 = vadd.s32 (!%p2134_p1), %v1304_v15, %v1298_v14  ;;  %v1306_v55 = vadd.s32 (!%p2134_p1), %v1304_v15, %v1297_v45  ;;  %v1311_v57 = vadd.s32 (!%p2134_p1), %v1304_v15, %v1302_v18  ;;  %v1309_v61 = vadd.s32 (!%p2134_p1), %v1304_v15, %v1300_v19  ;;  %v1381_v14 = vld [vmem:[#allocation3 + $0x28] sm:$0xff] (!%p2134_p1) }
 0x4ca   : > { %v1310_v59 = vadd.s32 (!%p2134_p1), %v1304_v15, %v1301_v20  ;;  %v1312_v62 = vadd.s32 (!%p2134_p1), %v1304_v15, %v1303_v21  ;;  %v2540_v19 = vld [vmem:[%s3044_s6 + $0x8] sm:$0xff] (!%p2134_p1)  }
 0x4cb   : > { %vm1327_vm3 = vcmp.lt.s32.totalorder %v1307_v60, 64  ;;  %vm1326_vm10 = vcmp.lt.s32.totalorder %v1306_v55, 64 }
 0x4cc   : > { %2297 = vmatpush3.bf16.xpose.msra.mxu0 %v3147_v49  ;;  %v1314_v49 = vand.u32 127, %v1295_v12 }
 0x4cd   : > { %2298 = vmatprep.subr.bf16.mxu0 %v3141_v40 }
 0x4ce   : > { %v3295_v16 = vadd.s32 %v1315_v54, %v1314_v49  ;;  %v3371_v54 = vld [vmem:[#allocation3 + $0x30] sm:$0xff] }
 0x4d0   : > { %vm1333_vm4 = vcmp.lt.s32.totalorder %v3295_v16, 64  ;;  %vm1319_vm5 = vcmp.le.s32.totalorder %v3295_v16, %v1307_v60  ;;  %vm1318_vm15 = vcmp.le.s32.totalorder %v3295_v16, %v1306_v55  ;;  %v2539_v60 = vld [vmem:[%s3044_s6] sm:$0xff]  }
 0x4d1   : > { %vm1354_vm6 = vmand %vm1327_vm3, %vm1333_vm4  ;;  %vm1331_vm3 = vcmp.lt.s32.totalorder %v1311_v57, 64  ;;  %2310 = vmatprep.subr.bf16.mxu1 %v2539_v60 }
 0x4d2   : > { %vm3301_vm9 = vmor %vm1319_vm5, %vm1354_vm6  ;;  %2311 = vmatpush3.bf16.msra.mxu1 %v2539_v60 }
 0x4d3   : > { %vm1353_vm0 = vmand %vm1326_vm10, %vm1333_vm4  ;;  %2312 = vmatprep.subr.bf16.mxu1 %v2540_v19 }
 0x4d4   : > { %2299 = vmatpush3.bf16.xpose.msra.mxu0 %v3141_v40  ;;  %v1299_v40 = vadd.s32 24, %v1296_v13  ;;  %vm1361_vm6 = vmor %vm1318_vm15, %vm1353_vm0  ;;  %vm1322_vm15 = vcmp.le.s32.totalorder %v3295_v16, %v1310_v59 }
 0x4d5   : > { %2300 = vmatprep.subr.bf16.mxu0 %v3145_v48  ;;  %vm1358_vm10 = vmand %vm1331_vm3, %vm1333_vm4  ;;  %vm1324_vm3 = vcmp.le.s32.totalorder %v3295_v16, %v1312_v62 }
 0x4d6   : > { %v1308_v17 = vadd.s32 %v1304_v15, %v1299_v40  ;;  %2313 = vmatpush3.bf16.msra.mxu1 %v2540_v19 }
 0x4d8   : > { %vm1328_vm8 = vcmp.lt.s32.totalorder %v1308_v17, 64  ;;  %vm1320_vm13 = vcmp.le.s32.totalorder %v3295_v16, %v1308_v17 }
 0x4d9   : > { %vm1355_vm14 = vmand %vm1328_vm8, %vm1333_vm4  ;;  %vm1323_vm8 = vcmp.le.s32.totalorder %v3295_v16, %v1311_v57 }
 0x4da   : > { %vm1363_vm5 = vmor %vm1320_vm13, %vm1355_vm14  ;;  %vm1332_vm14 = vcmp.lt.s32.totalorder %v1312_v62, 64 }
 0x4db   : > { %vm3335_vm13 = vmor %vm1323_vm8, %vm1358_vm10 }
 0x4dc   : > { %2301 = vmatpush3.bf16.xpose.msra.mxu0 %v3145_v48  ;;  %v1305_v48 = vadd.s32 %v1304_v15, %v1296_v13 }
 0x4de   : > { %vm1325_vm7 = vcmp.lt.s32.totalorder %v1305_v48, 64  ;;  %vm1317_vm11 = vcmp.le.s32.totalorder %v3295_v16, %v1305_v48  ;;  %v3375_v48 = vld [vmem:[#allocation3 + $0x38] sm:$0xff] }
 0x4df   : > { %vm1352_vm12 = vmand %vm1325_vm7, %vm1333_vm4  ;;  %vm1329_vm7 = vcmp.lt.s32.totalorder %v1309_v61, 64 }
 0x4e0   : > { %vm1360_vm1 = vmor %vm1317_vm11, %vm1352_vm12  ;;  %vm1321_vm11 = vcmp.le.s32.totalorder %v3295_v16, %v1309_v61 }
 0x4e1   : > { %vm1356_vm12 = vmand %vm1329_vm7, %vm1333_vm4 }
 0x4e3   : > { %2303 = vmatmul.mubr.bf16.vlgmr.msra.gmra.mrb[0].mxu0 %v1226_v4 }
 0x4e4   : > { %2306 = vmatprep.mubr.bf16.mxu0 %v1227_v11 }
 0x4eb   : > { %2307 = vmatmul.mubr.bf16.gmra.mrb[4].mxu0 %v1228_v41  ;;  %v1380_v41 = vld [vmem:[#allocation3 + $0x20] sm:$0xff] }
 0x5b6   : > { %v2304_v22 = vpop.f32.mrb[0].mxu0 }
 0x5b7   : > { %v3316_v23 = vsel %vm3301_vm9, %v2304_v22, -1e+30  ;;  %v1263_v24 = vpop.f32.mrb[1].mxu0  ;;  %vm1330_vm9 = vcmp.lt.s32.totalorder %v1310_v59, 64 }
 0x5b8   : > { %v3318_v25 = vsel %vm1360_vm1, %v1263_v24, -1e+30  ;;  %v2305_v26 = vpop.f32.mrb[2].mxu0  ;;  %v1391_v27 = vsel %vm1384_vm2, %v3316_v23, -inf  ;;  %vm1357_vm0 = vmand %vm1330_vm9, %vm1333_vm4  ;;  %v2541_v24 = vld [vmem:[%s3044_s6 + $0x10] sm:$0xff]  }
 0x5b9   : > { %v3325_v1 = vsel %vm1363_vm5, %v2305_v26, -1e+30  ;;  %1392 = vmax.xlane.f32.xlu1 %v1391_v27  ;;  %v1266_v29 = vpop.f32.mrb[3].mxu0  ;;  %v1385_v30 = vsel %vm1384_vm2, %v3318_v25, -inf  ;;  %vm1364_vm1 = vmor %vm1321_vm11, %vm1356_vm12  ;;  %2314 = vmatprep.subr.bf16.mxu1 %v2541_v24 }
 0x5ba   : > { %v3329_v63 = vsel %vm1361_vm6, %v1266_v29, -1e+30  ;;  %1386 = vmax.xlane.f32.xlu0 %v1385_v30  ;;  %v1394_v33 = vsel %vm1384_vm2, %v3325_v1, -inf  ;;  %vm1359_vm5 = vmand %vm1332_vm14, %vm1333_vm4  ;;  %vm1553_vm4 = vcmask 7168   ;;  %2315 = vmatpush3.bf16.msra.mxu1 %v2541_v24  ;;  %v2542_v29 = vld [vmem:[%s3044_s6 + $0x18] sm:$0xff]  }
 0x5bb   : > { %v1388_v36 = vsel %vm1384_vm2, %v3329_v63, -inf  ;;  %vm1365_vm6 = vmor %vm1322_vm15, %vm1357_vm0  ;;  %2316 = vmatprep.subr.bf16.mxu1 %v2542_v29 }
 0x5bc   : > { %vm1367_vm7 = vmor %vm1324_vm3, %vm1359_vm5 }
 0x5bd   : > { %1395 = vmax.xlane.f32.xlu1 %v1394_v33 }
 0x5be   : > { %1389 = vmax.xlane.f32.xlu0 %v1388_v36  ;;  %v2308_v2 = vpop.f32.mrb[4].mxu0  ;;  %2317 = vmatpush3.bf16.msra.mxu1 %v2542_v29  ;;  %v1507_v29 = vld [vmem:[#allocation4 + $0x10] sm:$0xff] }
 0x5bf   : > { %v1279_v38 = vpop.f32.mrb[5].mxu0  ;;  %v3355_v0 = vsel %vm3335_vm13, %v2308_v2, -1e+30 }
 0x5c0   : > { %v3349_v39 = vsel %vm1364_vm1, %v1279_v38, -1e+30  ;;  %v2309_v42 = vpop.f32.mrb[6].mxu0  ;;  %v1403_v52 = vsel %vm1384_vm2, %v3355_v0, -inf }
 0x5c1   : > { %v1282_v43 = vpop.f32.mrb[7].mxu0  ;;  %v1397_v58 = vsel %vm1384_vm2, %v3349_v39, -inf  ;;  %v3361_v51 = vsel %vm1367_vm7, %v2309_v42, -1e+30 }
 0x5c2   : > { %v3357_v44 = vsel %vm1365_vm6, %v1282_v43, -1e+30  ;;  %1398 = vmax.xlane.f32.xlu0 %v1397_v58  ;;  %v1406_v53 = vsel %vm1384_vm2, %v3361_v51, -inf }
 0x5c3   : > { %v1400_v47 = vsel %vm1384_vm2, %v3357_v44, -inf }
 0x5c4   : > { %1401 = vmax.xlane.f32.xlu1 %v1400_v47 }
 0x5c6   : > { %1404 = vmax.xlane.f32.xlu0 %v1403_v52 }
 0x5c8   : > { %1407 = vmax.xlane.f32.xlu1 %v1406_v53 }
 0x646   : > { %v1393_v3 = vpop.xlane.xlu1 %1392 }
 0x647   : > { %v1411_v46 = vmax.f32 %v1378_v34, %v1393_v3  ;;  %v1387_v5 = vpop.xlane.xlu0 %1386 }
 0x648   : > { %v1409_v7 = vmax.f32 %v1376_v35, %v1387_v5 }
 0x649   : > { %1749 = vst.msk [vmem:[#allocation3 + $0x10] sm:$0xff] %vm1553_vm4, %v1411_v46  ;;  %1453 = vperm.xlu1 %2538, %v1411_v46   ;;  %v1419_v40 = vsub.f32 %v1378_v34, %v1411_v46 }
 0x64a   : > { %v1417_v28 = vsub.f32 %v1376_v35, %v1409_v7  ;;  %1747 = vst.msk [vmem:[#allocation3] sm:$0xff] %vm1553_vm4, %v1409_v7  ;;  %v1396_v37 = vpop.xlane.xlu1 %1395  ;;  %1443 = vperm.xlu0 %2537, %v1409_v7  }
 0x64b   : > { %v1412_v31 = vmax.f32 %v1379_v8, %v1396_v37  ;;  %v1390_v10 = vpop.xlane.xlu0 %1389  ;;  %v1429_v61 = vmul.f32 1.442695, %v1419_v40 }
 0x64c   : > { %v1425_v6 = vmul.f32 1.442695, %v1417_v28  ;;  %v1410_v4 = vmax.f32 %v1377_v9, %v1390_v10 }
 0x64d   : > { %v1420_v11 = vsub.f32 %v1379_v8, %v1412_v31  ;;  %1750 = vst.msk [vmem:[#allocation3 + $0x18] sm:$0xff] %vm1553_vm4, %v1412_v31  ;;  %1458 = vperm.xlu1 %2538, %v1412_v31  }
 0x64e   : > { %2543 = vpow2.f32 %v1425_v6  ;;  %1748 = vst.msk [vmem:[#allocation3 + $0x8] sm:$0xff] %vm1553_vm4, %v1410_v4  ;;  %v1418_v21 = vsub.f32 %v1377_v9, %v1410_v4 }
 0x64f   : > { %v1431_v12 = vmul.f32 1.442695, %v1420_v11  ;;  %v1399_v13 = vpop.xlane.xlu0 %1398 }
 0x650   : > { %v1413_v49 = vmax.f32 %v1380_v41, %v1399_v13  ;;  %v1427_v26 = vmul.f32 1.442695, %v1418_v21 }
 0x651   : > { %2545 = vpow2.f32 %v1431_v12  ;;  %1448 = vperm.xlu1 %2538, %v1410_v4   ;;  %v1402_v15 = vpop.xlane.xlu1 %1401 }
 0x652   : > { %1751 = vst.msk [vmem:[#allocation3 + $0x20] sm:$0xff] %vm1553_vm4, %v1413_v49  ;;  %v1414_v16 = vmax.f32 %v1381_v14, %v1402_v15  ;;  %v1421_v27 = vsub.f32 %v1380_v41, %v1413_v49 }
 0x653   : > { %v1405_v45 = vpop.xlane.xlu0 %1404 }
 0x654   : > { %v1422_v17 = vsub.f32 %v1381_v14, %v1414_v16  ;;  %1752 = vst.msk [vmem:[#allocation3 + $0x28] sm:$0xff] %vm1553_vm4, %v1414_v16  ;;  %v3379_v55 = vmax.f32 %v3371_v54, %v1405_v45  ;;  %v1433_v30 = vmul.f32 1.442695, %v1421_v27 }
 0x655   : > { %v1408_v18 = vpop.xlane.xlu1 %1407 }
 0x656   : > { %v1435_v50 = vmul.f32 1.442695, %v1422_v17  ;;  %v1423_v57 = vsub.f32 %v3371_v54, %v3379_v55  ;;  %1753 = vst.msk [vmem:[#allocation3 + $0x30] sm:$0xff] %vm1553_vm4, %v3379_v55  ;;  %v3387_v20 = vmax.f32 %v3375_v48, %v1408_v18  ;;  %1473 = vperm.xlu1 %2538, %v3379_v55  }
 0x658   : > { %v3390_v59 = vpop.eup %2543  ;;  %2547 = vpow2.f32 %v1435_v50  ;;  %v1424_v22 = vsub.f32 %v3375_v48, %v3387_v20  ;;  %1754 = vst.msk [vmem:[#allocation3 + $0x38] sm:$0xff] %vm1553_vm4, %v3387_v20 }
 0x659   : > { %1572 = vperm.xlu0 %2537, %v3390_v59   ;;  %2549 = vpow2.f32 %v1429_v61  ;;  %v1437_v61 = vmul.f32 1.442695, %v1423_v57 }
 0x65a   : > { %1463 = vperm.xlu1 %2538, %v1413_v49   ;;  %2551 = vpow2.f32 %v1427_v26 }
 0x65b   : > { %v3398_v62 = vpop.eup %2545  ;;  %2553 = vpow2.f32 %v1433_v30 }
 0x65d   : > { %1587 = vperm.xlu0 %2537, %v3398_v62  }
 0x65e   : > { %1468 = vperm.xlu1 %2538, %v1414_v16  }
 0x662   : > { %v3402_v32 = vpop.eup %2547  ;;  %1478 = vperm.xlu1 %2538, %v3387_v20  }
 0x663   : > { %1597 = vperm.xlu0 %2537, %v3402_v32   ;;  %v3406_v33 = vpop.eup %2549 }
 0x664   : > { %v3409_v36 = vpop.eup %2551 }
 0x665   : > { %v3412_v2 = vpop.eup %2553 }
 0x666   : > { %1582 = vperm.xlu1 %2538, %v3406_v33  }
 0x66a   : > { %1577 = vperm.xlu1 %2538, %v3409_v36  }
 0x66e   : > { %1592 = vperm.xlu1 %2538, %v3412_v2  }
 0x6c8   : > { %v1454_v38 = vpop.permute.xlu1 %1453 }
 0x6c9   : > { %v1483_v42 = vsub.f32 %v3316_v23, %v1454_v38  ;;  %v1444_v43 = vpop.permute.xlu0 %1443  ;;  %v1505_v38 = vld [vmem:[#allocation4] sm:$0xff] }
 0x6ca   : > { %v1481_v58 = vsub.f32 %v3318_v25, %v1444_v43  ;;  %v1513_v54 = vmul.f32 %v3390_v59, %v1505_v38  ;;  %v1511_v59 = vld [vmem:[#allocation4 + $0x30] sm:$0xff] }
 0x6cb   : > { %v1493_v47 = vmul.f32 1.442695, %v1483_v42  ;;  %v1515_v42 = vmul.f32 %v3406_v33, %v1507_v29 }
 0x6cc   : > { %v1489_v52 = vmul.f32 1.442695, %v1481_v58  ;;  %v1459_v53 = vpop.permute.xlu1 %1458  ;;  %v1508_v58 = vld [vmem:[#allocation4 + $0x18] sm:$0xff] }
 0x6cd   : > { %2555 = vpow2.f32 %v1493_v47  ;;  %v1484_v56 = vsub.f32 %v3325_v1, %v1459_v53  ;;  %v1506_v53 = vld [vmem:[#allocation4 + $0x8] sm:$0xff] }
 0x6ce   : > { %2557 = vpow2.f32 %v1489_v52  ;;  %v1516_v52 = vmul.f32 %v3398_v62, %v1508_v58 }
 0x6cf   : > { %v1495_v34 = vmul.f32 1.442695, %v1484_v56 }
 0x6d0   : > { %v1449_v35 = vpop.permute.xlu1 %1448 }
 0x6d1   : > { %2559 = vpow2.f32 %v1495_v34  ;;  %v1482_v3 = vsub.f32 %v3329_v63, %v1449_v35  ;;  %v1514_v35 = vmul.f32 %v3409_v36, %v1506_v53  ;;  %v1512_v36 = vld [vmem:[#allocation4 + $0x38] sm:$0xff] }
 0x6d3   : > { %v1491_v46 = vmul.f32 1.442695, %v1482_v3 }
 0x6d5   : > { %2561 = vpow2.f32 %v1491_v46  ;;  %v1474_v5 = vpop.permute.xlu1 %1473 }
 0x6d6   : > { %v1487_v23 = vsub.f32 %v3355_v0, %v1474_v5 }
 0x6d7   : > { %v2556_v7 = vpop.eup %2555 }
 0x6d8   : > { %v2558_v8 = vpop.eup %2557  ;;  %v1501_v25 = vmul.f32 1.442695, %v1487_v23  ;;  %v1527_v9 = vsel %vm1384_vm2, %v2556_v7, 0.0  ;;  %v1573_v20 = vpop.permute.xlu0 %1572  ;;  %v1509_v23 = vld [vmem:[#allocation4 + $0x20] sm:$0xff] }
 0x6d9   : > { %1528 = vadd.xlane.f32.xlu0 %v1527_v9  ;;  %v1464_v28 = vpop.permute.xlu1 %1463  ;;  %v1521_v1 = vsel %vm1384_vm2, %v2558_v8, 0.0  ;;  %v1517_v62 = vmul.f32 %v3412_v2, %v1509_v23  ;;  %v1565_v2 = vld [vmem:[#allocation5 + $0x18] sm:$0xff] }
 0x6da   : > { %2563 = vpow2.f32 %v1501_v25  ;;  %v1485_v37 = vsub.f32 %v3349_v39, %v1464_v28  ;;  %1522 = vadd.xlane.f32.xlu1 %v1521_v1  ;;  %v1510_v1 = vld [vmem:[#allocation4 + $0x28] sm:$0xff] }
 0x6db   : > { %v2560_v31 = vpop.eup %2559 }
 0x6dc   : > { %v1497_v63 = vmul.f32 1.442695, %v1485_v37  ;;  %v1530_v10 = vsel %vm1384_vm2, %v2560_v31, 0.0  ;;  %v1619_v14 = vpack.c.bf16 %v2560_v31, %v2556_v7  ;;  %v1588_v26 = vpop.permute.xlu0 %1587  ;;  %v1518_v31 = vmul.f32 %v3402_v32, %v1510_v1 }
 0x6dd   : > { %v1469_v6 = vpop.permute.xlu1 %1468 }
 0x6de   : > { %2565 = vpow2.f32 %v1497_v63  ;;  %v1486_v0 = vsub.f32 %v3357_v44, %v1469_v6  ;;  %1531 = vadd.xlane.f32.xlu1 %v1530_v10  ;;  %v1564_v6 = vld [vmem:[#allocation5 + $0x10] sm:$0xff] }
 0x6df   : > { %v2562_v4 = vpop.eup %2561 }
 0x6e0   : > { %v1499_v11 = vmul.f32 1.442695, %v1486_v0  ;;  %v1524_v41 = vsel %vm1384_vm2, %v2562_v4, 0.0  ;;  %v1618_v12 = vpack.c.bf16 %v2562_v4, %v2558_v8  ;;  %v1562_v0 = vld [vmem:[#allocation5] sm:$0xff] }
 0x6e1   : > { %1525 = vadd.xlane.f32.xlu0 %v1524_v41  ;;  %v1479_v13 = vpop.permute.xlu1 %1478  ;;  %v1610_v41 = vmul.f32 %v1573_v20, %v1562_v0 }
 0x6e2   : > { %2567 = vpow2.f32 %v1499_v11  ;;  %v1488_v39 = vsub.f32 %v3361_v51, %v1479_v13  ;;  %2318 = vmatprep.mubr.msk.bf16.mxu1 %vm1384_vm2, %v1618_v12  ;;  %v1439_v51 = vmul.f32 1.442695, %v1424_v22  ;;  %v3441_v27 = vpop.permute.xlu0 %1597  ;;  %v1563_v11 = vld [vmem:[#allocation5 + $0x8] sm:$0xff]  ;;  %v1613_v13 = vmul.f32 %v1588_v26, %v1565_v2 }
 0x6e3   : > { %2319 = vmatmul.mubr.msk.bf16.vlgmr.msra.gmra.mrb[0].mxu1 %vm1384_vm2, %v1619_v14 }
 0x6e4   : > { %v2564_v49 = vpop.eup %2563  ;;  %v1503_v15 = vmul.f32 1.442695, %v1488_v39 }
 0x6e5   : > { %v1539_v44 = vsel %vm1384_vm2, %v2564_v49, 0.0  ;;  %v1583_v48 = vpop.permute.xlu1 %1582 }
 0x6e6   : > { %2569 = vpow2.f32 %v1503_v15  ;;  %1540 = vadd.xlane.f32.xlu0 %v1539_v44  ;;  %v1612_v4 = vmul.f32 %v1583_v48, %v1564_v6 }
 0x6e7   : > { %2571 = vpow2.f32 %v1439_v51  ;;  %v1569_v51 = vld [vmem:[#allocation5 + $0x38] sm:$0xff] }
 0x6e8   : > { %v2566_v60 = vpop.eup %2565  ;;  %2573 = vpow2.f32 %v1437_v61 }
 0x6e9   : > { %v1533_v16 = vsel %vm1384_vm2, %v2566_v60, 0.0  ;;  %v1578_v22 = vpop.permute.xlu1 %1577 }
 0x6ea   : > { %1534 = vadd.xlane.f32.xlu0 %v1533_v16 }
 0x6ec   : > { %v2568_v40 = vpop.eup %2567 }
 0x6ed   : > { %v1620_v45 = vpack.c.bf16 %v2568_v40, %v2566_v60  ;;  %v1536_v50 = vsel %vm1384_vm2, %v2568_v40, 0.0  ;;  %v3443_v30 = vpop.permute.xlu1 %1592  ;;  %v1568_v40 = vld [vmem:[#allocation5 + $0x30] sm:$0xff] }
 0x6ef   : > { %2322 = vmatprep.mubr.msk.bf16.mxu1 %vm1384_vm2, %v1620_v45 }
 0x6f0   : > { %v2570_v17 = vpop.eup %2569 }
 0x6f1   : > { %v1542_v18 = vsel %vm1384_vm2, %v2570_v17, 0.0  ;;  %v1621_v19 = vpack.c.bf16 %v2570_v17, %v2564_v49  ;;  %v2572_v21 = vpop.eup %2571  ;;  %v1611_v49 = vmul.f32 %v1578_v22, %v1563_v11  ;;  %v1566_v17 = vld [vmem:[#allocation5 + $0x20] sm:$0xff] }
 0x6f2   : > { %1543 = vadd.xlane.f32.xlu1 %v1542_v18  ;;  %v2574_v24 = vpop.eup %2573  ;;  %v1520_v9 = vmul.f32 %v2572_v21, %v1512_v36  ;;  %v1614_v61 = vmul.f32 %v3443_v30, %v1566_v17 }
 0x6f3   : > { %2323 = vmatmul.mubr.msk.bf16.gmra.mrb[4].mxu1 %vm1384_vm2, %v1621_v19  ;;  %v1519_v46 = vmul.f32 %v2574_v24, %v1511_v59  ;;  %v1567_v19 = vld [vmem:[#allocation5 + $0x28] sm:$0xff] }
 0x6f4   : > { %v1615_v22 = vmul.f32 %v3441_v27, %v1567_v19 }
 0x6f6   : > { %1537 = vadd.xlane.f32.xlu1 %v1536_v50 }
 0x700   : > { %1607 = vperm.xlu0 %2537, %v2572_v21  }
 0x707   : > { %1602 = vperm.xlu1 %2538, %v2574_v24  }
 0x766   : > { %v1529_v43 = vpop.xlane.xlu0 %1528 }
 0x767   : > { %v1547_v55 = vadd.f32 %v1529_v43, %v1515_v42  ;;  %v1523_v57 = vpop.xlane.xlu1 %1522 }
 0x768   : > { %v1545_v47 = vadd.f32 %v1523_v57, %v1513_v54 }
 0x769   : > { %1556 = vst.msk [vmem:[#allocation4 + $0x10] sm:$0xff] %vm1553_vm4, %v1547_v55 }
 0x76a   : > { %1554 = vst.msk [vmem:[#allocation4] sm:$0xff] %vm1553_vm4, %v1545_v47 }
 0x76b   : > { %v1532_v56 = vpop.xlane.xlu1 %1531 }
 0x76c   : > { %v1548_v34 = vadd.f32 %v1532_v56, %v1516_v52 }
 0x76e   : > { %1557 = vst.msk [vmem:[#allocation4 + $0x18] sm:$0xff] %vm1553_vm4, %v1548_v34  ;;  %v1526_v33 = vpop.xlane.xlu0 %1525 }
 0x76f   : > { %v1546_v3 = vadd.f32 %v1526_v33, %v1514_v35 }
 0x771   : > { %1555 = vst.msk [vmem:[#allocation4 + $0x8] sm:$0xff] %vm1553_vm4, %v1546_v3 }
 0x773   : > { %v1541_v5 = vpop.xlane.xlu0 %1540 }
 0x774   : > { %v1551_v7 = vadd.f32 %v1541_v5, %v1519_v46 }
 0x776   : > { %1560 = vst.msk [vmem:[#allocation4 + $0x30] sm:$0xff] %vm1553_vm4, %v1551_v7 }
 0x777   : > { %v1535_v8 = vpop.xlane.xlu0 %1534 }
 0x778   : > { %v1549_v25 = vadd.f32 %v1535_v8, %v1517_v62 }
 0x77a   : > { %1558 = vst.msk [vmem:[#allocation4 + $0x20] sm:$0xff] %vm1553_vm4, %v1549_v25 }
 0x77f   : > { %v1544_v28 = vpop.xlane.xlu1 %1543  ;;  %v1608_v18 = vpop.permute.xlu0 %1607 }
 0x780   : > { %v1552_v37 = vadd.f32 %v1544_v28, %v1520_v9  ;;  %v1617_v24 = vmul.f32 %v1608_v18, %v1569_v51 }
 0x782   : > { %1561 = vst.msk [vmem:[#allocation4 + $0x38] sm:$0xff] %vm1553_vm4, %v1552_v37 }
 0x783   : > { %v1538_v63 = vpop.xlane.xlu1 %1537 }
 0x784   : > { %v1550_v10 = vadd.f32 %v1538_v63, %v1518_v31 }
 0x786   : > { %1559 = vst.msk [vmem:[#allocation4 + $0x28] sm:$0xff] %vm1553_vm4, %v1550_v10 }
 0x787   : > { %v1603_v45 = vpop.permute.xlu1 %1602 }
 0x788   : > { %v1616_v50 = vmul.f32 %v1603_v45, %v1568_v40 }
 0x7b6   : > { %v2320_v12 = vpop.f32.mrb[0].mxu1 }
 0x7b7   : > { %v1733_v14 = vadd.f32 %v2320_v12, %v1612_v4  ;;  %v1700_v39 = vpop.f32.mrb[1].mxu1 }
 0x7b8   : > { %v1731_v15 = vadd.f32 %v1700_v39, %v1610_v41  ;;  %v2321_v44 = vpop.f32.mrb[2].mxu1 }
 0x7b9   : > { %1741 = vst [vmem:[#allocation5 + $0x10] sm:$0xff] %v1733_v14  ;;  %v1734_v60 = vadd.f32 %v2321_v44, %v1613_v13  ;;  %v1703_v32 = vpop.f32.mrb[3].mxu1 }
 0x7ba   : > { %1739 = vst [vmem:[#allocation5] sm:$0xff] %v1731_v15  ;;  %v1732_v16 = vadd.f32 %v1703_v32, %v1611_v49 }
 0x7bb   : > { %1742 = vst [vmem:[#allocation5 + $0x18] sm:$0xff] %v1734_v60 }
 0x7bc   : > { %1740 = vst [vmem:[#allocation5 + $0x8] sm:$0xff] %v1732_v16 }
 0x7c6   : > { %v2324_v21 = vpop.f32.mrb[4].mxu1 }
 0x7c7   : > { %v1737_v48 = vadd.f32 %v2324_v21, %v1616_v50  ;;  %v1716_v20 = vpop.f32.mrb[5].mxu1 }
 0x7c8   : > { %v1735_v26 = vadd.f32 %v1716_v20, %v1614_v61  ;;  %v2325_v29 = vpop.f32.mrb[6].mxu1 }
 0x7c9   : > { %1745 = vst [vmem:[#allocation5 + $0x30] sm:$0xff] %v1737_v48  ;;  %v1738_v38 = vadd.f32 %v2325_v29, %v1617_v24  ;;  %v1719_v42 = vpop.f32.mrb[7].mxu1 }
 0x7ca   : > { %1743 = vst [vmem:[#allocation5 + $0x20] sm:$0xff] %v1735_v26  ;;  %v1736_v43 = vadd.f32 %v1719_v42, %v1615_v22 }
 0x7cb   : > { %1746 = vst [vmem:[#allocation5 + $0x38] sm:$0xff] %v1738_v38 }
 0x7cc   : > { %1744 = vst [vmem:[#allocation5 + $0x28] sm:$0xff] %v1736_v43 }
 0x7cd PF: > { %p2144_p2 = scmp.ne.s32.totalorder %s3040_s12, 1 }
 0x7ce   : > { %v1769_v30 = vld [vmem:[#allocation4 + $0x10] sm:$0xff] (!%p2144_p2)  ;;  %v1767_v54 = vld [vmem:[#allocation4] sm:$0xff] (!%p2144_p2)  ;;  %v1770_v55 = vld [vmem:[#allocation4 + $0x18] sm:$0xff] (!%p2144_p2)  ;;  %v2773_v57 = vmov (!%p2144_p2), 0  }
 0x7cf   : > { %1758 = sbr.rel (%p2144_p2) target bundleno = 2156 (0x86c), region = 179  ;;  %2576 = vset.pattern.permute.xlu1 (!%p2144_p2), %v2773_v57  ;;  %2575 = vset.pattern.permute.xlu0 (!%p2144_p2), %v2773_v57  ;;  %2577 = vrcp.f32 (!%p2144_p2), %v1769_v30  ;;  %v1768_v27 = vld [vmem:[#allocation4 + $0x8] sm:$0xff] (!%p2144_p2)  ;;  %v1771_v47 = vld [vmem:[#allocation4 + $0x20] sm:$0xff] (!%p2144_p2)  ;;  %v1774_v52 = vld [vmem:[#allocation4 + $0x38] sm:$0xff] (!%p2144_p2) }
 0x7d0   : > { %2579 = vrcp.f32 (!%p2144_p2), %v1767_v54  ;;  %v1772_v58 = vld [vmem:[#allocation4 + $0x28] sm:$0xff] (!%p2144_p2)  ;;  %v1773_v53 = vld [vmem:[#allocation4 + $0x30] sm:$0xff] (!%p2144_p2)  ;;  %v1762_v8 = vld [vmem:[#allocation5 + $0x18] sm:$0xff] (!%p2144_p2) }
 0x7d1   : > { %2581 = vrcp.f32 (!%p2144_p2), %v1770_v55  ;;  %v1761_v62 = vld [vmem:[#allocation5 + $0x10] sm:$0xff] (!%p2144_p2)  ;;  %v1759_v25 = vld [vmem:[#allocation5] sm:$0xff] (!%p2144_p2)  ;;  %v1760_v36 = vld [vmem:[#allocation5 + $0x8] sm:$0xff] (!%p2144_p2) }
 0x7d2   : > { %2583 = vrcp.f32 (!%p2144_p2), %v1768_v27  ;;  %v1763_v0 = vld [vmem:[#allocation5 + $0x20] sm:$0xff] (!%p2144_p2)  ;;  %v1766_v13 = vld [vmem:[#allocation5 + $0x38] sm:$0xff] (!%p2144_p2)  ;;  %v1765_v14 = vld [vmem:[#allocation5 + $0x30] sm:$0xff] (!%p2144_p2) }
 0x7d3   : > { %2585 = vrcp.f32 (!%p2144_p2), %v1772_v58  ;;  %v1764_v10 = vld [vmem:[#allocation5 + $0x28] sm:$0xff] (!%p2144_p2) }
 0x7d4   : > { %2587 = vrcp.f32 (!%p2144_p2), %v1771_v47 }
 0x7d5   : > { %2589 = vrcp.f32 (!%p2144_p2), %v1774_v52 }
 0x7d6   : > { %2591 = vrcp.f32 %v1773_v53 }
 0x7d9   : > { %v2578_v56 = vpop.eup %2577 }
 0x7da   : > { %v2580_v34 = vpop.eup %2579  ;;  %1795 = vperm.xlu1 %2576, %v2578_v56  }
 0x7db   : > { %v2582_v35 = vpop.eup %2581  ;;  %1785 = vperm.xlu0 %2575, %v2580_v34  }
 0x7dc   : > { %v2584_v33 = vpop.eup %2583 }
 0x7dd   : > { %v2586_v3 = vpop.eup %2585 }
 0x7de   : > { %1800 = vperm.xlu1 %2576, %v2582_v35   ;;  %v2588_v59 = vpop.eup %2587 }
 0x7df   : > { %1790 = vperm.xlu0 %2575, %v2584_v33   ;;  %v2590_v46 = vpop.eup %2589 }
 0x7e0   : > { %v2592_v5 = vpop.eup %2591 }
 0x7e2   : > { %1810 = vperm.xlu1 %2576, %v2586_v3  }
 0x7e3   : > { %1805 = vperm.xlu0 %2575, %v2588_v59  }
 0x7e6   : > { %1820 = vperm.xlu1 %2576, %v2590_v46  }
 0x7e7   : > { %1815 = vperm.xlu0 %2575, %v2592_v5  }
 0x859   : > { %v1796_v23 = vpop.permute.xlu1 %1795 }
 0x85a   : > { %v1786_v7 = vpop.permute.xlu0 %1785  ;;  %v1825_v28 = vmul.f32 %v1796_v23, %v1761_v62 }
 0x85b   : > { %v1823_v31 = vmul.f32 %v1786_v7, %v1759_v25 }
 0x85d   : > { %v1801_v9 = vpop.permute.xlu1 %1800 }
 0x85e   : > { %v1826_v1 = vmul.f32 %v1801_v9, %v1762_v8  ;;  %v1791_v37 = vpop.permute.xlu0 %1790 }
 0x85f   : > { %v1824_v63 = vmul.f32 %v1791_v37, %v1760_v36 }
 0x860   : > { %v2209_v6 = vpack.c.bf16 %v1826_v1, %v1825_v28 }
 0x861   : > { %v2204_v2 = vpack.c.bf16 %v1824_v63, %v1823_v31  ;;  %v1811_v4 = vpop.permute.xlu1 %1810 }
 0x862   : > { %2227 = vst [vmem:[%s3046_s19 + $0x8] sm:$0xff] %v2209_v6   ;;  %v1828_v11 = vmul.f32 %v1811_v4, %v1764_v10  ;;  %v1806_v41 = vpop.permute.xlu0 %1805 }
 0x863   : > { %2205 = vst [vmem:[%s3046_s19] sm:$0xff] %v2204_v2   ;;  %v1827_v12 = vmul.f32 %v1806_v41, %v1763_v0 }
 0x865   : > { %v2214_v39 = vpack.c.bf16 %v1828_v11, %v1827_v12  ;;  %v1821_v49 = vpop.permute.xlu1 %1820 }
 0x866   : > { %v1830_v15 = vmul.f32 %v1821_v49, %v1766_v13  ;;  %v1816_v44 = vpop.permute.xlu0 %1815 }
 0x867   : > { %2228 = vst [vmem:[%s3046_s19 + $0x10] sm:$0xff] %v2214_v39   ;;  %v1829_v60 = vmul.f32 %v1816_v44, %v1765_v14 }
 0x869   : > { %v2219_v32 = vpack.c.bf16 %v1830_v15, %v1829_v60 }
 0x86b   : > { %2229 = vst [vmem:[%s3046_s19 + $0x18] sm:$0xff] %v2219_v32  }
 0x86c PF: > { %1877 = sbr.rel (!%p2983_p7) target bundleno = 2177 (0x881), region = 183  ;;  %s3587_s2 = sld [smem:[#allocation20_spill]] (%p2983_p7)  ;;  %v1901_v16 = vld [vmem:[%s3046_s19] sm:$0xf] (%p2983_p7)  ;;  %v1903_v40 = vld [vmem:[%s3046_s19 + $0x4] sm:$0xf] (%p2983_p7) }
 0x86d   : > { %s3588_s21 = sld [smem:[#allocation22_spill]] (%p2983_p7)  ;;  %s3589_s12 = sld [smem:[#allocation21_spill]] (%p2983_p7)  ;;  %v1905_v45 = vld [vmem:[%s3046_s19 + $0x8] sm:$0xf] (%p2983_p7)  ;;  %v1907_v17 = vld [vmem:[%s3046_s19 + $0xc] sm:$0xf] (%p2983_p7) }
 0x86e   : > { %v1909_v51 = vld [vmem:[%s3046_s19 + $0x10] sm:$0xf] (%p2983_p7)  ;;  %v1911_v18 = vld [vmem:[%s3046_s19 + $0x14] sm:$0xf] (%p2983_p7)  ;;  %s3590_s5 = sld [smem:[#allocation32_spill]] (%p2983_p7) }
 0x872   : > { %s1878_s6 = sld [smem:[#allocation7 + %s3587_s2]] (%p2983_p7)  ;;  %v1913_v19 = vld [vmem:[%s3046_s19 + $0x18] sm:$0xf] (%p2983_p7)  ;;  %v1915_v50 = vld [vmem:[%s3046_s19 + $0x1c] sm:$0xf] (%p2983_p7) }
 0x873   : > { %s2156_s27 = sshll.u32 %s3588_s21, 5 }
 0x878   : > { %s2168_s24 = sshll.u32 %s1878_s6, 4 }
 0x879   : > { %s1881_s22 = sadd.s32 %s3589_s12, %s2168_s24 }
 0x87a   : > { %s1883_s14 = sadd.s32 %s2156_s27, %s1881_s22 }
 0x87b   : > { %s2157_s23 = sshll.u32 %s1883_s14, 2 }
 0x87c   : > { %s1885_s3 = scalar_lea.vmem %s3590_s5, %s2157_s23 }
 0x87d   : > { %1902 = vst [vmem:[%s1885_s3] sm:$0xf] %v1901_v16  ;;  %1904 = vst [vmem:[%s1885_s3 + $0x8] sm:$0xf] %v1903_v40 }
 0x87e   : > { %1906 = vst [vmem:[%s1885_s3 + $0x10] sm:$0xf] %v1905_v45  ;;  %1908 = vst [vmem:[%s1885_s3 + $0x18] sm:$0xf] %v1907_v17 }
 0x87f   : > { %1910 = vst [vmem:[%s1885_s3 + $0x20] sm:$0xf] %v1909_v51  ;;  %1912 = vst [vmem:[%s1885_s3 + $0x28] sm:$0xf] %v1911_v18 }
 0x880   : > { %1914 = vst [vmem:[%s1885_s3 + $0x30] sm:$0xf] %v1913_v19  ;;  %1916 = vst [vmem:[%s1885_s3 + $0x38] sm:$0xf] %v1915_v50 }
 0x881 PF: > { %s37_s0 = sadd.s32 1, %s2761_s0   ;;  %s3592_s29 = sld [smem:[#allocation18_spill]] }
 0x882   : > { %p3483_p3 = scmp.ge.s32.totalorder %s37_s0, 14   ;;  %s3593_s19 = sld [smem:[#allocation27_spill]] }
 0x883   : > { %s3594_s18 = sld [smem:[#allocation26_spill]]  ;;  %s3595_s9 = sld [smem:[#allocation23_spill]] }
 0x884   : > { %s3596_s20 = sld [smem:[#allocation24_spill]]  ;;  %s3597_s2 = sld [smem:[#allocation25_spill]] }
 0x885   : > { %s3598_s3 = smov %s2709_s26  ;;  %s3599_s26 = smov %s2994_s30 }
 0x886   : > { %s3600_s27 = smov %s2717_s28  ;;  %s3601_s28 = smov %s2988_s1 }
 0x887   : > { %s3603_s10 = smov %s2733_s11  ;;  %s3605_s12 = smov %s2749_s15 }
 0x888   : > { %s3602_s30 = smov %s3593_s19  ;;  %s3606_s13 = smov %s2753_s16 }
 0x889   : > { %s3604_s11 = smov %s3594_s18  ;;  %s3607_s14 = smov %s2757_s17 }
 0x88a   : > { %s3608_s15 = smov %s3595_s9  ;;  %s3609_s16 = smov %s3596_s20 }
 0x88b   : > { %s3610_s17 = smov %s3597_s2  ;;  %36 = sbr.rel (!%p3483_p3) target bundleno = 57 (0x39), region = 275 }

</bundles_post_ra>
